<compile_context>
chip_gen: v6e
topology: v6e:2x2x1
jax: 0.10.0
libtpu: 0.0.40
codegen_flags: <defaults>
</compile_context>

<pallas_src>
import math

import jax
import jax.numpy as jnp
from jax.experimental import pallas as pl
from jax.experimental.pallas import tpu as pltpu

_BN_EPS = 1e-5


def _fold_bn(gamma, beta, mean, var):
    scale = gamma / jnp.sqrt(var + _BN_EPS)
    bias = beta - mean * scale
    return scale, bias


def _vmem_capacity_bytes():
    """Physical VMEM of the attached TPU (fallback: v7x-sized 64 MiB)."""
    try:
        info = pltpu.get_tpu_info()
        cap = int(getattr(info, "vmem_capacity_bytes", 0) or 0)
        if cap > 0:
            return cap
    except Exception:
        pass
    return 64 * 1024 * 1024


def _pick_band_rows(N, H, W, cin, c1, c2, budget_bytes):
    """Largest H row-band (divisor of H, 8-aligned or full-H) whose working set
    fits the VMEM budget.  Counts the double-buffered in/out blocks *and* the
    in-kernel px/acc/lane-pack temporaries.  Also guarantees >=2 grid steps so
    a 2-TensorCore part (v7x) never runs single-step."""
    c_out = c1 + c2
    cands = [d for d in range(1, H + 1) if H % d == 0 and (d % 8 == 0 or d == H)]

    def need(th):
        return 4 * (
            2 * (th + 2) * W * cin                        # input band + 2 halo rows, 2 bufs
            + 2 * th * W * c_out                          # output slab, 2 bufs
            + 6 * (th + 2) * (W + 2) * max(c1, c2, 1)     # px pieces / padded px / acc temps
            + 3 * th * W * c_out)                         # concat + lane-pack copies

    fitting = [d for d in cands if need(d) <= budget_bytes]
    th = max(fitting) if fitting else min(cands)
    if N * (H // th) < 2:                                 # keep both v7x cores busy
        smaller = [d for d in fitting if d < th] or [d for d in cands if d < th]
        if smaller:
            th = max(smaller)
    return th


def _make_fused_kernel(TH, W, Cin, C1, C2):
    C_OUT = C1 + C2
    use_mxu = Cin >= 64 and C1 >= 64

    def conv1x1(x, w1_ref, b1_ref):
        """primary 1x1 conv (+ folded BN scale) + bias + ReLU6 on an (R, W, Cin) piece."""
        if use_mxu:
            # realistic channel counts: bf16 operands on the MXU, f32 accumulation.
            R = x.shape[0]
            p = jnp.dot(x.reshape(R * W, Cin).astype(jnp.bfloat16),
                        w1_ref[...].astype(jnp.bfloat16),
                        preferred_element_type=jnp.float32).reshape(R, W, C1)
        else:
            # tiny channel counts (this test): plain VPU FMAs, keep the MXU idle.
            w1 = w1_ref[...]
            p = jnp.zeros(x.shape[:2] + (C1,), jnp.float32)
            for c in range(Cin):                     # static unroll; Cin is small here
                p = p + x[:, :, c:c + 1] * w1[c:c + 1, :]
        return jnp.clip(p + b1_ref[...], 0.0, 6.0)

    def kernel(x_main_ref, x_top_ref, x_bot_ref, w1_ref, b1_ref, wdw_ref, b2_ref,
               o_ref):
        i = pl.program_id(1)                         # H-band index
        nb = pl.num_programs(1)

        # Primary map, computed piecewise (no raw-input concat copy).
        px_main = conv1x1(x_main_ref[0], w1_ref, b1_ref)          # (TH, W, C1)
        # Halo rows: valid neighbouring rows for interior bands; the depthwise
        # must see zeros (not relu6(bias)) where they fall outside the image,
        # so gate them with a scalar multiply (first / last band only).
        px_top = conv1x1(x_top_ref[0], w1_ref, b1_ref) * (i > 0).astype(jnp.float32)
        px_bot = conv1x1(x_bot_ref[0], w1_ref, b1_ref) * (i < nb - 1).astype(jnp.float32)

        if C2 > 0:
            # ---- cheap: 3x3 depthwise conv (+ folded BN), bias, ReLU6 --------
            px_full = jnp.concatenate([px_top, px_main, px_bot], axis=0)  # (TH+2, W, C1)
            zcol = jnp.zeros((TH + 2, 1, C1), jnp.float32)
            px_p = jnp.concatenate([zcol, px_full, zcol], axis=1)         # (TH+2, W+2, C1)
            wdw = wdw_ref[...]                        # (9, C2), index [dy*3+dx, c]
            acc = jnp.zeros((TH, W, C2), jnp.float32) + b2_ref[...]
            for dy in range(3):
                band = px_p[dy:dy + TH]               # leading-dim slice: cheap
                for dx in range(3):
                    k = dy * 3 + dx
                    acc = acc + band[:, dx:dx + W, :] * wdw[k:k + 1, :]
            out = jnp.concatenate([px_main, jnp.clip(acc, 0.0, 6.0)], axis=-1)
        else:
            out = px_main

        # Single lane-dense store: (TH, W*c_out) slab (128 lanes at this shape).
        o_ref[0] = out.reshape(TH, W * C_OUT).astype(o_ref.dtype)

    return kernel


def init_ghost_conv_params(key, c_in, c_out, ratio=2):
    """Deterministic synthetic parameters (shapes follow GhostConv.__init__)."""
    init_ch = min(c_out, math.ceil(c_out / ratio))
    cheap_ch = c_out - init_ch
    if cheap_ch not in (0, init_ch):
        # TODO(synk): depthwise channel multiplier > 1 not implemented.
        raise NotImplementedError("only depthwise multiplier 1 supported")

    ks = jax.random.split(key, 10)
    params = {
        # primary 1x1 conv weight, stored as (c_in, init_ch) for the matmul
        "w_primary": jax.random.normal(ks[0], (c_in, init_ch), jnp.float32) * 0.3,
        "bn1_gamma": jax.random.uniform(ks[1], (init_ch,), jnp.float32, 0.5, 1.5),
        "bn1_beta": jax.random.normal(ks[2], (init_ch,), jnp.float32) * 0.1,
        "bn1_mean": jax.random.normal(ks[3], (init_ch,), jnp.float32) * 0.1,
        "bn1_var": jax.random.uniform(ks[4], (init_ch,), jnp.float32, 0.5, 1.5),
        "cheap_ch": cheap_ch,
        "init_ch": init_ch,
    }
    if cheap_ch > 0:
        # depthwise 3x3 weight stored as (9, cheap_ch): [dy*3+dx, c]
        params.update({
            "w_cheap": jax.random.normal(ks[5], (9, cheap_ch), jnp.float32) * 0.3,
            "bn2_gamma": jax.random.uniform(ks[6], (cheap_ch,), jnp.float32, 0.5, 1.5),
            "bn2_beta": jax.random.normal(ks[7], (cheap_ch,), jnp.float32) * 0.1,
            "bn2_mean": jax.random.normal(ks[8], (cheap_ch,), jnp.float32) * 0.1,
            "bn2_var": jax.random.uniform(ks[9], (cheap_ch,), jnp.float32, 0.5, 1.5),
        })
    return params


def ghost_conv_forward_nhwc(x_nhwc, params, band_rows=None, out_dtype=jnp.float32):
    """GhostConv forward (defaults k=1, s=1, dw_size=3). NHWC in / NHWC out."""
    N, H, W, Cin = x_nhwc.shape
    C1 = params["init_ch"]
    C2 = params["cheap_ch"]
    c_out = C1 + C2
    if C2 not in (0, C1):
        # TODO(synk): depthwise channel multiplier > 1 not implemented.
        raise NotImplementedError("only depthwise multiplier 1 supported")

    x = x_nhwc.astype(jnp.float32)

    # Fold the BatchNorm scale into the conv weights; only bias + clip stay
    # in-kernel.
    scale1, bias1 = _fold_bn(params["bn1_gamma"], params["bn1_beta"],
                             params["bn1_mean"], params["bn1_var"])
    w1 = (params["w_primary"] * scale1[None, :]).astype(jnp.float32)
    b1 = bias1.reshape(1, C1).astype(jnp.float32)
    if C2 > 0:
        scale2, bias2 = _fold_bn(params["bn2_gamma"], params["bn2_beta"],
                                 params["bn2_mean"], params["bn2_var"])
        wdw = (params["w_cheap"] * scale2[None, :]).astype(jnp.float32)
        b2 = bias2.reshape(1, C2).astype(jnp.float32)
    else:
        wdw = jnp.zeros((9, 1), jnp.float32)
        b2 = jnp.zeros((1, 1), jnp.float32)
    C2w = max(C2, 1)

    vmem_cap = _vmem_capacity_bytes()
    TH = band_rows if band_rows is not None else _pick_band_rows(
        N, H, W, Cin, C1, C2, budget_bytes=vmem_cap // 4)
    assert H % TH == 0, (H, TH)
    n_hb = H // TH

    out_flat = pl.pallas_call(
        _make_fused_kernel(TH, W, Cin, C1, C2),
        # Lane-dense output layout: (N, H, W*c_out); reshaped back for free below.
        out_shape=jax.ShapeDtypeStruct((N, H, W * c_out), out_dtype),
        grid=(N, n_hb),
        in_specs=[
            # main band: rows [i*TH, i*TH+TH) of the *unpadded* input
            pl.BlockSpec((1, TH, W, Cin), lambda n, i: (n, i, 0, 0)),
            # top / bottom halo rows (clamped at the image border; the kernel
            # zeroes their px contribution there, so the clamped values are
            # never consumed).  These are ~100-byte DMAs (descriptor overhead
            # only) in exchange for dropping the padded-input HBM copy.
            pl.BlockSpec((1, 1, W, Cin),
                         lambda n, i: (n, jnp.maximum(i * TH - 1, 0), 0, 0)),
            pl.BlockSpec((1, 1, W, Cin),
                         lambda n, i: (n, jnp.minimum(i * TH + TH, H - 1), 0, 0)),
            pl.BlockSpec((Cin, C1), lambda n, i: (0, 0)),
            pl.BlockSpec((1, C1), lambda n, i: (0, 0)),
            pl.BlockSpec((9, C2w), lambda n, i: (0, 0)),
            pl.BlockSpec((1, C2w), lambda n, i: (0, 0)),
        ],
        out_specs=pl.BlockSpec((1, TH, W * c_out), lambda n, i: (n, i, 0)),
        compiler_params=pltpu.CompilerParams(
            dimension_semantics=("parallel", "parallel"),
            vmem_limit_bytes=min(int(vmem_cap * 0.7), 96 * 1024 * 1024)),
    )(x, x, x, w1, b1, wdw, b2)

    return out_flat.reshape(N, H, W, c_out)


def ghost_conv_forward(x_nchw, params, band_rows=None):
    """NCHW adapter for parity with the PyTorch module.
    TODO(synk): production callers should use ghost_conv_forward_nhwc directly
    to avoid these two interface transposes (each a full HBM round trip)."""
    x_nhwc = jnp.transpose(x_nchw, (0, 2, 3, 1))
    y_nhwc = ghost_conv_forward_nhwc(x_nhwc, params, band_rows=band_rows)
    return jnp.transpose(y_nhwc, (0, 3, 1, 2))


# ---------------------------------------------------------------------------
# Pure-JAX reference (independent of the Pallas kernel) for verification.
# ---------------------------------------------------------------------------
def ghost_conv_reference(x_nchw, params):
    N, Cin, H, W = x_nchw.shape
    init_ch = params["init_ch"]
    cheap_ch = params["cheap_ch"]

    x_nhwc = jnp.transpose(x_nchw, (0, 2, 3, 1)).astype(jnp.float32)
    scale1, bias1 = _fold_bn(params["bn1_gamma"], params["bn1_beta"],
                             params["bn1_mean"], params["bn1_var"])
    px = jnp.clip(x_nhwc.reshape(-1, Cin) @ params["w_primary"] * scale1 + bias1,
                  0.0, 6.0).reshape(N, H, W, init_ch)

    if cheap_ch > 0:
        scale2, bias2 = _fold_bn(params["bn2_gamma"], params["bn2_beta"],
                                 params["bn2_mean"], params["bn2_var"])
        w_oihw = params["w_cheap"].T.reshape(cheap_ch, 1, 3, 3)
        px_nchw = jnp.transpose(px, (0, 3, 1, 2))
        cx_nchw = jax.lax.conv_general_dilated(
            px_nchw, w_oihw, (1, 1), "SAME",
            dimension_numbers=("NCHW", "OIHW", "NCHW"),
            feature_group_count=init_ch)
        cx = jnp.clip(jnp.transpose(cx_nchw, (0, 2, 3, 1)) * scale2 + bias2,
                      0.0, 6.0)
        y_nhwc = jnp.concatenate([px, cx], axis=-1)
    else:
        y_nhwc = px
    return jnp.transpose(y_nhwc, (0, 3, 1, 2))


if __name__ == "__main__":
    key = jax.random.PRNGKey(0)
    k_x, k_p = jax.random.split(key)

    # GhostConv(c_in=4, c_out=8): init_ch=4, cheap_ch=4
    N, C_IN, C_OUT, H, W = 2, 4, 8, 16, 16
    x = jax.random.normal(k_x, (N, C_IN, H, W), jnp.float32)
    params = init_ghost_conv_params(k_p, C_IN, C_OUT)

    y_ref = ghost_conv_reference(x, params)

    # Auto-picked band size.
    y = jax.block_until_ready(ghost_conv_forward(x, params))
    assert y.shape == (N, C_OUT, H, W), y.shape
    assert jnp.allclose(y, y_ref, atol=1e-4, rtol=1e-4), \
        float(jnp.max(jnp.abs(y - y_ref)))

    # Explicit 2-band tiling to exercise the clamped inter-band halo path.
    y8 = jax.block_until_ready(ghost_conv_forward(x, params, band_rows=8))
    assert jnp.allclose(y8, y_ref, atol=1e-4, rtol=1e-4), \
        float(jnp.max(jnp.abs(y8 - y_ref)))

    print("KERNEL_OK")
</pallas_src>

<mosaic_0001>
module attributes {stable_mosaic.version = 11 : i64} {
  func.func @kernel(%arg0: i32, %arg1: i32, %arg2: memref<1x16x16x4xf32, #tpu.memory_space<vmem>>, %arg3: memref<1x1x16x4xf32, #tpu.memory_space<vmem>>, %arg4: memref<1x1x16x4xf32, #tpu.memory_space<vmem>>, %arg5: memref<4x4xf32, #tpu.memory_space<vmem>>, %arg6: memref<1x4xf32, #tpu.memory_space<vmem>>, %arg7: memref<9x4xf32, #tpu.memory_space<vmem>>, %arg8: memref<1x4xf32, #tpu.memory_space<vmem>>, %arg9: memref<1x16x128xf32, #tpu.memory_space<vmem>>) attributes {dimension_semantics = [#tpu.dimension_semantics<parallel>, #tpu.dimension_semantics<parallel>], iteration_bounds = array<i64: 2, 1>, scalar_prefetch = 0 : i64, scratch_operands = 0 : i64, tpu.core_type = #tpu.core_type<tc>, window_params = [{transform_indices = @transform_0, window_bounds = array<i64: 1, 16, 16, 4>}, {transform_indices = @transform_1, window_bounds = array<i64: 1, 1, 16, 4>}, {transform_indices = @transform_2, window_bounds = array<i64: 1, 1, 16, 4>}, {pipeline_mode = #tpu.pipeline_mode<synchronous>, transform_indices = @transform_3, window_bounds = array<i64: 4, 4>}, {pipeline_mode = #tpu.pipeline_mode<synchronous>, transform_indices = @transform_4, window_bounds = array<i64: 1, 4>}, {pipeline_mode = #tpu.pipeline_mode<synchronous>, transform_indices = @transform_5, window_bounds = array<i64: 9, 4>}, {pipeline_mode = #tpu.pipeline_mode<synchronous>, transform_indices = @transform_6, window_bounds = array<i64: 1, 4>}, {transform_indices = @transform_7, window_bounds = array<i64: 1, 16, 128>}]} {
    %c0 = arith.constant 0 : index
    %c0_0 = arith.constant 0 : index
    %c0_1 = arith.constant 0 : index
    %c0_2 = arith.constant 0 : index
    %0 = vector.load %arg2[%c0, %c0_0, %c0_1, %c0_2] : memref<1x16x16x4xf32, #tpu.memory_space<vmem>>, vector<1x16x16x4xf32>
    %1 = vector.shape_cast %0 : vector<1x16x16x4xf32> to vector<16x16x4xf32>
    %c0_3 = arith.constant 0 : index
    %c0_4 = arith.constant 0 : index
    %2 = vector.load %arg5[%c0_3, %c0_4] : memref<4x4xf32, #tpu.memory_space<vmem>>, vector<4x4xf32>
    %cst = arith.constant 0.000000e+00 : f32
    %3 = vector.broadcast %cst : f32 to vector<16x16x4xf32>
    %4 = vector.extract_strided_slice %1 {offsets = [0, 0, 0], sizes = [16, 16, 1], strides = [1, 1, 1]} : vector<16x16x4xf32> to vector<16x16x1xf32>
    %5 = vector.extract_strided_slice %2 {offsets = [0, 0], sizes = [1, 4], strides = [1, 1]} : vector<4x4xf32> to vector<1x4xf32>
    %6 = vector.shape_cast %5 : vector<1x4xf32> to vector<1x1x4xf32>
    %7 = vector.broadcast %4 : vector<16x16x1xf32> to vector<16x16x4xf32>
    %8 = vector.broadcast %6 : vector<1x1x4xf32> to vector<16x16x4xf32>
    %9 = arith.mulf %7, %8 : vector<16x16x4xf32>
    %10 = arith.addf %3, %9 : vector<16x16x4xf32>
    %11 = vector.extract_strided_slice %1 {offsets = [0, 0, 1], sizes = [16, 16, 1], strides = [1, 1, 1]} : vector<16x16x4xf32> to vector<16x16x1xf32>
    %12 = vector.extract_strided_slice %2 {offsets = [1, 0], sizes = [1, 4], strides = [1, 1]} : vector<4x4xf32> to vector<1x4xf32>
    %13 = vector.shape_cast %12 : vector<1x4xf32> to vector<1x1x4xf32>
    %14 = vector.broadcast %11 : vector<16x16x1xf32> to vector<16x16x4xf32>
    %15 = vector.broadcast %13 : vector<1x1x4xf32> to vector<16x16x4xf32>
    %16 = arith.mulf %14, %15 : vector<16x16x4xf32>
    %17 = arith.addf %10, %16 : vector<16x16x4xf32>
    %18 = vector.extract_strided_slice %1 {offsets = [0, 0, 2], sizes = [16, 16, 1], strides = [1, 1, 1]} : vector<16x16x4xf32> to vector<16x16x1xf32>
    %19 = vector.extract_strided_slice %2 {offsets = [2, 0], sizes = [1, 4], strides = [1, 1]} : vector<4x4xf32> to vector<1x4xf32>
    %20 = vector.shape_cast %19 : vector<1x4xf32> to vector<1x1x4xf32>
    %21 = vector.broadcast %18 : vector<16x16x1xf32> to vector<16x16x4xf32>
    %22 = vector.broadcast %20 : vector<1x1x4xf32> to vector<16x16x4xf32>
    %23 = arith.mulf %21, %22 : vector<16x16x4xf32>
    %24 = arith.addf %17, %23 : vector<16x16x4xf32>
    %25 = vector.extract_strided_slice %1 {offsets = [0, 0, 3], sizes = [16, 16, 1], strides = [1, 1, 1]} : vector<16x16x4xf32> to vector<16x16x1xf32>
    %26 = vector.extract_strided_slice %2 {offsets = [3, 0], sizes = [1, 4], strides = [1, 1]} : vector<4x4xf32> to vector<1x4xf32>
    %27 = vector.shape_cast %26 : vector<1x4xf32> to vector<1x1x4xf32>
    %28 = vector.broadcast %25 : vector<16x16x1xf32> to vector<16x16x4xf32>
    %29 = vector.broadcast %27 : vector<1x1x4xf32> to vector<16x16x4xf32>
    %30 = arith.mulf %28, %29 : vector<16x16x4xf32>
    %31 = arith.addf %24, %30 : vector<16x16x4xf32>
    %c0_5 = arith.constant 0 : index
    %c0_6 = arith.constant 0 : index
    %32 = vector.load %arg6[%c0_5, %c0_6] : memref<1x4xf32, #tpu.memory_space<vmem>>, vector<1x4xf32>
    %33 = vector.shape_cast %32 : vector<1x4xf32> to vector<1x1x4xf32>
    %34 = vector.broadcast %33 : vector<1x1x4xf32> to vector<16x16x4xf32>
    %35 = arith.addf %31, %34 : vector<16x16x4xf32>
    %cst_7 = arith.constant 0.000000e+00 : f32
    %cst_8 = arith.constant 6.000000e+00 : f32
    %36 = vector.broadcast %cst_7 : f32 to vector<16x16x4xf32>
    %37 = arith.maximumf %36, %35 : vector<16x16x4xf32>
    %38 = vector.broadcast %cst_8 : f32 to vector<16x16x4xf32>
    %39 = arith.minimumf %38, %37 : vector<16x16x4xf32>
    %c0_9 = arith.constant 0 : index
    %c0_10 = arith.constant 0 : index
    %c0_11 = arith.constant 0 : index
    %c0_12 = arith.constant 0 : index
    %40 = vector.load %arg3[%c0_9, %c0_10, %c0_11, %c0_12] : memref<1x1x16x4xf32, #tpu.memory_space<vmem>>, vector<1x1x16x4xf32>
    %41 = vector.shape_cast %40 : vector<1x1x16x4xf32> to vector<1x16x4xf32>
    %c0_13 = arith.constant 0 : index
    %c0_14 = arith.constant 0 : index
    %42 = vector.load %arg5[%c0_13, %c0_14] : memref<4x4xf32, #tpu.memory_space<vmem>>, vector<4x4xf32>
    %cst_15 = arith.constant 0.000000e+00 : f32
    %43 = vector.broadcast %cst_15 : f32 to vector<1x16x4xf32>
    %44 = vector.extract_strided_slice %41 {offsets = [0, 0, 0], sizes = [1, 16, 1], strides = [1, 1, 1]} : vector<1x16x4xf32> to vector<1x16x1xf32>
    %45 = vector.extract_strided_slice %42 {offsets = [0, 0], sizes = [1, 4], strides = [1, 1]} : vector<4x4xf32> to vector<1x4xf32>
    %46 = vector.shape_cast %45 : vector<1x4xf32> to vector<1x1x4xf32>
    %47 = vector.broadcast %44 : vector<1x16x1xf32> to vector<1x16x4xf32>
    %48 = vector.broadcast %46 : vector<1x1x4xf32> to vector<1x16x4xf32>
    %49 = arith.mulf %47, %48 : vector<1x16x4xf32>
    %50 = arith.addf %43, %49 : vector<1x16x4xf32>
    %51 = vector.extract_strided_slice %41 {offsets = [0, 0, 1], sizes = [1, 16, 1], strides = [1, 1, 1]} : vector<1x16x4xf32> to vector<1x16x1xf32>
    %52 = vector.extract_strided_slice %42 {offsets = [1, 0], sizes = [1, 4], strides = [1, 1]} : vector<4x4xf32> to vector<1x4xf32>
    %53 = vector.shape_cast %52 : vector<1x4xf32> to vector<1x1x4xf32>
    %54 = vector.broadcast %51 : vector<1x16x1xf32> to vector<1x16x4xf32>
    %55 = vector.broadcast %53 : vector<1x1x4xf32> to vector<1x16x4xf32>
    %56 = arith.mulf %54, %55 : vector<1x16x4xf32>
    %57 = arith.addf %50, %56 : vector<1x16x4xf32>
    %58 = vector.extract_strided_slice %41 {offsets = [0, 0, 2], sizes = [1, 16, 1], strides = [1, 1, 1]} : vector<1x16x4xf32> to vector<1x16x1xf32>
    %59 = vector.extract_strided_slice %42 {offsets = [2, 0], sizes = [1, 4], strides = [1, 1]} : vector<4x4xf32> to vector<1x4xf32>
    %60 = vector.shape_cast %59 : vector<1x4xf32> to vector<1x1x4xf32>
    %61 = vector.broadcast %58 : vector<1x16x1xf32> to vector<1x16x4xf32>
    %62 = vector.broadcast %60 : vector<1x1x4xf32> to vector<1x16x4xf32>
    %63 = arith.mulf %61, %62 : vector<1x16x4xf32>
    %64 = arith.addf %57, %63 : vector<1x16x4xf32>
    %65 = vector.extract_strided_slice %41 {offsets = [0, 0, 3], sizes = [1, 16, 1], strides = [1, 1, 1]} : vector<1x16x4xf32> to vector<1x16x1xf32>
    %66 = vector.extract_strided_slice %42 {offsets = [3, 0], sizes = [1, 4], strides = [1, 1]} : vector<4x4xf32> to vector<1x4xf32>
    %67 = vector.shape_cast %66 : vector<1x4xf32> to vector<1x1x4xf32>
    %68 = vector.broadcast %65 : vector<1x16x1xf32> to vector<1x16x4xf32>
    %69 = vector.broadcast %67 : vector<1x1x4xf32> to vector<1x16x4xf32>
    %70 = arith.mulf %68, %69 : vector<1x16x4xf32>
    %71 = arith.addf %64, %70 : vector<1x16x4xf32>
    %c0_16 = arith.constant 0 : index
    %c0_17 = arith.constant 0 : index
    %72 = vector.load %arg6[%c0_16, %c0_17] : memref<1x4xf32, #tpu.memory_space<vmem>>, vector<1x4xf32>
    %73 = vector.shape_cast %72 : vector<1x4xf32> to vector<1x1x4xf32>
    %74 = vector.broadcast %73 : vector<1x1x4xf32> to vector<1x16x4xf32>
    %75 = arith.addf %71, %74 : vector<1x16x4xf32>
    %cst_18 = arith.constant 0.000000e+00 : f32
    %cst_19 = arith.constant 6.000000e+00 : f32
    %76 = vector.broadcast %cst_18 : f32 to vector<1x16x4xf32>
    %77 = arith.maximumf %76, %75 : vector<1x16x4xf32>
    %78 = vector.broadcast %cst_19 : f32 to vector<1x16x4xf32>
    %79 = arith.minimumf %78, %77 : vector<1x16x4xf32>
    %c0_i32 = arith.constant 0 : i32
    %80 = arith.cmpi sgt, %arg1, %c0_i32 : i32
    %81 = arith.extui %80 : i1 to i32
    %82 = arith.sitofp %81 : i32 to f32
    %83 = vector.broadcast %82 : f32 to vector<1x16x4xf32>
    %84 = arith.mulf %79, %83 : vector<1x16x4xf32>
    %c0_20 = arith.constant 0 : index
    %c0_21 = arith.constant 0 : index
    %c0_22 = arith.constant 0 : index
    %c0_23 = arith.constant 0 : index
    %85 = vector.load %arg4[%c0_20, %c0_21, %c0_22, %c0_23] : memref<1x1x16x4xf32, #tpu.memory_space<vmem>>, vector<1x1x16x4xf32>
    %86 = vector.shape_cast %85 : vector<1x1x16x4xf32> to vector<1x16x4xf32>
    %c0_24 = arith.constant 0 : index
    %c0_25 = arith.constant 0 : index
    %87 = vector.load %arg5[%c0_24, %c0_25] : memref<4x4xf32, #tpu.memory_space<vmem>>, vector<4x4xf32>
    %cst_26 = arith.constant 0.000000e+00 : f32
    %88 = vector.broadcast %cst_26 : f32 to vector<1x16x4xf32>
    %89 = vector.extract_strided_slice %86 {offsets = [0, 0, 0], sizes = [1, 16, 1], strides = [1, 1, 1]} : vector<1x16x4xf32> to vector<1x16x1xf32>
    %90 = vector.extract_strided_slice %87 {offsets = [0, 0], sizes = [1, 4], strides = [1, 1]} : vector<4x4xf32> to vector<1x4xf32>
    %91 = vector.shape_cast %90 : vector<1x4xf32> to vector<1x1x4xf32>
    %92 = vector.broadcast %89 : vector<1x16x1xf32> to vector<1x16x4xf32>
    %93 = vector.broadcast %91 : vector<1x1x4xf32> to vector<1x16x4xf32>
    %94 = arith.mulf %92, %93 : vector<1x16x4xf32>
    %95 = arith.addf %88, %94 : vector<1x16x4xf32>
    %96 = vector.extract_strided_slice %86 {offsets = [0, 0, 1], sizes = [1, 16, 1], strides = [1, 1, 1]} : vector<1x16x4xf32> to vector<1x16x1xf32>
    %97 = vector.extract_strided_slice %87 {offsets = [1, 0], sizes = [1, 4], strides = [1, 1]} : vector<4x4xf32> to vector<1x4xf32>
    %98 = vector.shape_cast %97 : vector<1x4xf32> to vector<1x1x4xf32>
    %99 = vector.broadcast %96 : vector<1x16x1xf32> to vector<1x16x4xf32>
    %100 = vector.broadcast %98 : vector<1x1x4xf32> to vector<1x16x4xf32>
    %101 = arith.mulf %99, %100 : vector<1x16x4xf32>
    %102 = arith.addf %95, %101 : vector<1x16x4xf32>
    %103 = vector.extract_strided_slice %86 {offsets = [0, 0, 2], sizes = [1, 16, 1], strides = [1, 1, 1]} : vector<1x16x4xf32> to vector<1x16x1xf32>
    %104 = vector.extract_strided_slice %87 {offsets = [2, 0], sizes = [1, 4], strides = [1, 1]} : vector<4x4xf32> to vector<1x4xf32>
    %105 = vector.shape_cast %104 : vector<1x4xf32> to vector<1x1x4xf32>
    %106 = vector.broadcast %103 : vector<1x16x1xf32> to vector<1x16x4xf32>
    %107 = vector.broadcast %105 : vector<1x1x4xf32> to vector<1x16x4xf32>
    %108 = arith.mulf %106, %107 : vector<1x16x4xf32>
    %109 = arith.addf %102, %108 : vector<1x16x4xf32>
    %110 = vector.extract_strided_slice %86 {offsets = [0, 0, 3], sizes = [1, 16, 1], strides = [1, 1, 1]} : vector<1x16x4xf32> to vector<1x16x1xf32>
    %111 = vector.extract_strided_slice %87 {offsets = [3, 0], sizes = [1, 4], strides = [1, 1]} : vector<4x4xf32> to vector<1x4xf32>
    %112 = vector.shape_cast %111 : vector<1x4xf32> to vector<1x1x4xf32>
    %113 = vector.broadcast %110 : vector<1x16x1xf32> to vector<1x16x4xf32>
    %114 = vector.broadcast %112 : vector<1x1x4xf32> to vector<1x16x4xf32>
    %115 = arith.mulf %113, %114 : vector<1x16x4xf32>
    %116 = arith.addf %109, %115 : vector<1x16x4xf32>
    %c0_27 = arith.constant 0 : index
    %c0_28 = arith.constant 0 : index
    %117 = vector.load %arg6[%c0_27, %c0_28] : memref<1x4xf32, #tpu.memory_space<vmem>>, vector<1x4xf32>
    %118 = vector.shape_cast %117 : vector<1x4xf32> to vector<1x1x4xf32>
    %119 = vector.broadcast %118 : vector<1x1x4xf32> to vector<1x16x4xf32>
    %120 = arith.addf %116, %119 : vector<1x16x4xf32>
    %cst_29 = arith.constant 0.000000e+00 : f32
    %cst_30 = arith.constant 6.000000e+00 : f32
    %121 = vector.broadcast %cst_29 : f32 to vector<1x16x4xf32>
    %122 = arith.maximumf %121, %120 : vector<1x16x4xf32>
    %123 = vector.broadcast %cst_30 : f32 to vector<1x16x4xf32>
    %124 = arith.minimumf %123, %122 : vector<1x16x4xf32>
    %c0_i32_31 = arith.constant 0 : i32
    %125 = arith.cmpi slt, %arg1, %c0_i32_31 : i32
    %126 = arith.extui %125 : i1 to i32
    %127 = arith.sitofp %126 : i32 to f32
    %128 = vector.broadcast %127 : f32 to vector<1x16x4xf32>
    %129 = arith.mulf %124, %128 : vector<1x16x4xf32>
    %130 = tpu.concatenate %84, %39, %129 in 0 : vector<1x16x4xf32>, vector<16x16x4xf32>, vector<1x16x4xf32> -> vector<18x16x4xf32>
    %cst_32 = arith.constant 0.000000e+00 : f32
    %131 = vector.broadcast %cst_32 : f32 to vector<18x1x4xf32>
    %132 = tpu.concatenate %131, %130, %131 in 1 : vector<18x1x4xf32>, vector<18x16x4xf32>, vector<18x1x4xf32> -> vector<18x18x4xf32>
    %c0_33 = arith.constant 0 : index
    %c0_34 = arith.constant 0 : index
    %133 = vector.load %arg7[%c0_33, %c0_34] : memref<9x4xf32, #tpu.memory_space<vmem>>, vector<9x4xf32>
    %cst_35 = arith.constant 0.000000e+00 : f32
    %134 = vector.broadcast %cst_35 : f32 to vector<16x16x4xf32>
    %c0_36 = arith.constant 0 : index
    %c0_37 = arith.constant 0 : index
    %135 = vector.load %arg8[%c0_36, %c0_37] : memref<1x4xf32, #tpu.memory_space<vmem>>, vector<1x4xf32>
    %136 = vector.shape_cast %135 : vector<1x4xf32> to vector<1x1x4xf32>
    %137 = vector.broadcast %136 : vector<1x1x4xf32> to vector<16x16x4xf32>
    %138 = arith.addf %134, %137 : vector<16x16x4xf32>
    %139 = vector.extract_strided_slice %132 {offsets = [0, 0, 0], sizes = [16, 18, 4], strides = [1, 1, 1]} : vector<18x18x4xf32> to vector<16x18x4xf32>
    %140 = vector.extract_strided_slice %139 {offsets = [0, 0, 0], sizes = [16, 16, 4], strides = [1, 1, 1]} : vector<16x18x4xf32> to vector<16x16x4xf32>
    %141 = vector.extract_strided_slice %133 {offsets = [0, 0], sizes = [1, 4], strides = [1, 1]} : vector<9x4xf32> to vector<1x4xf32>
    %142 = vector.shape_cast %141 : vector<1x4xf32> to vector<1x1x4xf32>
    %143 = vector.broadcast %142 : vector<1x1x4xf32> to vector<16x16x4xf32>
    %144 = arith.mulf %140, %143 : vector<16x16x4xf32>
    %145 = arith.addf %138, %144 : vector<16x16x4xf32>
    %146 = vector.extract_strided_slice %139 {offsets = [0, 1, 0], sizes = [16, 16, 4], strides = [1, 1, 1]} : vector<16x18x4xf32> to vector<16x16x4xf32>
    %147 = vector.extract_strided_slice %133 {offsets = [1, 0], sizes = [1, 4], strides = [1, 1]} : vector<9x4xf32> to vector<1x4xf32>
    %148 = vector.shape_cast %147 : vector<1x4xf32> to vector<1x1x4xf32>
    %149 = vector.broadcast %148 : vector<1x1x4xf32> to vector<16x16x4xf32>
    %150 = arith.mulf %146, %149 : vector<16x16x4xf32>
    %151 = arith.addf %145, %150 : vector<16x16x4xf32>
    %152 = vector.extract_strided_slice %139 {offsets = [0, 2, 0], sizes = [16, 16, 4], strides = [1, 1, 1]} : vector<16x18x4xf32> to vector<16x16x4xf32>
    %153 = vector.extract_strided_slice %133 {offsets = [2, 0], sizes = [1, 4], strides = [1, 1]} : vector<9x4xf32> to vector<1x4xf32>
    %154 = vector.shape_cast %153 : vector<1x4xf32> to vector<1x1x4xf32>
    %155 = vector.broadcast %154 : vector<1x1x4xf32> to vector<16x16x4xf32>
    %156 = arith.mulf %152, %155 : vector<16x16x4xf32>
    %157 = arith.addf %151, %156 : vector<16x16x4xf32>
    %158 = vector.extract_strided_slice %132 {offsets = [1, 0, 0], sizes = [16, 18, 4], strides = [1, 1, 1]} : vector<18x18x4xf32> to vector<16x18x4xf32>
    %159 = vector.extract_strided_slice %158 {offsets = [0, 0, 0], sizes = [16, 16, 4], strides = [1, 1, 1]} : vector<16x18x4xf32> to vector<16x16x4xf32>
    %160 = vector.extract_strided_slice %133 {offsets = [3, 0], sizes = [1, 4], strides = [1, 1]} : vector<9x4xf32> to vector<1x4xf32>
    %161 = vector.shape_cast %160 : vector<1x4xf32> to vector<1x1x4xf32>
    %162 = vector.broadcast %161 : vector<1x1x4xf32> to vector<16x16x4xf32>
    %163 = arith.mulf %159, %162 : vector<16x16x4xf32>
    %164 = arith.addf %157, %163 : vector<16x16x4xf32>
    %165 = vector.extract_strided_slice %158 {offsets = [0, 1, 0], sizes = [16, 16, 4], strides = [1, 1, 1]} : vector<16x18x4xf32> to vector<16x16x4xf32>
    %166 = vector.extract_strided_slice %133 {offsets = [4, 0], sizes = [1, 4], strides = [1, 1]} : vector<9x4xf32> to vector<1x4xf32>
    %167 = vector.shape_cast %166 : vector<1x4xf32> to vector<1x1x4xf32>
    %168 = vector.broadcast %167 : vector<1x1x4xf32> to vector<16x16x4xf32>
    %169 = arith.mulf %165, %168 : vector<16x16x4xf32>
    %170 = arith.addf %164, %169 : vector<16x16x4xf32>
    %171 = vector.extract_strided_slice %158 {offsets = [0, 2, 0], sizes = [16, 16, 4], strides = [1, 1, 1]} : vector<16x18x4xf32> to vector<16x16x4xf32>
    %172 = vector.extract_strided_slice %133 {offsets = [5, 0], sizes = [1, 4], strides = [1, 1]} : vector<9x4xf32> to vector<1x4xf32>
    %173 = vector.shape_cast %172 : vector<1x4xf32> to vector<1x1x4xf32>
    %174 = vector.broadcast %173 : vector<1x1x4xf32> to vector<16x16x4xf32>
    %175 = arith.mulf %171, %174 : vector<16x16x4xf32>
    %176 = arith.addf %170, %175 : vector<16x16x4xf32>
    %177 = vector.extract_strided_slice %132 {offsets = [2, 0, 0], sizes = [16, 18, 4], strides = [1, 1, 1]} : vector<18x18x4xf32> to vector<16x18x4xf32>
    %178 = vector.extract_strided_slice %177 {offsets = [0, 0, 0], sizes = [16, 16, 4], strides = [1, 1, 1]} : vector<16x18x4xf32> to vector<16x16x4xf32>
    %179 = vector.extract_strided_slice %133 {offsets = [6, 0], sizes = [1, 4], strides = [1, 1]} : vector<9x4xf32> to vector<1x4xf32>
    %180 = vector.shape_cast %179 : vector<1x4xf32> to vector<1x1x4xf32>
    %181 = vector.broadcast %180 : vector<1x1x4xf32> to vector<16x16x4xf32>
    %182 = arith.mulf %178, %181 : vector<16x16x4xf32>
    %183 = arith.addf %176, %182 : vector<16x16x4xf32>
    %184 = vector.extract_strided_slice %177 {offsets = [0, 1, 0], sizes = [16, 16, 4], strides = [1, 1, 1]} : vector<16x18x4xf32> to vector<16x16x4xf32>
    %185 = vector.extract_strided_slice %133 {offsets = [7, 0], sizes = [1, 4], strides = [1, 1]} : vector<9x4xf32> to vector<1x4xf32>
    %186 = vector.shape_cast %185 : vector<1x4xf32> to vector<1x1x4xf32>
    %187 = vector.broadcast %186 : vector<1x1x4xf32> to vector<16x16x4xf32>
    %188 = arith.mulf %184, %187 : vector<16x16x4xf32>
    %189 = arith.addf %183, %188 : vector<16x16x4xf32>
    %190 = vector.extract_strided_slice %177 {offsets = [0, 2, 0], sizes = [16, 16, 4], strides = [1, 1, 1]} : vector<16x18x4xf32> to vector<16x16x4xf32>
    %191 = vector.extract_strided_slice %133 {offsets = [8, 0], sizes = [1, 4], strides = [1, 1]} : vector<9x4xf32> to vector<1x4xf32>
    %192 = vector.shape_cast %191 : vector<1x4xf32> to vector<1x1x4xf32>
    %193 = vector.broadcast %192 : vector<1x1x4xf32> to vector<16x16x4xf32>
    %194 = arith.mulf %190, %193 : vector<16x16x4xf32>
    %195 = arith.addf %189, %194 : vector<16x16x4xf32>
    %cst_38 = arith.constant 0.000000e+00 : f32
    %cst_39 = arith.constant 6.000000e+00 : f32
    %196 = vector.broadcast %cst_38 : f32 to vector<16x16x4xf32>
    %197 = arith.maximumf %196, %195 : vector<16x16x4xf32>
    %198 = vector.broadcast %cst_39 : f32 to vector<16x16x4xf32>
    %199 = arith.minimumf %198, %197 : vector<16x16x4xf32>
    %200 = tpu.concatenate %39, %199 in 2 : vector<16x16x4xf32>, vector<16x16x4xf32> -> vector<16x16x8xf32>
    %201 = vector.shape_cast %200 : vector<16x16x8xf32> to vector<16x128xf32>
    %c0_40 = arith.constant 0 : index
    %c0_41 = arith.constant 0 : index
    %c0_42 = arith.constant 0 : index
    %202 = vector.load %arg9[%c0_40, %c0_41, %c0_42] : memref<1x16x128xf32, #tpu.memory_space<vmem>>, vector<1x16x128xf32>
    %203 = vector.shape_cast %202 : vector<1x16x128xf32> to vector<16x128xf32>
    %204 = vector.shape_cast %201 : vector<16x128xf32> to vector<1x16x128xf32>
    tpu.vector_store %arg9[%c0_40, %c0_41, %c0_42], %204 {strides = array<i32>} : memref<1x16x128xf32, #tpu.memory_space<vmem>>, vector<1x16x128xf32>,
    return
  }
  func.func @transform_0(%arg0: i32, %arg1: i32) -> (i32, i32, i32, i32) {
    %c0_i32 = arith.constant 0 : i32
    %c0_i32_0 = arith.constant 0 : i32
    %c0_i32_1 = arith.constant 0 : i32
    return %arg0, %arg1, %c0_i32, %c0_i32_0 : i32, i32, i32, i32
  }
  func.func @transform_1(%arg0: i32, %arg1: i32) -> (i32, i32, i32, i32) {
    %c16_i32 = arith.constant 16 : i32
    %0 = arith.muli %arg1, %c16_i32 : i32
    %c1_i32 = arith.constant 1 : i32
    %1 = arith.subi %0, %c1_i32 : i32
    %c0_i32 = arith.constant 0 : i32
    %2 = arith.maxsi %1, %c0_i32 : i32
    %c0_i32_0 = arith.constant 0 : i32
    %c0_i32_1 = arith.constant 0 : i32
    %c0_i32_2 = arith.constant 0 : i32
    return %arg0, %2, %c0_i32_0, %c0_i32_1 : i32, i32, i32, i32
  }
  func.func @transform_2(%arg0: i32, %arg1: i32) -> (i32, i32, i32, i32) {
    %c16_i32 = arith.constant 16 : i32
    %0 = arith.muli %arg1, %c16_i32 : i32
    %c16_i32_0 = arith.constant 16 : i32
    %1 = arith.addi %0, %c16_i32_0 : i32
    %c15_i32 = arith.constant 15 : i32
    %2 = arith.minsi %1, %c15_i32 : i32
    %c0_i32 = arith.constant 0 : i32
    %c0_i32_1 = arith.constant 0 : i32
    %c0_i32_2 = arith.constant 0 : i32
    return %arg0, %2, %c0_i32, %c0_i32_1 : i32, i32, i32, i32
  }
  func.func @transform_3(%arg0: i32, %arg1: i32) -> (i32, i32) {
    %c0_i32 = arith.constant 0 : i32
    %c0_i32_0 = arith.constant 0 : i32
    %c0_i32_1 = arith.constant 0 : i32
    return %c0_i32, %c0_i32_0 : i32, i32
  }
  func.func @transform_4(%arg0: i32, %arg1: i32) -> (i32, i32) {
    %c0_i32 = arith.constant 0 : i32
    %c0_i32_0 = arith.constant 0 : i32
    %c0_i32_1 = arith.constant 0 : i32
    return %c0_i32, %c0_i32_0 : i32, i32
  }
  func.func @transform_5(%arg0: i32, %arg1: i32) -> (i32, i32) {
    %c0_i32 = arith.constant 0 : i32
    %c0_i32_0 = arith.constant 0 : i32
    %c0_i32_1 = arith.constant 0 : i32
    return %c0_i32, %c0_i32_0 : i32, i32
  }
  func.func @transform_6(%arg0: i32, %arg1: i32) -> (i32, i32) {
    %c0_i32 = arith.constant 0 : i32
    %c0_i32_0 = arith.constant 0 : i32
    %c0_i32_1 = arith.constant 0 : i32
    return %c0_i32, %c0_i32_0 : i32, i32
  }
  func.func @transform_7(%arg0: i32, %arg1: i32) -> (i32, i32, i32) {
    %c0_i32 = arith.constant 0 : i32
    %c0_i32_0 = arith.constant 0 : i32
    return %arg0, %arg1, %c0_i32 : i32, i32, i32
  }
}

</mosaic_0001>

<bundles_post_ra>
// kernel: tpu_custom_call.1
= control target key start
LH: loop header
LB: loop body
LE: loop exit
PB: predicated region body
PF: predicated region fallthrough
CT: control target
= control target key end

     0   :  { %12 = vsyncpa [#allocation3], 0  ;;  %s8559_s0 = inlined_call_operand.vmem [shape: f32[2,16,16,4], index: 0, kind: input, shape index: {}]   ;;  %s8560_s1 = inlined_call_operand.vmem [shape: f32[2,16,16,4], index: 1, kind: input, shape index: {}]   ;;  %s8561_s2 = inlined_call_operand.vmem [shape: f32[2,16,16,4], index: 2, kind: input, shape index: {}]   ;;  %s8562_s3 = inlined_call_operand.vmem [shape: f32[4,4], index: 3, kind: input, shape index: {}]   ;;  %s8563_s4 = inlined_call_operand.vmem [shape: f32[1,4], index: 4, kind: input, shape index: {}]   ;;  %s8564_s5 = inlined_call_operand.vmem [shape: f32[9,4], index: 5, kind: input, shape index: {}]   ;;  %s8565_s6 = inlined_call_operand.vmem [shape: f32[1,4], index: 6, kind: input, shape index: {}]   ;;  %s8566_s7 = inlined_call_operand.hbm [shape: f32[2,16,128], index: 7, kind: output, shape index: {}]  }
   0x1   :  { %14 = vsyncpa [#allocation3 + $0x1], 0  ;;  %s4720_s24 = smov 0   ;;  %s4722_s25 = smov 0  }
   0x2   :  { %s4724_s26 = smov 0   ;;  %s4726_s27 = smov 0  }
   0x3   :  { %s4728_s28 = smov 0   ;;  %s4730_s29 = smov 0  }
   0x4 LB: > { %s4452_s30 = sadd.s32 4294967295, %s4654_s29   ;;  %s4453_s8 = sadd.s32 4294967294, %s4654_s29   ;;  %s4654_s29 = sphi %s4730_s29, %s20_s29   ;;  %s4650_s28 = sphi %s4728_s28, %s9689_s28   ;;  %s4646_s27 = sphi %s4726_s27, %s9688_s27   ;;  %s4642_s26 = sphi %s4724_s26, %s9687_s26   ;;  %s4638_s25 = sphi %s4722_s25, %s9686_s25   ;;  %s4634_s24 = sphi %s4720_s24, %s9685_s24  }
   0x5   : > { %s32_s9 = sadd.s32 1, %s4650_s28  ;;  %s225_s10 = sadd.s32 1, %s4642_s26 }
   0x6   : > { %p34_p0 = scmp.ge.s32.totalorder %s32_s9, 2  ;;  %p235_p1 = scmp.ne.s32.totalorder %s4642_s26, %s4638_s25 }
   0x7   : > { %p236_p2 = scmp.eq.s32.totalorder %s4452_s30, 1  ;;  %p241_p3 = scmp.ne.s32.totalorder %s4638_s25, %s4634_s24 }
   0x8   : > { %s9691_s9 = smov (%p34_p0, %s32_s9), 0  ;;  %p242_p5 = scmp.eq.s32.totalorder %s4453_s8, 1 }
   0x9   : > { %p4760_p4 = por %p236_p2, %p235_p1  ;;  %s220_s12 = ssub.s32 %s4650_s28, %s9691_s9 }
   0xa   : > { %p4456_p6 = scmp.ge.s32.totalorder %s4654_s29, 1  ;;  %p223_p7 = scmp.eq.s32.totalorder %s220_s12, 0 }
   0xb   : > { %p4767_p8 = por %p242_p5, %p241_p3  ;;  %p326_p9 = scmp.lt.s32.totalorder %s4654_s29, 3 }
   0xc   : > { %s4773_s14 = scalar_select %p223_p7, %s4642_s26, %s225_s10  }
   0xd   : > { %p327_p10 = pnand %p4456_p6, %p326_p9 }
   0xf   : > { %330 = sbr.rel (%p327_p10) target bundleno = 1054 (0x41e), region = 48 }
  0x14   : > { %p390_p11 = scmp.lt.s32.totalorder %s4646_s27, 1  ;;  %v8567_v0 = vmov 2   ;;  %v8569_v1 = vmov 0   ;;  %v8571_v34 = vmov 3   ;;  %v8573_v35 = vmov 1   ;;  %s4660_s30 = smov 4  }
  0x15   : > { %4559 = vset.pattern.permute.xlu0 %v8567_v0  ;;  %4556 = vset.pattern.permute.xlu1 %v8569_v1  ;;  %vm1551_vm0 = vcmask 1040384   ;;  %vm1874_vm1 = vcmask 1046528   ;;  %vm2119_vm2 = vcmask 1045504   ;;  %vm3568_vm3 = vcmask 31744   ;;  %s4666_s8 = smov 32   ;;  %s4668_s12 = smov 48  }
  0x16   : > { %s391_s15 = scalar_select %p390_p11, %s4646_s27, 1  ;;  %vm4265_vm4 = vcmask 64512   ;;  %vm4268_vm5 = vcmask 130048   ;;  %vm4271_vm6 = vcmask 195584   ;;  %vm4274_vm7 = vcmask 261120  }
  0x17   : > { %s4671_s17 = smov 72   ;;  %s4672_s18 = smov 80   ;;  %vm4277_vm8 = vcmask 326656   ;;  %vm4280_vm9 = vcmask 392192   ;;  %vm4283_vm10 = vcmask 457728   ;;  %vm4286_vm11 = vcmask 523264  }
  0x18   : > { %s4779_s16 = sshll.u32 %s391_s15, 8  ;;  %s4669_s15 = smov 56   ;;  %vm4289_vm12 = vcmask 588800   ;;  %vm4292_vm13 = vcmask 654336   ;;  %vm4295_vm14 = vcmask 719872   ;;  %vm4298_vm15 = vcmask 785408  }
  0x19   : > { %s4785_s19 = scalar_lea.vmem %s8559_s0, %s4779_s16  ;;  %s4933_s22 = scalar_lea.vmem %s8560_s1, %s4779_s16 }
  0x1a   : > { %v4788_v2 = vld [vmem:[%s4785_s19 + $0x10] sm:$0xff]  ;;  %v4791_v3 = vld [vmem:[%s4785_s19 + $0x8] sm:$0xff]  ;;  %v4796_v4 = vld [vmem:[%s4785_s19 + $0x18] sm:$0xff]  ;;  %s4475_s23 = sadd.s32 240, %s4779_s16  ;;  %s4670_s16 = smov 64  }
  0x1b   : > { %480 = vperm.xlu1 %4556, %v4788_v2   ;;  %897 = vperm.xlu0 %4559, %v4791_v3   ;;  %v4799_v5 = vld [vmem:[%s4785_s19 + $0x20] sm:$0xff]  ;;  %v4804_v6 = vld [vmem:[%s4785_s19 + $0x28] sm:$0xff]  ;;  %v4807_v7 = vld [vmem:[%s4785_s19 + $0x30] sm:$0xff]  ;;  %s5056_s10 = scalar_lea.vmem %s8561_s2, %s4475_s23  ;;  %s4664_s23 = smov 16  }
  0x1c   : > { %v4812_v8 = vld [vmem:[%s4785_s19 + $0x38] sm:$0xff]  ;;  %v4815_v9 = vld [vmem:[%s4785_s19 + $0x40] sm:$0xff]  ;;  %v4820_v10 = vld [vmem:[%s4785_s19 + $0x48] sm:$0xff]  ;;  %s4674_s20 = smov 96   ;;  %s4675_s21 = smov 104  }
  0x1d   : > { %v4823_v11 = vld [vmem:[%s4785_s19 + $0x50] sm:$0xff]  ;;  %v4828_v12 = vld [vmem:[%s4785_s19 + $0x58] sm:$0xff]  ;;  %v4831_v13 = vld [vmem:[%s4785_s19 + $0x60] sm:$0xff] }
  0x1e   : > { %v4836_v14 = vld [vmem:[%s4785_s19 + $0x68] sm:$0xff]  ;;  %v4839_v15 = vld [vmem:[%s4785_s19 + $0x70] sm:$0xff]  ;;  %v4844_v16 = vld [vmem:[%s4785_s19 + $0x78] sm:$0xff] }
  0x1f   : > { %485 = vperm.xlu1 %4556, %v4796_v4   ;;  %909 = vperm.xlu0 %4559, %v4799_v5   ;;  %v4847_v17 = vld [vmem:[%s4785_s19 + $0x80] sm:$0xff]  ;;  %v4852_v18 = vld [vmem:[%s4785_s19 + $0x88] sm:$0xff]  ;;  %v4855_v19 = vld [vmem:[%s4785_s19 + $0x90] sm:$0xff] }
  0x20   : > { %v4860_v20 = vld [vmem:[%s4785_s19 + $0x98] sm:$0xff]  ;;  %v4863_v21 = vld [vmem:[%s4785_s19 + $0xa0] sm:$0xff]  ;;  %v4868_v22 = vld [vmem:[%s4785_s19 + $0xa8] sm:$0xff] }
  0x21   : > { %v4871_v23 = vld [vmem:[%s4785_s19 + $0xb0] sm:$0xff]  ;;  %v4876_v24 = vld [vmem:[%s4785_s19 + $0xb8] sm:$0xff]  ;;  %v4879_v25 = vld [vmem:[%s4785_s19 + $0xc0] sm:$0xff] }
  0x22   : > { %v4884_v26 = vld [vmem:[%s4785_s19 + $0xc8] sm:$0xff]  ;;  %v4887_v27 = vld [vmem:[%s4785_s19 + $0xd0] sm:$0xff]  ;;  %v4892_v28 = vld [vmem:[%s4785_s19 + $0xd8] sm:$0xff] }
  0x23   : > { %495 = vperm.xlu1 %4556, %v4804_v6   ;;  %917 = vperm.xlu0 %4559, %v4807_v7   ;;  %v4895_v29 = vld [vmem:[%s4785_s19 + $0xe0] sm:$0xff]  ;;  %v4900_v30 = vld [vmem:[%s4785_s19 + $0xe8] sm:$0xff]  ;;  %v4903_v31 = vld [vmem:[%s4785_s19 + $0xf0] sm:$0xff] }
  0x24   : > { %v4908_v32 = vld [vmem:[%s4785_s19 + $0xf8] sm:$0xff]  ;;  %v4911_v33 = vld [vmem:[%s4785_s19] sm:$0xff]  ;;  %s4673_s19 = smov 88  }
  0x25   : > { %v4938_v36 = vld [vmem:[%s4933_s22] sm:$0xff] }
  0x27   : > { %505 = vperm.xlu1 %4556, %v4812_v8   ;;  %925 = vperm.xlu0 %4559, %v4815_v9  }
  0x2b   : > { %515 = vperm.xlu1 %4556, %v4820_v10   ;;  %933 = vperm.xlu0 %4559, %v4823_v11  }
  0x2f   : > { %525 = vperm.xlu1 %4556, %v4828_v12   ;;  %941 = vperm.xlu0 %4559, %v4831_v13  }
  0x33   : > { %535 = vperm.xlu1 %4556, %v4836_v14   ;;  %949 = vperm.xlu0 %4559, %v4839_v15  }
  0x37   : > { %545 = vperm.xlu1 %4556, %v4844_v16   ;;  %957 = vperm.xlu0 %4559, %v4847_v17  }
  0x3b   : > { %555 = vperm.xlu1 %4556, %v4852_v18   ;;  %965 = vperm.xlu0 %4559, %v4855_v19  }
  0x3f   : > { %565 = vperm.xlu1 %4556, %v4860_v20   ;;  %973 = vperm.xlu0 %4559, %v4863_v21  }
  0x43   : > { %575 = vperm.xlu1 %4556, %v4868_v22   ;;  %981 = vperm.xlu0 %4559, %v4871_v23  }
  0x47   : > { %585 = vperm.xlu1 %4556, %v4876_v24   ;;  %989 = vperm.xlu0 %4559, %v4879_v25  }
  0x4b   : > { %595 = vperm.xlu1 %4556, %v4884_v26   ;;  %997 = vperm.xlu0 %4559, %v4887_v27  }
  0x4f   : > { %605 = vperm.xlu1 %4556, %v4892_v28   ;;  %1005 = vperm.xlu0 %4559, %v4895_v29  }
  0x53   : > { %615 = vperm.xlu1 %4556, %v4900_v30   ;;  %1013 = vperm.xlu0 %4559, %v4903_v31  }
  0x57   : > { %625 = vperm.xlu1 %4556, %v4908_v32   ;;  %4560 = vset.pattern.permute.xlu0 %v8571_v34 }
  0x58   : > { %1089 = vperm.xlu0 %4560, %v4911_v33  }
  0x5b   : > { %4557 = vset.pattern.permute.xlu1 %v8573_v35 }
  0x5c   : > { %701 = vperm.xlu1 %4557, %v4791_v3   ;;  %1101 = vperm.xlu0 %4560, %v4796_v4  }
  0x60   : > { %705 = vperm.xlu1 %4557, %v4788_v2   ;;  %1109 = vperm.xlu0 %4560, %v4804_v6  }
  0x64   : > { %713 = vperm.xlu1 %4557, %v4799_v5   ;;  %1117 = vperm.xlu0 %4560, %v4812_v8  }
  0x68   : > { %721 = vperm.xlu1 %4557, %v4807_v7   ;;  %1125 = vperm.xlu0 %4560, %v4820_v10  }
  0x6c   : > { %729 = vperm.xlu1 %4557, %v4815_v9   ;;  %1133 = vperm.xlu0 %4560, %v4828_v12  }
  0x70   : > { %737 = vperm.xlu1 %4557, %v4823_v11   ;;  %1141 = vperm.xlu0 %4560, %v4836_v14  }
  0x74   : > { %745 = vperm.xlu1 %4557, %v4831_v13   ;;  %1149 = vperm.xlu0 %4560, %v4844_v16  }
  0x78   : > { %753 = vperm.xlu1 %4557, %v4839_v15   ;;  %1428 = vperm.xlu0 %4560, %v4938_v36  }
  0x7c   : > { %761 = vperm.xlu1 %4557, %v4847_v17   ;;  %1161 = vperm.xlu0 %4560, %v4855_v19  }
  0x80   : > { %769 = vperm.xlu1 %4557, %v4855_v19   ;;  %1169 = vperm.xlu0 %4560, %v4863_v21  }
  0x84   : > { %777 = vperm.xlu1 %4557, %v4863_v21   ;;  %1177 = vperm.xlu0 %4560, %v4871_v23  }
  0x88   : > { %785 = vperm.xlu1 %4557, %v4871_v23   ;;  %1185 = vperm.xlu0 %4560, %v4879_v25  }
  0x8c   : > { %793 = vperm.xlu1 %4557, %v4879_v25   ;;  %1193 = vperm.xlu0 %4560, %v4887_v27  }
  0x90   : > { %801 = vperm.xlu1 %4557, %v4887_v27   ;;  %1201 = vperm.xlu0 %4560, %v4895_v29  }
  0x94   : > { %809 = vperm.xlu1 %4557, %v4895_v29   ;;  %4566 = vset.pattern.permute.xlu0 %v8569_v1 }
  0x95   : > { %470 = vperm.xlu0 %4566, %v4911_v33  }
  0x96   : > { %v4957_v37 = vpop.permute.xlu1 %480  ;;  %v4959_v38 = vpop.permute.xlu0 %897 }
  0x98   : > { %817 = vperm.xlu1 %4557, %v4903_v31  }
  0x99   : > { %475 = vperm.xlu0 %4566, %v4791_v3  }
  0x9a   : > { %v4963_v39 = vpop.permute.xlu1 %485  ;;  %v4965_v40 = vpop.permute.xlu0 %909 }
  0x9c   : > { %4558 = vset.pattern.permute.xlu1 %v8567_v0 }
  0x9d   : > { %490 = vperm.xlu0 %4566, %v4799_v5   ;;  %893 = vperm.xlu1 %4558, %v4911_v33  }
  0x9e   : > { %v4970_v41 = vpop.permute.xlu1 %495  ;;  %v4972_v42 = vpop.permute.xlu0 %917 }
  0xa1   : > { %500 = vperm.xlu0 %4566, %v4807_v7   ;;  %901 = vperm.xlu1 %4558, %v4788_v2  }
  0xa2   : > { %v4976_v43 = vpop.permute.xlu1 %505  ;;  %v4978_v44 = vpop.permute.xlu0 %925 }
  0xa5   : > { %510 = vperm.xlu0 %4566, %v4815_v9   ;;  %905 = vperm.xlu1 %4558, %v4796_v4  }
  0xa6   : > { %v4982_v45 = vpop.permute.xlu1 %515  ;;  %v4984_v46 = vpop.permute.xlu0 %933 }
  0xa9   : > { %520 = vperm.xlu0 %4566, %v4823_v11   ;;  %913 = vperm.xlu1 %4558, %v4804_v6  }
  0xaa   : > { %v4988_v47 = vpop.permute.xlu1 %525  ;;  %v4990_v48 = vpop.permute.xlu0 %941 }
  0xad   : > { %530 = vperm.xlu0 %4566, %v4831_v13   ;;  %921 = vperm.xlu1 %4558, %v4812_v8  }
  0xae   : > { %v4994_v49 = vpop.permute.xlu1 %535  ;;  %v4996_v50 = vpop.permute.xlu0 %949 }
  0xb1   : > { %540 = vperm.xlu0 %4566, %v4839_v15   ;;  %929 = vperm.xlu1 %4558, %v4820_v10  }
  0xb2   : > { %v5000_v51 = vpop.permute.xlu1 %545  ;;  %v5002_v52 = vpop.permute.xlu0 %957 }
  0xb5   : > { %550 = vperm.xlu0 %4566, %v4847_v17   ;;  %937 = vperm.xlu1 %4558, %v4828_v12  }
  0xb6   : > { %v5006_v53 = vpop.permute.xlu1 %555  ;;  %v5008_v54 = vpop.permute.xlu0 %965 }
  0xb9   : > { %560 = vperm.xlu0 %4566, %v4855_v19   ;;  %945 = vperm.xlu1 %4558, %v4836_v14  }
  0xba   : > { %v5012_v55 = vpop.permute.xlu1 %565  ;;  %v5014_v56 = vpop.permute.xlu0 %973 }
  0xbd   : > { %570 = vperm.xlu0 %4566, %v4863_v21   ;;  %953 = vperm.xlu1 %4558, %v4844_v16  }
  0xbe   : > { %v5018_v57 = vpop.permute.xlu1 %575  ;;  %v5020_v58 = vpop.permute.xlu0 %981 }
  0xc1   : > { %580 = vperm.xlu0 %4566, %v4871_v23   ;;  %961 = vperm.xlu1 %4558, %v4852_v18  }
  0xc2   : > { %v5024_v59 = vpop.permute.xlu1 %585  ;;  %v5026_v60 = vpop.permute.xlu0 %989 }
  0xc5   : > { %590 = vperm.xlu0 %4566, %v4879_v25   ;;  %969 = vperm.xlu1 %4558, %v4860_v20  }
  0xc6   : > { %v5030_v61 = vpop.permute.xlu1 %595  ;;  %v5032_v62 = vpop.permute.xlu0 %997 }
  0xc9   : > { %600 = vperm.xlu0 %4566, %v4887_v27   ;;  %977 = vperm.xlu1 %4558, %v4868_v22  }
  0xca   : > { %v5036_v63 = vpop.permute.xlu1 %605  ;;  %v5038_v19 = vpop.permute.xlu0 %1005 }
  0xcd   : > { %610 = vperm.xlu0 %4566, %v4895_v29   ;;  %985 = vperm.xlu1 %4558, %v4876_v24   ;;  %v5061_v29 = vld [vmem:[%s5056_s10] sm:$0xff] }
  0xce   : > { %v5042_v21 = vpop.permute.xlu1 %615  ;;  %v5044_v23 = vpop.permute.xlu0 %1013 }
  0xcf   : > { %8885 = vst [vmem:[#allocation5_spill] sm:$0xff] %v5042_v21  ;;  %8886 = vst [vmem:[#allocation6_spill] sm:$0xff] %v5044_v23 }
  0xd1   : > { %620 = vperm.xlu0 %4566, %v4903_v31   ;;  %993 = vperm.xlu1 %4558, %v4884_v26  }
  0xd2   : > { %v5049_v25 = vpop.permute.xlu1 %625 }
  0xd3   : > { %8887 = vst [vmem:[#allocation7_spill] sm:$0xff] %v5049_v25  ;;  %v5051_v27 = vpop.permute.xlu0 %1089 }
  0xd4   : > { %8888 = vst [vmem:[#allocation8_spill] sm:$0xff] %v5051_v27  ;;  %v8892_v27 = vmov 1  }
  0xd5   : > { %1391 = vperm.xlu0 %4566, %v4938_v36   ;;  %1001 = vperm.xlu1 %4558, %v4892_v28  }
  0xd7   : > { %v5063_v0 = vpop.permute.xlu1 %701  ;;  %v5065_v1 = vpop.permute.xlu0 %1101 }
  0xd8   : > { %8889 = vst [vmem:[#allocation9_spill] sm:$0xff] %v5063_v0  ;;  %8890 = vst [vmem:[#allocation10_spill] sm:$0xff] %v5065_v1  ;;  %v8894_v0 = vmov 3  }
  0xd9   : > { %1455 = vperm.xlu0 %4566, %v5061_v29   ;;  %1009 = vperm.xlu1 %4558, %v4900_v30  }
  0xdb   : > { %v5069_v34 = vpop.permute.xlu1 %705  ;;  %v5071_v35 = vpop.permute.xlu0 %1109 }
  0xdc   : > { %8891 = vst [vmem:[#allocation11_spill] sm:$0xff] %v5071_v35 }
  0xdd   : > { %4567 = vset.pattern.permute.xlu0 %v8892_v27  ;;  %1017 = vperm.xlu1 %4558, %v4908_v32  }
  0xde   : > { %697 = vperm.xlu0 %4567, %v4911_v33  }
  0xdf   : > { %v5076_v25 = vpop.permute.xlu1 %713  ;;  %v5078_v23 = vpop.permute.xlu0 %1117 }
  0xe0   : > { %8893 = vst [vmem:[#allocation12_spill] sm:$0xff] %v5078_v23 }
  0xe1   : > { %4561 = vset.pattern.permute.xlu1 %v8894_v0 }
  0xe2   : > { %709 = vperm.xlu0 %4567, %v4796_v4   ;;  %1093 = vperm.xlu1 %4561, %v4791_v3  }
  0xe3   : > { %v5083_v1 = vpop.permute.xlu1 %721  ;;  %v5085_v21 = vpop.permute.xlu0 %1125 }
  0xe6   : > { %717 = vperm.xlu0 %4567, %v4804_v6   ;;  %1097 = vperm.xlu1 %4561, %v4788_v2  }
  0xe7   : > { %v5089_v35 = vpop.permute.xlu1 %729  ;;  %v5091_v33 = vpop.permute.xlu0 %1133 }
  0xea   : > { %725 = vperm.xlu0 %4567, %v4812_v8   ;;  %1105 = vperm.xlu1 %4561, %v4799_v5  }
  0xeb   : > { %v5095_v23 = vpop.permute.xlu1 %737  ;;  %v5097_v4 = vpop.permute.xlu0 %1141 }
  0xee   : > { %733 = vperm.xlu0 %4567, %v4820_v10   ;;  %1113 = vperm.xlu1 %4561, %v4807_v7  }
  0xef   : > { %v5101_v3 = vpop.permute.xlu1 %745  ;;  %v5103_v6 = vpop.permute.xlu0 %1149 }
  0xf0   : > { %8895 = vst [vmem:[#allocation13_spill] sm:$0xff] %v5101_v3  ;;  %8896 = vst [vmem:[#allocation14_spill] sm:$0xff] %v5103_v6  ;;  %v8908_v6 = vmov 2  }
  0xf2   : > { %741 = vperm.xlu0 %4567, %v4828_v12   ;;  %1121 = vperm.xlu1 %4561, %v4815_v9  }
  0xf3   : > { %v5107_v2 = vpop.permute.xlu1 %753  ;;  %v5109_v8 = vpop.permute.xlu0 %1428 }
  0xf4   : > { %8897 = vst [vmem:[#allocation15_spill] sm:$0xff] %v5107_v2  ;;  %8898 = vst [vmem:[#allocation16_spill] sm:$0xff] %v5109_v8 }
  0xf6   : > { %749 = vperm.xlu0 %4567, %v4836_v14   ;;  %1129 = vperm.xlu1 %4561, %v4823_v11  }
  0xf7   : > { %v5113_v5 = vpop.permute.xlu1 %761  ;;  %v5115_v7 = vpop.permute.xlu0 %1161 }
  0xf8   : > { %8899 = vst [vmem:[#allocation17_spill] sm:$0xff] %v5113_v5  ;;  %v8902_v5 = vmov 0  }
  0xfa   : > { %757 = vperm.xlu0 %4567, %v4844_v16   ;;  %1137 = vperm.xlu1 %4561, %v4831_v13   ;;  %v1388_v13 = vld [vmem:[%s4933_s22 + $0x8] sm:$0xff]  ;;  %s4663_s22 = smov 8  }
  0xfb   : > { %v5119_v10 = vpop.permute.xlu1 %769  ;;  %v5121_v9 = vpop.permute.xlu0 %1169 }
  0xfe   : > { %765 = vperm.xlu0 %4567, %v4852_v18   ;;  %1145 = vperm.xlu1 %4561, %v4839_v15  }
  0xff   : > { %v5125_v12 = vpop.permute.xlu1 %777  ;;  %v5127_v14 = vpop.permute.xlu0 %1177 }
 0x100   : > { %8900 = vst [vmem:[#allocation18_spill] sm:$0xff] %v5127_v14 }
 0x102   : > { %773 = vperm.xlu0 %4567, %v4860_v20   ;;  %1153 = vperm.xlu1 %4561, %v4847_v17  }
 0x103   : > { %v5131_v11 = vpop.permute.xlu1 %785  ;;  %v5133_v16 = vpop.permute.xlu0 %1185 }
 0x104   : > { %8901 = vst [vmem:[#allocation19_spill] sm:$0xff] %v5133_v16 }
 0x106   : > { %781 = vperm.xlu0 %4567, %v4868_v22   ;;  %4562 = vset.pattern.permute.xlu1 %v8902_v5 }
 0x107   : > { %v5138_v8 = vpop.permute.xlu1 %793  ;;  %v5140_v15 = vpop.permute.xlu0 %1193  ;;  %1396 = vperm.xlu1 %4562, %v1388_v13  }
 0x108   : > { %8903 = vst [vmem:[#allocation20_spill] sm:$0xff] %v5140_v15 }
 0x10a   : > { %789 = vperm.xlu0 %4567, %v4876_v24  }
 0x10b   : > { %v5143_v14 = vpop.permute.xlu1 %801  ;;  %v5145_v2 = vpop.permute.xlu0 %1201  ;;  %4563 = vset.pattern.permute.xlu1 %v8892_v27 }
 0x10c   : > { %8904 = vst [vmem:[#allocation21_spill] sm:$0xff] %v5143_v14  ;;  %8905 = vst [vmem:[#allocation22_spill] sm:$0xff] %v5145_v2  ;;  %1404 = vperm.xlu1 %4563, %v4938_v36  }
 0x10e   : > { %797 = vperm.xlu0 %4567, %v4884_v26  }
 0x10f   : > { %v5150_v17 = vpop.permute.xlu1 %809 }
 0x110   : > { %8906 = vst [vmem:[#allocation23_spill] sm:$0xff] %v5150_v17  ;;  %v5152_v16 = vpop.permute.xlu0 %470  ;;  %4564 = vset.pattern.permute.xlu1 %v8908_v6 }
 0x111   : > { %8907 = vst [vmem:[#allocation24_spill] sm:$0xff] %v5152_v16  ;;  %1416 = vperm.xlu1 %4564, %v4938_v36  }
 0x112   : > { %805 = vperm.xlu0 %4567, %v4892_v28  }
 0x113   : > { %v5157_v15 = vpop.permute.xlu1 %817 }
 0x114   : > { %8909 = vst [vmem:[#allocation25_spill] sm:$0xff] %v5157_v15  ;;  %v5159_v2 = vpop.permute.xlu0 %475  ;;  %v5174_v15 = vld [vmem:[%s5056_s10 + $0x8] sm:$0xff]  ;;  %s4667_s10 = smov 40  }
 0x115   : > { %8910 = vst [vmem:[#allocation26_spill] sm:$0xff] %v5159_v2  ;;  %1420 = vperm.xlu1 %4564, %v1388_v13  }
 0x116   : > { %813 = vperm.xlu0 %4567, %v4900_v30  }
 0x118   : > { %v5162_v14 = vpop.permute.xlu0 %490  ;;  %v5164_v3 = vpop.permute.xlu1 %893 }
 0x119   : > { %8911 = vst [vmem:[#allocation27_spill] sm:$0xff] %v5162_v14  ;;  %8912 = vst [vmem:[#allocation28_spill] sm:$0xff] %v5164_v3  ;;  %4565 = vset.pattern.permute.xlu1 %v8894_v0  ;;  %v628_v3 = vlaneseq }
 0x11a   : > { %821 = vperm.xlu0 %4567, %v4908_v32   ;;  %1432 = vperm.xlu1 %4565, %v1388_v13  }
 0x11c   : > { %v5168_v16 = vpop.permute.xlu0 %500  ;;  %v5170_v36 = vpop.permute.xlu1 %901 }
 0x11d   : > { %8913 = vst [vmem:[#allocation29_spill] sm:$0xff] %v5170_v36 }
 0x11e   : > { %1408 = vperm.xlu0 %4567, %v1388_v13   ;;  %1157 = vperm.xlu1 %4565, %v4852_v18   ;;  %v5188_v18 = vshrl.u32 %v628_v3, 7 }
 0x120   : > { %v5176_v6 = vpop.permute.xlu0 %510  ;;  %v5178_v2 = vpop.permute.xlu1 %905  ;;  %8918 = vst [vmem:[#allocation34_spill] sm:$0xff] %v5188_v18 }
 0x121   : > { %8914 = vst [vmem:[#allocation30_spill] sm:$0xff] %v5176_v6  ;;  %8915 = vst [vmem:[#allocation31_spill] sm:$0xff] %v5178_v2 }
 0x122   : > { %1472 = vperm.xlu0 %4567, %v5174_v15   ;;  %1165 = vperm.xlu1 %4565, %v4860_v20   ;;  %v630_v20 = vsub.s32 0, %v5188_v18 }
 0x124   : > { %v5182_v14 = vpop.permute.xlu0 %520  ;;  %v5184_v17 = vpop.permute.xlu1 %913 }
 0x125   : > { %8916 = vst [vmem:[#allocation32_spill] sm:$0xff] %v5182_v14  ;;  %8917 = vst [vmem:[#allocation33_spill] sm:$0xff] %v5184_v17  ;;  %v1022_v14 = vsub.s32 2, %v5188_v18 }
 0x126   : > { %4570 = vset.pattern.permute.xlu0 %v8894_v0  ;;  %1173 = vperm.xlu1 %4565, %v4868_v22   ;;  %v467_v22 = vld [vmem:[%s8562_s3] sm:$0xf]  ;;  %v826_v0 = vsub.s32 1, %v5188_v18 }
 0x127   : > { %1209 = vperm.xlu0 %4570, %v4903_v31   ;;  %v8576_v31 = vsub.s32 3, %v5188_v18 }
 0x128   : > { %v5191_v13 = vpop.permute.xlu0 %530  ;;  %v5193_v2 = vpop.permute.xlu1 %921 }
 0x129   : > { %8919 = vst [vmem:[#allocation35_spill] sm:$0xff] %v5191_v13  ;;  %8920 = vst [vmem:[#allocation36_spill] sm:$0xff] %v5193_v2  ;;  %v5208_v2 = vrot.slane %v467_v22, %v630_v20  ;;  %v5219_v6 = vrot.slane %v467_v22, %v8576_v31 }
 0x12a   : > { %1181 = vperm.xlu1 %4565, %v4876_v24   ;;  %v5210_v24 = vrot.slane %v467_v22, %v1022_v14 }
 0x12b   : > { %1492 = vperm.xlu0 %4570, %v5061_v29   ;;  %8924 = vst [vmem:[#allocation40_spill] sm:$0xff] %v5219_v6 }
 0x12c   : > { %v5202_v3 = vpop.permute.xlu0 %540  ;;  %v5204_v17 = vpop.permute.xlu1 %929  ;;  %v5238_v31 = vmul.f32 %v5210_v24, %v4965_v40  ;;  %v5260_v40 = vmul.f32 %v5208_v2, %v4982_v45  ;;  %v5281_v45 = vmul.f32 %v5210_v24, %v4996_v50  ;;  %v2334_v50 = vsub.s32 4, %v5188_v18 }
 0x12d   : > { %8921 = vst [vmem:[#allocation37_spill] sm:$0xff] %v5202_v3  ;;  %8922 = vst [vmem:[#allocation38_spill] sm:$0xff] %v5204_v17  ;;  %v5224_v17 = vmul.f32 %v5208_v2, %v4957_v37  ;;  %v5232_v3 = vmul.f32 %v5208_v2, %v4963_v39  ;;  %v5246_v37 = vmul.f32 %v5210_v24, %v4972_v42 }
 0x12e   : > { %1189 = vperm.xlu1 %4565, %v4884_v26   ;;  %v5228_v26 = vmul.f32 %v5210_v24, %v4959_v38  ;;  %v5250_v38 = vmul.f32 %v5208_v2, %v4976_v43  ;;  %8928 = vst [vmem:[#allocation44_spill] sm:$0xff] %v5260_v40  ;;  %v5269_v43 = vmul.f32 %v5208_v2, %v4988_v47 }
 0x12f   : > { %8925 = vst [vmem:[#allocation41_spill] sm:$0xff] %v5232_v3  ;;  %v5290_v47 = vmul.f32 %v5210_v24, %v5002_v52  ;;  %v5308_v52 = vmul.f32 %v5208_v2, %v5012_v55  ;;  %v5326_v55 = vmul.f32 %v5208_v2, %v5024_v59 }
 0x130   : > { %v5213_v13 = vpop.permute.xlu0 %550  ;;  %v5215_v36 = vpop.permute.xlu1 %937  ;;  %8927 = vst [vmem:[#allocation43_spill] sm:$0xff] %v5250_v38  ;;  %8929 = vst [vmem:[#allocation45_spill] sm:$0xff] %v5269_v43  ;;  %v5273_v38 = vmul.f32 %v5210_v24, %v4990_v48  ;;  %v5317_v43 = vmul.f32 %v5208_v2, %v5018_v57 }
 0x131   : > { %8923 = vst [vmem:[#allocation39_spill] sm:$0xff] %v5213_v13  ;;  %v5234_v13 = vrot.slane %v467_v22, %v826_v0  ;;  %v5256_v22 = vmul.f32 %v5210_v24, %v4978_v44  ;;  %v5277_v44 = vmul.f32 %v5208_v2, %v4994_v49  ;;  %v5297_v49 = vld [vmem:[%s8564_s5] sm:$0xff]  ;;  %8933 = vst [vmem:[#allocation49_spill] sm:$0xff] %v5308_v52 }
 0x132   : > { %1197 = vperm.xlu1 %4565, %v4892_v28   ;;  %v5242_v28 = vmul.f32 %v5208_v2, %v4970_v41  ;;  %v5264_v41 = vmul.f32 %v5210_v24, %v4984_v46  ;;  %v5286_v46 = vmul.f32 %v5208_v2, %v5000_v51  ;;  %v1042_v51 = vmul.f32 %v5210_v24, %v5008_v54 }
 0x133   : > { %8930 = vst [vmem:[#allocation46_spill] sm:$0xff] %v5277_v44  ;;  %v846_v48 = vmul.f32 %v5234_v13, %v5119_v10  ;;  %v1044_v44 = vmul.f32 %v5210_v24, %v5014_v56  ;;  %8934 = vst [vmem:[#allocation50_spill] sm:$0xff] %v5317_v43  ;;  %v5322_v54 = vmul.f32 %v5210_v24, %v5020_v58  ;;  %v8947_v43 = vld [vmem:[#allocation8_spill] sm:$0xff] }
 0x134   : > { %8926 = vst [vmem:[#allocation42_spill] sm:$0xff] %v5242_v28  ;;  %v561_v39 = vpop.permute.xlu0 %560  ;;  %v5252_v3 = vpop.permute.xlu1 %945  ;;  %8931 = vst [vmem:[#allocation47_spill] sm:$0xff] %v5286_v46  ;;  %v2578_v46 = vsub.s32 5, %v5188_v18  ;;  %v5330_v52 = vmul.f32 %v5210_v24, %v5026_v60  ;;  %v5334_v56 = vrot.slane %v5297_v49, %v630_v20  ;;  %v848_v57 = vmul.f32 %v5234_v13, %v5125_v12 }
 0x135   : > { %v650_v42 = vmul.f32 %v5208_v2, %v561_v39  ;;  %8935 = vst [vmem:[#allocation51_spill] sm:$0xff] %v5326_v55  ;;  %v5342_v58 = vrot.slane %v5297_v49, %v1022_v14  ;;  %v5345_v59 = vrot.slane %v5297_v49, %v2334_v50  ;;  %v5349_v60 = vmul.f32 %v5208_v2, %v5030_v61  ;;  %v8945_v55 = vld [vmem:[#allocation7_spill] sm:$0xff] }
 0x136   : > { %1205 = vperm.xlu1 %4565, %v4900_v30   ;;  %v5302_v30 = vmul.f32 %v5208_v2, %v5006_v53  ;;  %8936 = vst [vmem:[#allocation52_spill] sm:$0xff] %v5334_v56  ;;  %v5357_v12 = vmul.f32 %v5208_v2, %v5036_v63  ;;  %v5362_v14 = vrot.slane %v5297_v49, %v2578_v46  ;;  %v8943_v63 = vld [vmem:[#allocation6_spill] sm:$0xff]  ;;  %v8974_v56 = vld [vmem:[#allocation20_spill] sm:$0xff] }
 0x137   : > { %v878_v53 = vadd.f32 %v846_v48, %v650_v42  ;;  %v5339_v42 = vrot.slane %v5297_v49, %v826_v0  ;;  %8938 = vst [vmem:[#allocation54_spill] sm:$0xff] %v5342_v58  ;;  %8939 = vst [vmem:[#allocation55_spill] sm:$0xff] %v5349_v60  ;;  %v5366_v48 = vmul.f32 %v5210_v24, %v5038_v19 }
 0x138   : > { %8932 = vst [vmem:[#allocation48_spill] sm:$0xff] %v5302_v30  ;;  %v571_v39 = vpop.permute.xlu0 %570  ;;  %v5310_v10 = vpop.permute.xlu1 %953  ;;  %8940 = vst [vmem:[#allocation56_spill] sm:$0xff] %v5357_v12  ;;  %v830_v61 = vmul.f32 %v5234_v13, %v5069_v34  ;;  %v5376_v12 = vmul.f32 %v5210_v24, %v8943_v63  ;;  %v5380_v46 = vmul.f32 %v5208_v2, %v8945_v55 }
 0x139   : > { %v652_v30 = vmul.f32 %v5208_v2, %v571_v39  ;;  %8937 = vst [vmem:[#allocation53_spill] sm:$0xff] %v5339_v42  ;;  %v1074_v50 = vadd.f32 %v1042_v51, %v878_v53  ;;  %v8941_v39 = vld [vmem:[#allocation5_spill] sm:$0xff]  ;;  %v5386_v34 = vmul.f32 %v5219_v6, %v8947_v43  ;;  %v8950_v53 = vld [vmem:[#allocation10_spill] sm:$0xff]  ;;  %v1238_v55 = vmul.f32 %v5219_v6, %v5115_v7  ;;  %v8973_v42 = vld [vmem:[#allocation19_spill] sm:$0xff] }
 0x13a   : > { %1213 = vperm.xlu1 %4565, %v4908_v32   ;;  %v5353_v32 = vmul.f32 %v5210_v24, %v5032_v62  ;;  %v5372_v60 = vmul.f32 %v5208_v2, %v8941_v39  ;;  %8944 = vst [vmem:[#allocation6_spill] sm:$0xff] %v5376_v12  ;;  %8946 = vst [vmem:[#allocation7_spill] sm:$0xff] %v5380_v46  ;;  %v850_v43 = vmul.f32 %v5234_v13, %v5131_v11  ;;  %v8979_v12 = vld [vmem:[#allocation30_spill] sm:$0xff] }
 0x13b   : > { %v880_v62 = vadd.f32 %v848_v57, %v652_v30  ;;  %8948 = vst [vmem:[#allocation8_spill] sm:$0xff] %v5386_v34  ;;  %v8949_v30 = vld [vmem:[#allocation9_spill] sm:$0xff]  ;;  %v5394_v57 = vmul.f32 %v5219_v6, %v8950_v53  ;;  %v2890_v53 = vsub.s32 7, %v5188_v18  ;;  %v5410_v46 = vadd.f32 %v830_v61, %v5224_v17 }
 0x13c   : > { %v581_v0 = vpop.permute.xlu0 %580  ;;  %v5359_v20 = vpop.permute.xlu1 %961  ;;  %8942 = vst [vmem:[#allocation5_spill] sm:$0xff] %v5372_v60  ;;  %v5390_v51 = vmul.f32 %v5234_v13, %v8949_v30  ;;  %v2822_v30 = vsub.s32 6, %v5188_v18  ;;  %v1270_v7 = vadd.f32 %v1238_v55, %v1074_v50  ;;  %v5421_v58 = vmul.f32 %v5234_v13, %v5083_v1  ;;  %v5426_v17 = vld [vmem:[%s8563_s4] ss:$0 sm:$0xff] }
 0x13d   : > { %v654_v19 = vmul.f32 %v5208_v2, %v581_v0  ;;  %8951 = vst [vmem:[#allocation9_spill] sm:$0xff] %v5394_v57  ;;  %v8952_v0 = vld [vmem:[#allocation11_spill] sm:$0xff]  ;;  %v1076_v60 = vadd.f32 %v1044_v44, %v880_v62  ;;  %v5430_v44 = vmul.f32 %v5219_v6, %v5085_v21  ;;  %v852_v50 = vmul.f32 %v5234_v13, %v5138_v8  ;;  %v8976_v57 = vld [vmem:[#allocation24_spill] sm:$0xff] }
 0x13e   : > { %4568 = vset.pattern.permute.xlu1 %v8902_v5  ;;  %v5401_v5 = vmul.f32 %v5219_v6, %v8952_v0  ;;  %v832_v0 = vmul.f32 %v5234_v13, %v5076_v25  ;;  %v1240_v25 = vmul.f32 %v5219_v6, %v5121_v9  ;;  %v8957_v1 = vsub.s32 3, %v5188_v18 }
 0x13f   : > { %1460 = vperm.xlu1 %4568, %v5174_v15   ;;  %v882_v61 = vadd.f32 %v850_v43, %v654_v19  ;;  %v836_v19 = vmul.f32 %v5234_v13, %v5089_v35  ;;  %v5446_v21 = vmul.f32 %v5219_v6, %v5091_v33  ;;  %v5452_v8 = vrot.slane %v5297_v49, %v2822_v30  ;;  %v8961_v30 = vld [vmem:[#allocation14_spill] sm:$0xff] }
 0x140   : > { %8953 = vst [vmem:[#allocation10_spill] sm:$0xff] %v5401_v5  ;;  %v591_v39 = vpop.permute.xlu0 %590  ;;  %v5405_v63 = vpop.permute.xlu1 %969  ;;  %v8954_v5 = vld [vmem:[#allocation12_spill] sm:$0xff]  ;;  %v5440_v62 = vrot.slane %v5297_v49, %v8957_v1  ;;  %v1309_v35 = vadd.f32 %v5426_v17, %v1270_v7  ;;  %v1272_v43 = vadd.f32 %v1240_v25, %v1076_v60  ;;  %v8960_v1 = vld [vmem:[#allocation13_spill] sm:$0xff] }
 0x141   : > { %v656_v40 = vmul.f32 %v5208_v2, %v591_v39  ;;  %v5417_v11 = vmul.f32 %v5219_v6, %v8954_v5  ;;  %8956 = vst [vmem:[#allocation12_spill] sm:$0xff] %v5430_v44  ;;  %8958 = vst [vmem:[#allocation57_spill] sm:$0xff] %v5446_v21  ;;  %v5459_v5 = vmul.f32 %v5234_v13, %v5095_v23  ;;  %v8964_v7 = vld [vmem:[#allocation16_spill] sm:$0xff] }
 0x142   : > { %v5464_v39 = vmul.f32 %v5219_v6, %v5097_v4  ;;  %v840_v18 = vmul.f32 %v5234_v13, %v8960_v1  ;;  %v5470_v21 = vmul.f32 %v5219_v6, %v8961_v30  ;;  %v5477_v60 = vmul.f32 %v8964_v7, %v5219_v6 }
 0x143   : > { %8955 = vst [vmem:[#allocation11_spill] sm:$0xff] %v5417_v11  ;;  %4569 = vset.pattern.permute.xlu1 %v8892_v27  ;;  %v5455_v27 = vrot.slane %v5297_v49, %v2890_v53  ;;  %v884_v33 = vadd.f32 %v852_v50, %v656_v40  ;;  %v1078_v49 = vadd.f32 %v5322_v54, %v882_v61  ;;  %v8963_v53 = vld [vmem:[#allocation15_spill] sm:$0xff]  ;;  %v8966_v40 = vld [vmem:[#allocation18_spill] sm:$0xff]  ;;  %v8967_v50 = vld [vmem:[#allocation21_spill] sm:$0xff]  ;;  %v8971_v7 = vmov 2  }
 0x144   : > { %v601_v55 = vpop.permute.xlu0 %600  ;;  %1468 = vperm.xlu1 %4569, %v5061_v29   ;;  %v5449_v9 = vpop.permute.xlu1 %977  ;;  %8959 = vst [vmem:[#allocation58_spill] sm:$0xff] %v5464_v39  ;;  %8962 = vst [vmem:[#allocation13_spill] sm:$0xff] %v5470_v21  ;;  %v842_v23 = vmul.f32 %v5234_v13, %v8963_v53  ;;  %v1242_v4 = vmul.f32 %v5219_v6, %v8966_v40  ;;  %v854_v1 = vmul.f32 %v5234_v13, %v8967_v50  ;;  %v8968_v39 = vld [vmem:[#allocation23_spill] sm:$0xff]  ;;  %v8969_v21 = vld [vmem:[#allocation26_spill] sm:$0xff] }
 0x145   : > { %8965 = vst [vmem:[#allocation14_spill] sm:$0xff] %v5477_v60  ;;  %v658_v25 = vmul.f32 %v5208_v2, %v601_v55  ;;  %v856_v30 = vmul.f32 %v5234_v13, %v8968_v39  ;;  %v633_v54 = vmul.f32 %v5208_v2, %v8969_v21  ;;  %v8970_v61 = vld [vmem:[#allocation27_spill] sm:$0xff]  ;;  %v1341_v40 = vmax.f32 %v1309_v35, 0.0  ;;  %v8972_v39 = vld [vmem:[#allocation17_spill] sm:$0xff]  ;;  %v8975_v35 = vld [vmem:[#allocation22_spill] sm:$0xff] }
 0x146   : > { %v636_v53 = vmul.f32 %v5208_v2, %v8970_v61  ;;  %v1311_v55 = vadd.f32 %v5426_v17, %v1272_v43  ;;  %v1080_v11 = vadd.f32 %v5330_v52, %v884_v33  ;;  %v844_v21 = vmul.f32 %v5234_v13, %v8972_v39  ;;  %v8977_v33 = vld [vmem:[#allocation25_spill] sm:$0xff] }
 0x147   : > { %v1244_v61 = vmul.f32 %v5219_v6, %v8973_v42  ;;  %v1274_v28 = vadd.f32 %v1242_v4, %v1078_v49  ;;  %v1248_v43 = vmul.f32 %v5219_v6, %v8975_v35  ;;  %v5507_v52 = vmul.f32 %v5208_v2, %v8976_v57 }
 0x148   : > { %v611_v44 = vpop.permute.xlu0 %610  ;;  %4571 = vset.pattern.permute.xlu1 %v8971_v7  ;;  %v5491_v60 = vpop.permute.xlu1 %985  ;;  %v1246_v7 = vmul.f32 %v5219_v6, %v8974_v56  ;;  %v5511_v39 = vmul.f32 %v5234_v13, %v8977_v33  ;;  %v861_v42 = vadd.f32 %v5390_v51, %v633_v54  ;;  %v638_v56 = vmul.f32 %v5208_v2, %v5168_v16  ;;  %v8983_v54 = vld [vmem:[#allocation32_spill] sm:$0xff] }
 0x149   : > { %v660_v50 = vmul.f32 %v5208_v2, %v611_v44  ;;  %1480 = vperm.xlu1 %4571, %v5061_v29   ;;  %v886_v44 = vadd.f32 %v854_v1, %v658_v25  ;;  %v640_v49 = vmul.f32 %v5208_v2, %v8979_v12  ;;  %v864_v57 = vadd.f32 %v832_v0, %v636_v53  ;;  %v8986_v53 = vld [vmem:[#allocation37_spill] sm:$0xff] }
 0x14a   : > { %8978 = vst [vmem:[#allocation15_spill] sm:$0xff] %v5511_v39  ;;  %v5522_v34 = vmin.f32 %v1341_v40, 6.0  ;;  %v1343_v25 = vmax.f32 %v1311_v55, 0.0  ;;  %v1276_v1 = vadd.f32 %v1244_v61, %v1080_v11  ;;  %v642_v16 = vmul.f32 %v5208_v2, %v8983_v54  ;;  %v8985_v39 = vld [vmem:[#allocation28_spill] sm:$0xff]  ;;  %v8987_v54 = vld [vmem:[#allocation39_spill] sm:$0xff] }
 0x14b   : > { %v888_v29 = vadd.f32 %v856_v30, %v660_v50  ;;  %v8982_v30 = vld [vmem:[#allocation29_spill] sm:$0xff]  ;;  %v8984_v50 = vld [vmem:[#allocation35_spill] sm:$0xff]  ;;  %v1313_v33 = vadd.f32 %v5426_v17, %v1274_v28  ;;  %v5534_v0 = vmul.f32 %v5210_v24, %v8985_v39  ;;  %v646_v11 = vmul.f32 %v5208_v2, %v8986_v53 }
 0x14c   : > { %v5518_v4 = vpop.permute.xlu0 %620  ;;  %v5520_v35 = vpop.permute.xlu1 %993  ;;  %8981 = vst [vmem:[#allocation18_spill] sm:$0xff] %v5522_v34  ;;  %v1026_v51 = vmul.f32 %v5210_v24, %v8982_v30  ;;  %v644_v12 = vmul.f32 %v5208_v2, %v8984_v50  ;;  %v1082_v40 = vadd.f32 %v5353_v32, %v886_v44  ;;  %v866_v61 = vadd.f32 %v5421_v58, %v638_v56 }
 0x14d   : > { %8980 = vst [vmem:[#allocation16_spill] sm:$0xff] %v5520_v35  ;;  %1484 = vperm.xlu1 %4571, %v5174_v15   ;;  %v1084_v55 = vadd.f32 %v5366_v48, %v888_v29  ;;  %v868_v30 = vadd.f32 %v836_v19, %v640_v49  ;;  %v648_v35 = vmul.f32 %v5208_v2, %v8987_v54  ;;  %v8585_v6 = vrot.slane %v5522_v34, 7  ;;  %v8991_v54 = vld [vmem:[#allocation33_spill] sm:$0xff] }
 0x14e   : > { %v5548_v39 = vadd.f32 %v5228_v26, %v861_v42  ;;  %v5551_v53 = vmin.f32 %v1343_v25, 6.0  ;;  %v1315_v32 = vadd.f32 %v5426_v17, %v1276_v1  ;;  %v8989_v48 = vmov 3   ;;  %v8990_v26 = vld [vmem:[#allocation31_spill] sm:$0xff] }
 0x14f   : > { %v5556_v58 = vadd.f32 %v5238_v31, %v864_v57  ;;  %v5559_v19 = vadd.f32 %v1026_v51, %v5410_v46  ;;  %v870_v44 = vadd.f32 %v5459_v5, %v642_v16  ;;  %v872_v29 = vadd.f32 %v840_v18, %v644_v12  ;;  %v8992_v5 = vld [vmem:[#allocation36_spill] sm:$0xff] }
 0x150   : > { %v5543_v50 = vpop.permute.xlu0 %1391  ;;  %v5545_v28 = vpop.permute.xlu1 %1001  ;;  %8988 = vst [vmem:[#allocation21_spill] sm:$0xff] %v5551_v53  ;;  %v1345_v56 = vmax.f32 %v1313_v33, 0.0  ;;  %v5565_v42 = vmul.f32 %v5210_v24, %v8990_v26  ;;  %v874_v49 = vadd.f32 %v842_v23, %v646_v11  ;;  %v1278_v25 = vadd.f32 %v1246_v7, %v1082_v40 }
 0x151   : > { %4572 = vset.pattern.permute.xlu1 %v8989_v48  ;;  %v1280_v1 = vadd.f32 %v1248_v43, %v1084_v55  ;;  %v5569_v31 = vmul.f32 %v5210_v24, %v8991_v54  ;;  %v876_v57 = vadd.f32 %v844_v21, %v648_v35  ;;  %v5576_v18 = vadd.f32 %v5246_v37, %v866_v61  ;;  %v8994_v35 = vld [vmem:[#allocation38_spill] sm:$0xff] }
 0x152   : > { %1496 = vperm.xlu1 %4572, %v5174_v15   ;;  %v5579_v15 = vadd.f32 %v5256_v22, %v868_v30  ;;  %v5583_v23 = vmul.f32 %v5210_v24, %v8992_v5  ;;  %v5588_v7 = vsel %vm1551_vm0, 0.0, %v8585_v6  ;;  %v8584_v21 = vrot.slane %v5551_v53, 7  ;;  %v9008_v6 = vld [vmem:[#allocation15_spill] sm:$0xff] }
 0x153   : > { %8993 = vst [vmem:[#allocation23_spill] sm:$0xff] %v5588_v7  ;;  %v1347_v43 = vmax.f32 %v1315_v32, 0.0  ;;  %v5593_v16 = vmul.f32 %v5210_v24, %v8994_v35  ;;  %v5595_v37 = vmin.f32 %v1345_v56, 6.0  ;;  %v5598_v22 = vadd.f32 %v5264_v41, %v870_v44 }
 0x154   : > { %v5571_v46 = vpop.permute.xlu0 %1455  ;;  %v5573_v51 = vpop.permute.xlu1 %1009  ;;  %v5601_v12 = vadd.f32 %v5273_v38, %v872_v29  ;;  %v5605_v33 = vmul.f32 %v5210_v24, %v5215_v36  ;;  %v1317_v11 = vadd.f32 %v5426_v17, %v1278_v25  ;;  %v1319_v40 = vadd.f32 %v5426_v17, %v1280_v1 }
 0x155   : > { %8995 = vst [vmem:[#allocation26_spill] sm:$0xff] %v5595_v37  ;;  %v5610_v55 = vadd.f32 %v5281_v45, %v874_v49  ;;  %v5614_v61 = vmul.f32 %v5210_v24, %v5252_v3  ;;  %v5618_v41 = vmul.f32 %v5210_v24, %v5310_v10  ;;  %v5623_v36 = vadd.f32 %v5290_v47, %v876_v57 }
 0x156   : > { %v5627_v30 = vmul.f32 %v5345_v59, %v5588_v7  ;;  %v5632_v45 = vsel %vm1551_vm0, 0.0, %v8584_v21  ;;  %v5636_v3 = vmul.f32 %v5210_v24, %v5359_v20  ;;  %v5638_v10 = vmin.f32 %v1347_v43, 6.0 }
 0x157   : > { %8997 = vst [vmem:[#allocation17_spill] sm:$0xff] %v5632_v45  ;;  %v5642_v47 = vmul.f32 %v5362_v14, %v5588_v7  ;;  %v8590_v48 = vrot.slane %v5595_v37, 7  ;;  %v5647_v44 = vmul.f32 %v5210_v24, %v5405_v63  ;;  %v5651_v29 = vmul.f32 %v5210_v24, %v5449_v9  ;;  %v5668_v9 = vld [vmem:[%s8564_s5 + $0x8] ss:$0 sm:$0xff] }
 0x158   : > { %v5620_v38 = vpop.permute.xlu1 %1017  ;;  %8996 = vst [vmem:[#allocation27_spill] sm:$0xff] %v5627_v30  ;;  %8998 = vst [vmem:[#allocation19_spill] sm:$0xff] %v5638_v10  ;;  %v1349_v56 = vmax.f32 %v1317_v11, 0.0  ;;  %v1351_v26 = vmax.f32 %v1319_v40, 0.0  ;;  %v662_v49 = vmul.f32 %v5208_v2, %v5518_v4  ;;  %v5658_v25 = vmul.f32 %v5440_v62, %v5588_v7  ;;  %v9009_v7 = vld [vmem:[#allocation16_spill] sm:$0xff] }
 0x159   : > { %v698_v32 = vpop.permute.xlu0 %697  ;;  %8999 = vst [vmem:[#allocation20_spill] sm:$0xff] %v5642_v47  ;;  %v5662_v1 = vmul.f32 %v5210_v24, %v5491_v60  ;;  %v5673_v4 = vmul.f32 %v5455_v27, %v5632_v45  ;;  %v5683_v35 = vmul.f32 %v5668_v9, %v5632_v45  ;;  %v5688_v11 = vsel %vm1551_vm0, 0.0, %v8590_v48  ;;  %v9011_v47 = vld [vmem:[#allocation8_spill] sm:$0xff]  ;;  %v9012_v48 = vld [vmem:[#allocation41_spill] sm:$0xff] }
 0x15a   : > { %v828_v20 = vmul.f32 %v5234_v13, %v698_v32  ;;  %9000 = vst [vmem:[#allocation22_spill] sm:$0xff] %v5658_v25  ;;  %9004 = vst [vmem:[#allocation29_spill] sm:$0xff] %v5688_v11  ;;  %v5693_v60 = vmin.f32 %v1349_v56, 6.0  ;;  %v5695_v21 = vmin.f32 %v1351_v26, 6.0  ;;  %v890_v57 = vadd.f32 %v9008_v6, %v662_v49 }
 0x15b   : > { %9001 = vst [vmem:[#allocation24_spill] sm:$0xff] %v5673_v4  ;;  %9003 = vst [vmem:[#allocation30_spill] sm:$0xff] %v5683_v35  ;;  %v5713_v6 = vmul.f32 %v5543_v50, %v5208_v2  ;;  %v9021_v50 = vld [vmem:[#allocation52_spill] sm:$0xff] }
 0x15c   : > { %v860_v63 = vadd.f32 %v828_v20, %v5507_v52  ;;  %v5679_v52 = vmul.f32 %v5452_v8, %v5632_v45  ;;  %v9005_v20 = vld [vmem:[#allocation40_spill] sm:$0xff]  ;;  %9006 = vst [vmem:[#allocation32_spill] sm:$0xff] %v5693_v60  ;;  %9007 = vst [vmem:[#allocation35_spill] sm:$0xff] %v5695_v21  ;;  %v1732_v4 = vmul.f32 %v9021_v50, %v5632_v45 }
 0x15d   : > { %v710_v5 = vpop.permute.xlu0 %709  ;;  %v1094_v43 = vpop.permute.xlu1 %1093 }
 0x15e   : > { %9002 = vst [vmem:[#allocation25_spill] sm:$0xff] %v5679_v52  ;;  %v1056_v40 = vadd.f32 %v5534_v0, %v860_v63  ;;  %v831_v32 = vmul.f32 %v5234_v13, %v710_v5  ;;  %v1221_v54 = vmul.f32 %v9005_v20, %v1094_v43  ;;  %v5700_v52 = vmul.f32 %v5210_v24, %v9009_v7  ;;  %v9019_v63 = vld [vmem:[#allocation9_spill] sm:$0xff] }
 0x15f   : > { %v9013_v5 = vrot.slane %v5638_v10, 7  ;;  %v5717_v7 = vmul.f32 %v5210_v24, %v5545_v28  ;;  %v5728_v28 = vmul.f32 %v5571_v46, %v5208_v2  ;;  %v9022_v46 = vld [vmem:[#allocation53_spill] sm:$0xff] }
 0x160   : > { %9010 = vst [vmem:[#allocation28_spill] sm:$0xff] %v5700_v52  ;;  %v1252_v30 = vadd.f32 %v9011_v47, %v1056_v40  ;;  %v863_v25 = vadd.f32 %v831_v32, %v9012_v48  ;;  %v1253_v0 = vadd.f32 %v1221_v54, %v5548_v39  ;;  %v9017_v32 = vld [vmem:[#allocation6_spill] sm:$0xff] }
 0x161   : > { %v5709_v56 = vsel %vm1551_vm0, 0.0, %v9013_v5  ;;  %9015 = vst [vmem:[#allocation39_spill] sm:$0xff] %v5717_v7  ;;  %v718_v47 = vpop.permute.xlu0 %717  ;;  %v1098_v26 = vpop.permute.xlu1 %1097  ;;  %9016 = vst [vmem:[#allocation31_spill] sm:$0xff] %v5728_v28  ;;  %v5731_v5 = vadd.f32 %v9017_v32, %v890_v57  ;;  %v5740_v28 = vmul.f32 %v9022_v46, %v5632_v45  ;;  %v9024_v57 = vld [vmem:[#allocation54_spill] sm:$0xff] }
 0x162   : > { %9014 = vst [vmem:[#allocation37_spill] sm:$0xff] %v5709_v56  ;;  %v1291_v39 = vadd.f32 %v5426_v17, %v1252_v30  ;;  %v1059_v49 = vadd.f32 %v5565_v42, %v863_v25  ;;  %v1292_v54 = vadd.f32 %v5426_v17, %v1253_v0  ;;  %v833_v43 = vmul.f32 %v5234_v13, %v718_v47  ;;  %v9020_v42 = vld [vmem:[#allocation42_spill] sm:$0xff] }
 0x163   : > { %9018 = vst [vmem:[#allocation33_spill] sm:$0xff] %v5731_v5  ;;  %v1222_v0 = vmul.f32 %v9005_v20, %v1098_v26  ;;  %9023 = vst [vmem:[#allocation36_spill] sm:$0xff] %v5740_v28 }
 0x164   : > { %v1323_v48 = vmax.f32 %v1291_v39, 0.0  ;;  %v1255_v30 = vadd.f32 %v9019_v63, %v1059_v49  ;;  %v1324_v35 = vmax.f32 %v1292_v54, 0.0  ;;  %v865_v25 = vadd.f32 %v833_v43, %v9020_v42 }
 0x165   : > { %v726_v47 = vpop.permute.xlu0 %725  ;;  %v1106_v40 = vpop.permute.xlu1 %1105  ;;  %v5744_v39 = vmul.f32 %v9024_v57, %v5632_v45  ;;  %v5748_v63 = vmul.f32 %v5210_v24, %v5573_v51  ;;  %v9029_v43 = vrot.slane %v5693_v60, 7  ;;  %v9031_v42 = vrot.slane %v5695_v21, 7 }
 0x166   : > { %v5750_v49 = vmin.f32 %v1323_v48, 6.0  ;;  %v1294_v26 = vadd.f32 %v5426_v17, %v1255_v30  ;;  %v5753_v54 = vmin.f32 %v1324_v35, 6.0  ;;  %v1061_v51 = vadd.f32 %v5569_v31, %v865_v25 }
 0x167   : > { %9025 = vst [vmem:[#allocation38_spill] sm:$0xff] %v5744_v39  ;;  %9026 = vst [vmem:[#allocation40_spill] sm:$0xff] %v5748_v63  ;;  %v5758_v32 = vsel %vm1551_vm0, 0.0, %v9029_v43  ;;  %v5763_v45 = vsel %vm1551_vm0, 0.0, %v9031_v42  ;;  %v5768_v48 = vmul.f32 %v5345_v59, %v5688_v11  ;;  %v5772_v35 = vmul.f32 %v5210_v24, %v5620_v38  ;;  %v5778_v43 = vld [vmem:[%s8565_s6] ss:$0 sm:$0xff] }
 0x168   : > { %9027 = vst [vmem:[#allocation15_spill] sm:$0xff] %v5750_v49  ;;  %9028 = vst [vmem:[#allocation16_spill] sm:$0xff] %v5753_v54  ;;  %v1555_v30 = vrot.slane %v5750_v49, 7  ;;  %v1326_v60 = vmax.f32 %v1294_v26, 0.0  ;;  %v1556_v42 = vrot.slane %v5753_v54, 7  ;;  %v1254_v31 = vadd.f32 %v1222_v0, %v5559_v19  ;;  %v9044_v63 = vld [vmem:[#allocation43_spill] sm:$0xff] }
 0x169   : > { %9030 = vst [vmem:[#allocation8_spill] sm:$0xff] %v5758_v32  ;;  %9032 = vst [vmem:[#allocation41_spill] sm:$0xff] %v5763_v45  ;;  %v734_v25 = vpop.permute.xlu0 %733  ;;  %v1114_v45 = vpop.permute.xlu1 %1113  ;;  %v5783_v32 = vadd.f32 %v5778_v43, %v1732_v4  ;;  %v5795_v54 = vmul.f32 %v5440_v62, %v5688_v11  ;;  %v5799_v19 = vmul.f32 %v5362_v14, %v5688_v11  ;;  %v9039_v4 = vld [vmem:[#allocation10_spill] sm:$0xff] }
 0x16a   : > { %9033 = vst [vmem:[#allocation6_spill] sm:$0xff] %v5768_v48  ;;  %9034 = vst [vmem:[#allocation9_spill] sm:$0xff] %v5772_v35  ;;  %v5788_v26 = vsel %vm1551_vm0, %v1555_v30, %v1556_v42  ;;  %v5791_v49 = vsel %vm1551_vm0, %v1556_v42, 0.0  ;;  %v1257_v0 = vadd.f32 %v9039_v4, %v1061_v51  ;;  %v835_v38 = vmul.f32 %v5234_v13, %v726_v47 }
 0x16b   : > { %9035 = vst [vmem:[#allocation42_spill] sm:$0xff] %v5783_v32  ;;  %9036 = vst [vmem:[#allocation52_spill] sm:$0xff] %v5788_v26  ;;  %v5806_v39 = vmul.f32 %v5455_v27, %v5709_v56  ;;  %v5808_v42 = vmin.f32 %v1326_v60, 6.0  ;;  %v5812_v32 = vmul.f32 %v9022_v46, %v5788_v26  ;;  %v1783_v11 = vmul.f32 %v9022_v46, %v5791_v49 }
 0x16c   : > { %9037 = vst [vmem:[#allocation53_spill] sm:$0xff] %v5795_v54  ;;  %9038 = vst [vmem:[#allocation54_spill] sm:$0xff] %v5799_v19  ;;  %v5818_v51 = vmul.f32 %v9024_v57, %v5788_v26  ;;  %v5821_v47 = vsel %vm1551_vm0, 0.0, %v1555_v30  ;;  %v2028_v4 = vmul.f32 %v9024_v57, %v5791_v49  ;;  %v1293_v60 = vadd.f32 %v5426_v17, %v1254_v31 }
 0x16d   : > { %9040 = vst [vmem:[#allocation10_spill] sm:$0xff] %v5806_v39  ;;  %9041 = vst [vmem:[#allocation59_spill] sm:$0xff] %v5808_v42  ;;  %v742_v21 = vpop.permute.xlu0 %741  ;;  %v1122_v48 = vpop.permute.xlu1 %1121  ;;  %v5828_v54 = vmul.f32 %v5668_v9, %v5709_v56  ;;  %v1883_v35 = vrot.slane %v1783_v11, 1  ;;  %v1224_v37 = vmul.f32 %v9005_v20, %v1106_v40  ;;  %v867_v53 = vadd.f32 %v835_v38, %v9044_v63 }
 0x16e   : > { %9042 = vst [vmem:[#allocation60_spill] sm:$0xff] %v5821_v47  ;;  %v2128_v30 = vrot.slane %v2028_v4, 2  ;;  %v5837_v31 = vmul.f32 %v5452_v8, %v5709_v56  ;;  %v5841_v7 = vmul.f32 %v9022_v46, %v5821_v47  ;;  %v9046_v11 = vrot.slane %v5812_v32, 1 }
 0x16f   : > { %9043 = vst [vmem:[#allocation61_spill] sm:$0xff] %v5828_v54  ;;  %v1296_v40 = vadd.f32 %v5426_v17, %v1257_v0  ;;  %v5850_v63 = vmul.f32 %v9024_v57, %v5821_v47  ;;  %v9047_v38 = vrot.slane %v5818_v51, 2  ;;  %v1256_v0 = vadd.f32 %v1224_v37, %v5556_v58  ;;  %v9052_v54 = vld [vmem:[#allocation11_spill] sm:$0xff] }
 0x170   : > { %9045 = vst [vmem:[#allocation43_spill] sm:$0xff] %v5837_v31  ;;  %v1884_v10 = vsel %vm1874_vm1, %v9046_v11, %v1883_v35  ;;  %v1713_v31 = vmul.f32 %v9021_v50, %v5788_v26  ;;  %v1325_v11 = vmax.f32 %v1293_v60, 0.0  ;;  %v5864_v52 = vmul.f32 %v9021_v50, %v5821_v47 }
 0x171   : > { %v5855_v4 = vsel %vm2119_vm2, %v9047_v38, %v2128_v30  ;;  %v750_v34 = vpop.permute.xlu0 %749  ;;  %v1328_v35 = vmax.f32 %v1296_v40, 0.0  ;;  %v1130_v19 = vpop.permute.xlu1 %1129  ;;  %v1063_v30 = vadd.f32 %v5583_v23, %v867_v53  ;;  %v837_v38 = vmul.f32 %v5234_v13, %v734_v25  ;;  %v9053_v53 = vld [vmem:[#allocation44_spill] sm:$0xff] }
 0x172   : > { %9048 = vst [vmem:[#allocation62_spill] sm:$0xff] %v5855_v4  ;;  %v1226_v56 = vmul.f32 %v9005_v20, %v1114_v45  ;;  %v9049_v4 = vrot.slane %v5808_v42, 7  ;;  %v839_v58 = vmul.f32 %v5234_v13, %v742_v21  ;;  %v1228_v25 = vmul.f32 %v9005_v20, %v1122_v48 }
 0x173   : > { %v5875_v60 = vmin.f32 %v1328_v35, 6.0  ;;  %v1259_v39 = vadd.f32 %v9052_v54, %v1063_v30  ;;  %v869_v23 = vadd.f32 %v837_v38, %v9053_v53  ;;  %v1745_v45 = vadd.f32 %v5778_v43, %v1713_v31 }
 0x174   : > { %v5873_v40 = vsel %vm1551_vm0, %v9049_v4, 0.0  ;;  %v1295_v28 = vadd.f32 %v5426_v17, %v1256_v0  ;;  %v1258_v47 = vadd.f32 %v1226_v56, %v5576_v18  ;;  %v9054_v4 = vld [vmem:[#allocation45_spill] sm:$0xff]  ;;  %v5898_v31 = vmul.f32 %v5345_v59, %v5788_v26 }
 0x175   : > { %9050 = vst [vmem:[#allocation63_spill] sm:$0xff] %v5873_v40  ;;  %9051 = vst [vmem:[#allocation64_spill] sm:$0xff] %v5875_v60  ;;  %v871_v5 = vadd.f32 %v839_v58, %v9054_v4  ;;  %v5888_v35 = vmul.f32 %v9022_v46, %v5873_v40  ;;  %v5892_v21 = vmul.f32 %v9024_v57, %v5873_v40  ;;  %v758_v30 = vpop.permute.xlu0 %757  ;;  %v1562_v18 = vrot.slane %v5875_v60, 7  ;;  %v1138_v38 = vpop.permute.xlu1 %1137  ;;  %v9059_v4 = vld [vmem:[#allocation12_spill] sm:$0xff]  ;;  %v9060_v60 = vld [vmem:[#allocation57_spill] sm:$0xff] }
 0x176   : > { %v1298_v54 = vadd.f32 %v5426_v17, %v1259_v39  ;;  %v1065_v48 = vadd.f32 %v5593_v16, %v869_v23  ;;  %v5901_v56 = vmin.f32 %v1325_v11, 6.0  ;;  %v5906_v58 = vmul.f32 %v5345_v59, %v5791_v49 }
 0x177   : > { %9055 = vst [vmem:[#allocation11_spill] sm:$0xff] %v5888_v35  ;;  %9056 = vst [vmem:[#allocation44_spill] sm:$0xff] %v5892_v21  ;;  %v1067_v0 = vadd.f32 %v5605_v33, %v871_v5  ;;  %v1260_v39 = vadd.f32 %v1228_v25, %v5579_v15  ;;  %v841_v16 = vmul.f32 %v5234_v13, %v750_v34  ;;  %v1327_v23 = vmax.f32 %v1295_v28, 0.0 }
 0x178   : > { %9057 = vst [vmem:[#allocation45_spill] sm:$0xff] %v5901_v56  ;;  %9058 = vst [vmem:[#allocation65_spill] sm:$0xff] %v5906_v58  ;;  %v1330_v53 = vmax.f32 %v1298_v54, 0.0  ;;  %v1261_v37 = vadd.f32 %v9059_v4, %v1065_v48  ;;  %v1297_v40 = vadd.f32 %v5426_v17, %v1258_v47  ;;  %v5915_v5 = vadd.f32 %v1884_v10, %v1745_v45  ;;  %v9065_v48 = vld [vmem:[#allocation46_spill] sm:$0xff] }
 0x179   : > { %v1263_v11 = vadd.f32 %v9060_v60, %v1067_v0  ;;  %v5919_v54 = vmul.f32 %v5362_v14, %v5791_v49  ;;  %v5922_v15 = vsel %vm1551_vm0, %v1562_v18, 0.0  ;;  %v1558_v34 = vrot.slane %v5901_v56, 7  ;;  %v5932_v0 = vpop.permute.xlu0 %765  ;;  %v1146_v56 = vpop.permute.xlu1 %1145 }
 0x17a   : > { %9061 = vst [vmem:[#allocation12_spill] sm:$0xff] %v5915_v5  ;;  %9063 = vst [vmem:[#allocation66_spill] sm:$0xff] %v5922_v15  ;;  %v1300_v28 = vadd.f32 %v5426_v17, %v1261_v37  ;;  %v5927_v60 = vmin.f32 %v1330_v53, 6.0  ;;  %v1299_v25 = vadd.f32 %v5426_v17, %v1260_v39  ;;  %v873_v10 = vadd.f32 %v841_v16, %v9065_v48 }
 0x17b   : > { %9062 = vst [vmem:[#allocation57_spill] sm:$0xff] %v5919_v54  ;;  %v1302_v47 = vadd.f32 %v5426_v17, %v1263_v11  ;;  %v1230_v45 = vmul.f32 %v9005_v20, %v1130_v19  ;;  %v5934_v49 = vmin.f32 %v1327_v23, 6.0  ;;  %v1329_v33 = vmax.f32 %v1297_v40, 0.0 }
 0x17c   : > { %9064 = vst [vmem:[#allocation67_spill] sm:$0xff] %v5927_v60  ;;  %v1332_v4 = vmax.f32 %v1300_v28, 0.0  ;;  %v1069_v11 = vadd.f32 %v5614_v61, %v873_v10  ;;  %v843_v39 = vmul.f32 %v5234_v13, %v758_v30  ;;  %v5943_v19 = vmul.f32 %v9022_v46, %v5922_v15 }
 0x17d   : > { %9066 = vst [vmem:[#allocation46_spill] sm:$0xff] %v5934_v49  ;;  %v1334_v26 = vmax.f32 %v1302_v47, 0.0  ;;  %v1262_v53 = vadd.f32 %v1230_v45, %v5598_v22  ;;  %v5947_v23 = vmul.f32 %v9024_v57, %v5922_v15  ;;  %v1565_v28 = vrot.slane %v5927_v60, 7  ;;  %v9071_v22 = vld [vmem:[#allocation58_spill] sm:$0xff]  ;;  %v9076_v60 = vld [vmem:[#allocation47_spill] sm:$0xff] }
 0x17e   : > { %9067 = vst [vmem:[#allocation68_spill] sm:$0xff] %v5943_v19  ;;  %v5949_v40 = vmin.f32 %v1332_v4, 6.0  ;;  %v1331_v61 = vmax.f32 %v1299_v25, 0.0  ;;  %v1265_v48 = vadd.f32 %v9071_v22, %v1069_v11  ;;  %v9072_v30 = vrot.slane %v5808_v42, 7  ;;  %v774_v22 = vpop.permute.xlu0 %773 }
 0x17f   : > { %9068 = vst [vmem:[#allocation69_spill] sm:$0xff] %v5947_v23  ;;  %v5952_v47 = vmin.f32 %v1334_v26, 6.0  ;;  %v1561_v45 = vrot.slane %v5934_v49, 7  ;;  %v5961_v16 = vmin.f32 %v1329_v33, 6.0  ;;  %v1301_v37 = vadd.f32 %v5426_v17, %v1262_v53  ;;  %v1154_v49 = vpop.permute.xlu1 %1153 }
 0x180   : > { %9069 = vst [vmem:[#allocation70_spill] sm:$0xff] %v5949_v40  ;;  %v5958_v10 = vsel %vm1551_vm0, %v1558_v34, %v9072_v30  ;;  %v5965_v4 = vsel %vm1551_vm0, 0.0, %v1558_v34  ;;  %v1568_v26 = vrot.slane %v5949_v40, 7  ;;  %v1304_v25 = vadd.f32 %v5426_v17, %v1265_v48 }
 0x181   : > { %9070 = vst [vmem:[#allocation71_spill] sm:$0xff] %v5952_v47  ;;  %9073 = vst [vmem:[#allocation58_spill] sm:$0xff] %v5958_v10  ;;  %v875_v11 = vadd.f32 %v843_v39, %v9076_v60  ;;  %v1571_v30 = vrot.slane %v5952_v47, 7  ;;  %v1333_v5 = vmax.f32 %v1301_v37, 0.0  ;;  %v1232_v33 = vmul.f32 %v9005_v20, %v1138_v38 }
 0x182   : > { %9074 = vst [vmem:[#allocation72_spill] sm:$0xff] %v5961_v16  ;;  %9075 = vst [vmem:[#allocation73_spill] sm:$0xff] %v5965_v4  ;;  %v5975_v34 = vsel %vm1551_vm0, %v1565_v28, 0.0  ;;  %v5977_v21 = vmin.f32 %v1331_v61, 6.0  ;;  %v1336_v40 = vmax.f32 %v1304_v25, 0.0  ;;  %v5980_v48 = vsel %vm1551_vm0, %v1561_v45, %v1562_v18 }
 0x183   : > { %9077 = vst [vmem:[#allocation47_spill] sm:$0xff] %v5975_v34  ;;  %9079 = vst [vmem:[#allocation75_spill] sm:$0xff] %v5980_v48  ;;  %v5983_v60 = vsel %vm1551_vm0, 0.0, %v1561_v45  ;;  %v1564_v39 = vrot.slane %v5961_v16, 7  ;;  %v1071_v37 = vadd.f32 %v5618_v41, %v875_v11  ;;  %v5988_v38 = vsel %vm1551_vm0, %v1568_v26, 0.0  ;;  %v9087_v41 = vld [vmem:[#allocation13_spill] sm:$0xff] }
 0x184   : > { %9078 = vst [vmem:[#allocation74_spill] sm:$0xff] %v5977_v21  ;;  %9080 = vst [vmem:[#allocation76_spill] sm:$0xff] %v5983_v60  ;;  %v5990_v53 = vmin.f32 %v1336_v40, 6.0  ;;  %v5992_v42 = vmin.f32 %v1333_v5, 6.0  ;;  %v1264_v61 = vadd.f32 %v1232_v33, %v5601_v12  ;;  %v5997_v18 = vmul.f32 %v9022_v46, %v5975_v34  ;;  %v782_v33 = vpop.permute.xlu0 %781 }
 0x185   : > { %9081 = vst [vmem:[#allocation77_spill] sm:$0xff] %v5988_v38  ;;  %v6001_v45 = vmul.f32 %v9024_v57, %v5975_v34  ;;  %v6004_v25 = vsel %vm1551_vm0, %v1571_v30, 0.0  ;;  %v1267_v11 = vadd.f32 %v9087_v41, %v1071_v37  ;;  %v1567_v40 = vrot.slane %v5977_v21, 7  ;;  %v1397_v41 = vpop.permute.xlu1 %1396 }
 0x186   : > { %9082 = vst [vmem:[#allocation78_spill] sm:$0xff] %v5990_v53  ;;  %9083 = vst [vmem:[#allocation79_spill] sm:$0xff] %v5992_v42  ;;  %v1303_v47 = vadd.f32 %v5426_v17, %v1264_v61  ;;  %v1234_v12 = vmul.f32 %v9005_v20, %v1146_v56  ;;  %v6013_v16 = vmul.f32 %v9022_v46, %v5988_v38  ;;  %v6024_v5 = vsel %vm1551_vm0, 0.0, %v1564_v39 }
 0x187   : > { %9084 = vst [vmem:[#allocation80_spill] sm:$0xff] %v5997_v18  ;;  %9085 = vst [vmem:[#allocation81_spill] sm:$0xff] %v6001_v45  ;;  %v6017_v23 = vmul.f32 %v9024_v57, %v5988_v38  ;;  %v6020_v19 = vsel %vm1551_vm0, %v1564_v39, %v1565_v28  ;;  %v1306_v37 = vadd.f32 %v5426_v17, %v1267_v11  ;;  %v1570_v21 = vrot.slane %v5992_v42, 7 }
 0x188   : > { %9086 = vst [vmem:[#allocation82_spill] sm:$0xff] %v6004_v25  ;;  %9088 = vst [vmem:[#allocation13_spill] sm:$0xff] %v6013_v16  ;;  %v6028_v56 = vmul.f32 %v9022_v46, %v6004_v25  ;;  %v6032_v61 = vmul.f32 %v9024_v57, %v6004_v25  ;;  %v9093_v11 = vrot.slane %v5990_v53, 7  ;;  %v845_v39 = vmul.f32 %v5234_v13, %v5932_v0 }
 0x189   : > { %9089 = vst [vmem:[#allocation83_spill] sm:$0xff] %v6017_v23  ;;  %9090 = vst [vmem:[#allocation84_spill] sm:$0xff] %v6020_v19  ;;  %v6045_v15 = vsel %vm1551_vm0, 0.0, %v1567_v40  ;;  %v1335_v35 = vmax.f32 %v1303_v47, 0.0  ;;  %v1266_v25 = vadd.f32 %v1234_v12, %v5610_v55  ;;  %v847_v42 = vmul.f32 %v5234_v13, %v774_v22  ;;  %v6063_v47 = vpop.permute.xlu0 %789  ;;  %v9097_v12 = vld [vmem:[#allocation48_spill] sm:$0xff]  ;;  %v6078_v0 = vpop.permute.xlu1 %1404 }
 0x18a   : > { %9091 = vst [vmem:[#allocation85_spill] sm:$0xff] %v6028_v56  ;;  %9092 = vst [vmem:[#allocation86_spill] sm:$0xff] %v6032_v61  ;;  %v6040_v34 = vsel %vm1551_vm0, %v9093_v11, 0.0  ;;  %v6052_v45 = vsel %vm1551_vm0, %v1567_v40, %v1568_v26  ;;  %v1338_v11 = vmax.f32 %v1306_v37, 0.0  ;;  %v6061_v55 = vsel %vm1551_vm0, %v1570_v21, %v1571_v30 }
 0x18b   : > { %9094 = vst [vmem:[#allocation87_spill] sm:$0xff] %v6040_v34  ;;  %9095 = vst [vmem:[#allocation88_spill] sm:$0xff] %v6052_v45  ;;  %v6058_v54 = vmul.f32 %v9022_v46, %v6040_v34  ;;  %v6066_v22 = vsel %vm1551_vm0, 0.0, %v1570_v21  ;;  %v6069_v26 = vadd.f32 %v845_v39, %v9097_v12  ;;  %v1744_v40 = vadd.f32 %v5778_v43, %v5864_v52  ;;  %v9102_v12 = vld [vmem:[#allocation49_spill] sm:$0xff] }
 0x18c   : > { %v9098_v37 = vrot.slane %v5812_v32, 1  ;;  %v9099_v28 = vrot.slane %v5841_v7, 1  ;;  %v6082_v30 = vmul.f32 %v9024_v57, %v6040_v34  ;;  %v6084_v21 = vmin.f32 %v1335_v35, 6.0 }
 0x18d   : > { %9096 = vst [vmem:[#allocation89_spill] sm:$0xff] %v6058_v54  ;;  %v1305_v39 = vadd.f32 %v5426_v17, %v1266_v25  ;;  %v6088_v18 = vadd.f32 %v847_v42, %v9102_v12  ;;  %v6090_v52 = vmin.f32 %v1338_v11, 6.0  ;;  %v1236_v32 = vmul.f32 %v9005_v20, %v1154_v49 }
 0x18e   : > { %v1882_v38 = vsel %vm1874_vm1, %v9099_v28, %v9098_v37  ;;  %9100 = vst [vmem:[#allocation48_spill] sm:$0xff] %v6082_v30  ;;  %9101 = vst [vmem:[#allocation90_spill] sm:$0xff] %v6084_v21  ;;  %v2339_v28 = vmul.f32 %v5345_v59, %v5965_v4  ;;  %v849_v23 = vmul.f32 %v5234_v13, %v782_v33  ;;  %v9104_v35 = vrot.slane %v5818_v51, 2  ;;  %v6123_v37 = vpop.permute.xlu1 %1416 }
 0x18f   : > { %9103 = vst [vmem:[#allocation49_spill] sm:$0xff] %v6090_v52  ;;  %v1989_v7 = vadd.f32 %v1882_v38, %v1744_v40  ;;  %v9105_v16 = vrot.slane %v5850_v63, 2  ;;  %v2270_v42 = vmul.f32 %v5440_v62, %v5965_v4  ;;  %v6106_v49 = vmul.f32 %v5345_v59, %v5958_v10 }
 0x190   : > { %v2437_v38 = vrot.slane %v2339_v28, 1  ;;  %v2583_v40 = vmul.f32 %v5362_v14, %v5965_v4  ;;  %v1573_v51 = vrot.slane %v6084_v21, 7  ;;  %v1337_v12 = vmax.f32 %v1305_v39, 0.0 }
 0x191   : > { %v2127_v25 = vsel %vm2119_vm2, %v9105_v16, %v9104_v35  ;;  %9106 = vst [vmem:[#allocation91_spill] sm:$0xff] %v6106_v49  ;;  %v6113_v63 = vmul.f32 %v1397_v41, %v5208_v2  ;;  %v6115_v16 = vpop.permute.xlu0 %797  ;;  %v6121_v28 = vmul.f32 %v5362_v14, %v5958_v10  ;;  %v1268_v33 = vadd.f32 %v1236_v32, %v5623_v36 }
 0x192   : > { %v2234_v11 = vadd.f32 %v2127_v25, %v1989_v7  ;;  %v8658_v25 = vrot.slane %v6106_v49, 1  ;;  %v2681_v21 = vrot.slane %v2583_v40, 2  ;;  %v2895_v41 = vmul.f32 %v5455_v27, %v5983_v60  ;;  %v9109_v7 = vld [vmem:[#allocation50_spill] sm:$0xff] }
 0x193   : > { %9107 = vst [vmem:[#allocation92_spill] sm:$0xff] %v6121_v28  ;;  %v6130_v39 = vmul.f32 %v5455_v27, %v5980_v48  ;;  %v8664_v30 = vrot.slane %v6121_v28, 2  ;;  %v3139_v36 = vmul.f32 %v5668_v9, %v5983_v60  ;;  %v9110_v32 = vrot.slane %v5990_v53, 7 }
 0x194   : > { %v2302_v35 = vadd.f32 %v2270_v42, %v2234_v11  ;;  %v6133_v42 = vadd.f32 %v849_v23, %v9109_v7  ;;  %v2439_v11 = vsel %vm1874_vm1, %v2437_v38, %v8658_v25  ;;  %v6147_v54 = vsel %vm1551_vm0, 0.0, %v1573_v51 }
 0x195   : > { %9108 = vst [vmem:[#allocation93_spill] sm:$0xff] %v6130_v39  ;;  %v6144_v40 = vsel %vm1551_vm0, %v1573_v51, %v9110_v32  ;;  %v6151_v23 = vmul.f32 %v5668_v9, %v5980_v48  ;;  %v9112_v38 = vrot.slane %v6090_v52, 7  ;;  %v2683_v25 = vsel %vm2119_vm2, %v2681_v21, %v8664_v30  ;;  %v6165_v56 = vpop.permute.xlu0 %805 }
 0x196   : > { %v2546_v61 = vadd.f32 %v2439_v11, %v2302_v35  ;;  %v2993_v53 = vrot.slane %v2895_v41, 1  ;;  %v8674_v32 = vrot.slane %v6130_v39, 1  ;;  %v2826_v51 = vmul.f32 %v5452_v8, %v5983_v60 }
 0x197   : > { %9111 = vst [vmem:[#allocation50_spill] sm:$0xff] %v6151_v23  ;;  %v6156_v7 = vsel %vm1551_vm0, %v9112_v38, 0.0  ;;  %v3237_v35 = vrot.slane %v3139_v36, 2  ;;  %v6167_v49 = vmin.f32 %v1337_v12, 6.0  ;;  %v6170_v38 = vadd.f32 %v5426_v17, %v1268_v33 }
 0x198   : > { %9113 = vst [vmem:[#allocation94_spill] sm:$0xff] %v6156_v7  ;;  %v2790_v34 = vadd.f32 %v2683_v25, %v2546_v61  ;;  %v1716_v21 = vmul.f32 %v9021_v50, %v5983_v60  ;;  %v1787_v41 = vmul.f32 %v9022_v46, %v5983_v60  ;;  %v6176_v61 = vpop.permute.xlu1 %1420  ;;  %v6180_v25 = vmul.f32 %v9022_v46, %v6156_v7 }
 0x199   : > { %9114 = vst [vmem:[#allocation95_spill] sm:$0xff] %v6167_v49  ;;  %v6184_v36 = vmul.f32 %v9024_v57, %v6156_v7  ;;  %v6188_v33 = vmul.f32 %v9022_v46, %v5980_v48  ;;  %v2995_v30 = vsel %vm1874_vm1, %v2993_v53, %v8674_v32  ;;  %v2032_v58 = vmul.f32 %v9024_v57, %v5983_v60 }
 0x19a   : > { %9115 = vst [vmem:[#allocation96_spill] sm:$0xff] %v6180_v25  ;;  %v2858_v12 = vadd.f32 %v2826_v51, %v2790_v34  ;;  %v1748_v11 = vadd.f32 %v5778_v43, %v1716_v21  ;;  %v1890_v28 = vrot.slane %v1787_v41, 1  ;;  %v9118_v4 = vrot.slane %v6151_v23, 2 }
 0x19b   : > { %9116 = vst [vmem:[#allocation97_spill] sm:$0xff] %v6184_v36  ;;  %9117 = vst [vmem:[#allocation98_spill] sm:$0xff] %v6188_v33  ;;  %v8679_v34 = vrot.slane %v6188_v33, 1  ;;  %v6202_v51 = vmul.f32 %v9024_v57, %v5980_v48  ;;  %v2135_v39 = vrot.slane %v2032_v58, 2  ;;  %v2345_v53 = vmul.f32 %v5345_v59, %v6024_v5 }
 0x19c   : > { %v3102_v10 = vadd.f32 %v2995_v30, %v2858_v12  ;;  %v3239_v7 = vsel %vm2119_vm2, %v3237_v35, %v9118_v4  ;;  %v6208_v21 = vmul.f32 %v5345_v59, %v6020_v19  ;;  %v2589_v30 = vmul.f32 %v5362_v14, %v6024_v5  ;;  %v6220_v12 = vpop.permute.xlu0 %813 }
 0x19d   : > { %9119 = vst [vmem:[#allocation99_spill] sm:$0xff] %v6202_v51  ;;  %v1892_v4 = vsel %vm1874_vm1, %v1890_v28, %v8679_v34  ;;  %v8684_v35 = vrot.slane %v6202_v51, 2  ;;  %v6218_v58 = vmul.f32 %v5362_v14, %v6020_v19  ;;  %v1339_v23 = vmax.f32 %v6170_v38, 0.0 }
 0x19e   : > { %9120 = vst [vmem:[#allocation100_spill] sm:$0xff] %v6208_v21  ;;  %v3346_v41 = vadd.f32 %v3239_v7, %v3102_v10  ;;  %v1411_v48 = vmul.f32 %v6078_v0, %v5234_v13  ;;  %v1993_v10 = vadd.f32 %v1892_v4, %v1748_v11  ;;  %v6226_v7 = vpop.permute.xlu1 %1432  ;;  %v2447_v34 = vrot.slane %v2345_v53, 1 }
 0x19f   : > { %9121 = vst [vmem:[#allocation101_spill] sm:$0xff] %v6218_v58  ;;  %v2137_v28 = vsel %vm2119_vm2, %v2135_v39, %v8684_v35  ;;  %v2274_v32 = vmul.f32 %v5440_v62, %v6024_v5  ;;  %v2901_v38 = vmul.f32 %v5455_v27, %v6045_v15  ;;  %v6238_v0 = vmul.f32 %v5455_v27, %v6052_v45 }
 0x1a0   : > { %v3378_v33 = vmax.f32 %v3346_v41, 0.0  ;;  %v2238_v60 = vadd.f32 %v2137_v28, %v1993_v10  ;;  %v2691_v41 = vrot.slane %v2589_v30, 2  ;;  %v3145_v39 = vmul.f32 %v5668_v9, %v6045_v15 }
 0x1a1   : > { %9122 = vst [vmem:[#allocation102_spill] sm:$0xff] %v6238_v0  ;;  %v1413_v53 = vadd.f32 %v1411_v48, %v5713_v6  ;;  %v6246_v28 = vmul.f32 %v5668_v9, %v6052_v45  ;;  %v1423_v35 = vmul.f32 %v6123_v37, %v5210_v24  ;;  %v9124_v30 = vrot.slane %v6208_v21, 1  ;;  %v6258_v48 = vpop.permute.xlu0 %821 }
 0x1a2   : > { %v3410_v11 = vmin.f32 %v3378_v33, 6.0  ;;  %v2306_v10 = vadd.f32 %v2274_v32, %v2238_v60  ;;  %v2830_v6 = vmul.f32 %v5452_v8, %v6045_v15  ;;  %v3003_v32 = vrot.slane %v2901_v38, 1  ;;  %v6261_v19 = vpop.permute.xlu1 %1157  ;;  %v9126_v38 = vld [vmem:[#allocation14_spill] sm:$0xff] }
 0x1a3   : > { %9123 = vst [vmem:[#allocation103_spill] sm:$0xff] %v6246_v28  ;;  %v2449_v4 = vsel %vm1874_vm1, %v2447_v34, %v9124_v30  ;;  %v1425_v51 = vadd.f32 %v1423_v35, %v1413_v53  ;;  %v9125_v33 = vrot.slane %v6218_v58, 2  ;;  %v3247_v36 = vrot.slane %v3145_v39, 2 }
 0x1a4   : > { %3476 = vrot.lane.b32.xlu0 %v3410_v11, %s4660_s30  ;;  %v2550_v60 = vadd.f32 %v2449_v4, %v2306_v10  ;;  %v1720_v34 = vmul.f32 %v9021_v50, %v6045_v15  ;;  %v1793_v30 = vmul.f32 %v9022_v46, %v6045_v15  ;;  %v6274_v35 = vmul.f32 %v9022_v46, %v6052_v45 }
 0x1a5   : > { %v2693_v11 = vsel %vm2119_vm2, %v2691_v41, %v9125_v33  ;;  %v1437_v10 = vadd.f32 %v9126_v38, %v1425_v51  ;;  %v2038_v41 = vmul.f32 %v9024_v57, %v6045_v15  ;;  %v6281_v39 = vmul.f32 %v9024_v57, %v6052_v45  ;;  %v1409_v21 = vpop.permute.xlu0 %1408 }
 0x1a6   : > { %v2794_v25 = vadd.f32 %v2693_v11, %v2550_v60  ;;  %9127 = vst [vmem:[#allocation14_spill] sm:$0xff] %v6274_v35  ;;  %v1752_v53 = vadd.f32 %v5778_v43, %v1720_v34  ;;  %v1900_v37 = vrot.slane %v1793_v30, 1  ;;  %v9129_v60 = vrot.slane %v6238_v0, 1 }
 0x1a7   : > { %9128 = vst [vmem:[#allocation104_spill] sm:$0xff] %v6281_v39  ;;  %v1439_v51 = vadd.f32 %v5426_v17, %v1437_v10  ;;  %v8694_v38 = vrot.slane %v6274_v35, 1  ;;  %v2145_v4 = vrot.slane %v2038_v41, 2  ;;  %v2351_v30 = vmul.f32 %v5345_v59, %v6066_v22  ;;  %v1166_v10 = vpop.permute.xlu1 %1165 }
 0x1a8   : > { %v2862_v33 = vadd.f32 %v2830_v6, %v2794_v25  ;;  %v3005_v11 = vsel %vm1874_vm1, %v3003_v32, %v9129_v60  ;;  %v6293_v58 = vmul.f32 %v5345_v59, %v6061_v55  ;;  %v2595_v17 = vmul.f32 %v5362_v14, %v6066_v22 }
 0x1a9   : > { %v1441_v6 = vmax.f32 %v1439_v51, 0.0  ;;  %v1902_v32 = vsel %vm1874_vm1, %v1900_v37, %v8694_v38  ;;  %v6300_v41 = vmin.f32 %v1339_v23, 6.0  ;;  %v9132_v60 = vrot.slane %v6246_v28, 2 }
 0x1aa   : > { %9130 = vst [vmem:[#allocation105_spill] sm:$0xff] %v6293_v58  ;;  %v3106_v25 = vadd.f32 %v3005_v11, %v2862_v33  ;;  %v1997_v0 = vadd.f32 %v1902_v32, %v1752_v53  ;;  %v9133_v45 = vrot.slane %v6281_v39, 2  ;;  %v2457_v51 = vrot.slane %v2351_v30, 1 }
 0x1ab   : > { %9131 = vst [vmem:[#allocation106_spill] sm:$0xff] %v6300_v41  ;;  %v3249_v34 = vsel %vm2119_vm2, %v3247_v36, %v9132_v60  ;;  %v8697_v35 = vrot.slane %v6293_v58, 1  ;;  %v6311_v37 = vmul.f32 %v5362_v14, %v6061_v55  ;;  %v1443_v38 = vmin.f32 %v1441_v6, 6.0  ;;  %v6333_v60 = vpop.permute.xlu0 %1472  ;;  %v9141_v58 = vld [vmem:[#allocation51_spill] sm:$0xff] }
 0x1ac   : > { %v2147_v33 = vsel %vm2119_vm2, %v2145_v4, %v9133_v45  ;;  %v3350_v11 = vadd.f32 %v3249_v34, %v3106_v25  ;;  %v2278_v28 = vmul.f32 %v5440_v62, %v6066_v22  ;;  %v2907_v36 = vmul.f32 %v5455_v27, %v6147_v54 }
 0x1ad   : > { %9134 = vst [vmem:[#allocation107_spill] sm:$0xff] %v6311_v37  ;;  %v2242_v23 = vadd.f32 %v2147_v33, %v1997_v0  ;;  %v2701_v32 = vrot.slane %v2595_v17, 2  ;;  %v6320_v4 = vmul.f32 %v5455_v27, %v6144_v40  ;;  %v9136_v34 = vrot.slane %v6090_v52, 7 }
 0x1ae   : > { %v3382_v53 = vmax.f32 %v3350_v11, 0.0  ;;  %v9137_v30 = vrot.slane %v6167_v49, 7  ;;  %v851_v25 = vmul.f32 %v5234_v13, %v6063_v47  ;;  %v853_v6 = vmul.f32 %v5234_v13, %v6115_v16 }
 0x1af   : > { %9135 = vst [vmem:[#allocation108_spill] sm:$0xff] %v6320_v4  ;;  %v2310_v17 = vadd.f32 %v2278_v28, %v2242_v23  ;;  %v2459_v11 = vsel %vm1874_vm1, %v2457_v51, %v8697_v35  ;;  %v3151_v45 = vmul.f32 %v5668_v9, %v6147_v54  ;;  %v6344_v47 = vmul.f32 0.0, %v1443_v38 }
 0x1b0   : > { %v6327_v0 = vsel %vm1551_vm0, %v9137_v30, %v9136_v34  ;;  %v3414_v33 = vmin.f32 %v3382_v53, 6.0  ;;  %v6342_v34 = vmul.f32 %v5668_v9, %v6144_v40  ;;  %v1174_v30 = vpop.permute.xlu1 %1173  ;;  %v3013_v16 = vrot.slane %v2907_v36, 1  ;;  %v9142_v36 = vld [vmem:[#allocation55_spill] sm:$0xff] }
 0x1b1   : > { %v2554_v52 = vadd.f32 %v2459_v11, %v2310_v17  ;;  %v9139_v23 = vrot.slane %v6167_v49, 7  ;;  %v9140_v35 = vrot.slane %v6311_v37, 2  ;;  %v1412_v38 = vmul.f32 %v1409_v21, %v5234_v13 }
 0x1b2   : > { %9138 = vst [vmem:[#allocation109_spill] sm:$0xff] %v6342_v34  ;;  %3484 = vrot.lane.b32.xlu0 %v3414_v33, %s4660_s30  ;;  %v883_v17 = vadd.f32 %v851_v25, %v9141_v58  ;;  %v6360_v11 = vadd.f32 %v853_v6, %v9142_v36  ;;  %v1424_v51 = vmul.f32 %v6176_v61, %v5210_v24  ;;  %v3257_v49 = vrot.slane %v3151_v45, 2  ;;  %v1210_v25 = vpop.permute.xlu0 %1209 }
 0x1b3   : > { %v6350_v53 = vsel %vm1551_vm0, 0.0, %v9139_v23  ;;  %v2703_v9 = vsel %vm2119_vm2, %v2701_v32, %v9140_v35  ;;  %v2834_v23 = vmul.f32 %v5452_v8, %v6147_v54  ;;  %v8701_v33 = vrot.slane %v6342_v34, 2 }
 0x1b4   : > { %v2798_v28 = vadd.f32 %v2703_v9, %v2554_v52  ;;  %v1414_v37 = vadd.f32 %v1412_v38, %v6113_v63  ;;  %v1552_v35 = vrot.slane %v6344_v47, 7  ;;  %v9143_v58 = vrot.slane %v6320_v4, 1  ;;  %v1182_v9 = vpop.permute.xlu1 %1181 }
 0x1b5   : > { %v1436_v52 = vmul.f32 %v6226_v7, %v9005_v20  ;;  %v1073_v61 = vadd.f32 %v5636_v3, %v6069_v26  ;;  %v1237_v45 = vmul.f32 %v9005_v20, %v6261_v19  ;;  %v1075_v63 = vadd.f32 %v5647_v44, %v6088_v18 }
 0x1b6   : > { %v2866_v21 = vadd.f32 %v2834_v23, %v2798_v28  ;;  %v3015_v32 = vsel %vm1874_vm1, %v3013_v16, %v9143_v58  ;;  %v1426_v6 = vadd.f32 %v1424_v51, %v1414_v37  ;;  %v1239_v38 = vmul.f32 %v9005_v20, %v1166_v10 }
 0x1b7   : > { %v1077_v16 = vadd.f32 %v5651_v29, %v6133_v42  ;;  %v1241_v7 = vmul.f32 %v9005_v20, %v1174_v30  ;;  %v3259_v37 = vsel %vm2119_vm2, %v3257_v49, %v8701_v33  ;;  %v1269_v26 = vadd.f32 %v1237_v45, %v1073_v61  ;;  %v6395_v29 = vld [vmem:[%s8563_s4] ss:$0 sm:$0xff] }
 0x1b8   : > { %v3110_v28 = vadd.f32 %v3015_v32, %v2866_v21  ;;  %v1438_v3 = vadd.f32 %v1436_v52, %v1426_v6  ;;  %v1250_v19 = vmul.f32 %v9005_v20, %v1210_v25  ;;  %v1271_v36 = vadd.f32 %v1239_v38, %v1075_v63  ;;  %v9144_v32 = vld [vmem:[#allocation33_spill] sm:$0xff]  ;;  %v1190_v63 = vpop.permute.xlu1 %1189 }
 0x1b9   : > { %v1273_v44 = vadd.f32 %v1241_v7, %v1077_v16  ;;  %v1243_v18 = vmul.f32 %v9005_v20, %v1182_v9  ;;  %v1660_v10 = vsel %vm1551_vm0, 0.0, %v1552_v35  ;;  %v1308_v42 = vadd.f32 %v6395_v29, %v1269_v26 }
 0x1ba   : > { %v3354_v51 = vadd.f32 %v3259_v37, %v3110_v28  ;;  %v1440_v49 = vadd.f32 %v6395_v29, %v1438_v3  ;;  %v1079_v30 = vadd.f32 %v5662_v1, %v883_v17  ;;  %v1310_v21 = vadd.f32 %v6395_v29, %v1271_v36 }
 0x1bb   : > { %v1312_v58 = vadd.f32 %v6395_v29, %v1273_v44  ;;  %v1282_v52 = vadd.f32 %v1250_v19, %v9144_v32  ;;  %v855_v25 = vmul.f32 %v5234_v13, %v6165_v56  ;;  %v1340_v61 = vmax.f32 %v1308_v42, 0.0 }
 0x1bc   : > { %v3386_v23 = vmax.f32 %v3354_v51, 0.0  ;;  %v1442_v6 = vmax.f32 %v1440_v49, 0.0  ;;  %v1275_v45 = vadd.f32 %v1243_v18, %v1079_v30  ;;  %v857_v9 = vmul.f32 %v5234_v13, %v6220_v12  ;;  %v9148_v18 = vld [vmem:[#allocation56_spill] sm:$0xff]  ;;  %v9149_v49 = vld [vmem:[#allocation5_spill] sm:$0xff]  ;;  %v9150_v30 = vld [vmem:[#allocation7_spill] sm:$0xff] }
 0x1bd   : > { %v859_v1 = vmul.f32 %v5234_v13, %v6258_v48  ;;  %v1342_v17 = vmax.f32 %v1310_v21, 0.0  ;;  %v1710_v38 = vmul.f32 %v9021_v50, %v1660_v10  ;;  %v6411_v16 = vmul.f32 %v9022_v46, %v1660_v10  ;;  %v9151_v21 = vld [vmem:[#allocation28_spill] sm:$0xff] }
 0x1be   : > { %v3418_v28 = vmin.f32 %v3386_v23, 6.0  ;;  %v1444_v7 = vmin.f32 %v1442_v6, 6.0  ;;  %v6413_v37 = vmin.f32 %v1340_v61, 6.0  ;;  %v6416_v56 = vmul.f32 %v9024_v57, %v1660_v10 }
 0x1bf   : > { %v1344_v3 = vmax.f32 %v1312_v58, 0.0  ;;  %v1321_v12 = vadd.f32 %v6395_v29, %v1282_v52  ;;  %v1245_v26 = vmul.f32 %v9005_v20, %v1190_v63  ;;  %v9146_v48 = vrot.slane %v6300_v41, 7 }
 0x1c0   : > { %9145 = vst [vmem:[#allocation51_spill] sm:$0xff] %v6413_v37  ;;  %3492 = vrot.lane.b32.xlu0 %v3418_v28, %s4660_s30  ;;  %v1450_v51 = vmul.f32 0.0, %v1444_v7  ;;  %v6426_v36 = vmin.f32 %v1342_v17, 6.0  ;;  %v1314_v44 = vadd.f32 %v6395_v29, %v1275_v45  ;;  %v887_v10 = vadd.f32 %v855_v25, %v9148_v18 }
 0x1c1   : > { %v6424_v19 = vsel %vm1551_vm0, 0.0, %v9146_v48  ;;  %v6431_v42 = vadd.f32 %v857_v9, %v9149_v49  ;;  %v6434_v23 = vadd.f32 %v859_v1, %v9150_v30  ;;  %v1081_v58 = vadd.f32 %v9151_v21, %v6360_v11 }
 0x1c2   : > { %9147 = vst [vmem:[#allocation55_spill] sm:$0xff] %v6426_v36  ;;  %v6439_v32 = vadd.f32 %v5778_v43, %v1710_v38  ;;  %v1875_v52 = vrot.slane %v6411_v16, 1  ;;  %v1553_v6 = vrot.slane %v1450_v51, 7  ;;  %v1580_v61 = vrot.slane %v6413_v37, 7 }
 0x1c3   : > { %v6444_v25 = vmin.f32 %v1344_v3, 6.0  ;;  %v1353_v63 = vmax.f32 %v1321_v12, 0.0  ;;  %v1277_v9 = vadd.f32 %v1245_v26, %v1081_v58  ;;  %v1583_v1 = vrot.slane %v6426_v36, 7  ;;  %v9154_v26 = vld [vmem:[#allocation39_spill] sm:$0xff] }
 0x1c4   : > { %v1554_v28 = vsel %vm1551_vm0, %v1552_v35, %v1553_v6  ;;  %v1678_v11 = vsel %vm1551_vm0, %v1553_v6, 0.0  ;;  %v1346_v17 = vmax.f32 %v1314_v44, 0.0  ;;  %v6459_v47 = vsel %vm1551_vm0, %v1580_v61, 0.0 }
 0x1c5   : > { %9152 = vst [vmem:[#allocation33_spill] sm:$0xff] %v6444_v25  ;;  %v1711_v38 = vmul.f32 %v9021_v50, %v1554_v28  ;;  %v1779_v16 = vmul.f32 %v9022_v46, %v1554_v28  ;;  %v1780_v7 = vmul.f32 %v9022_v46, %v1678_v11  ;;  %v6455_v3 = vmul.f32 %v9024_v57, %v1554_v28  ;;  %v1198_v28 = vpop.permute.xlu1 %1197 }
 0x1c6   : > { %v2025_v12 = vmul.f32 %v9024_v57, %v1678_v11  ;;  %9153 = vst [vmem:[#allocation56_spill] sm:$0xff] %v6459_v47  ;;  %v6463_v35 = vmul.f32 %v6333_v60, %v5234_v13  ;;  %v1083_v48 = vadd.f32 %v9154_v26, %v887_v10  ;;  %v6469_v21 = vsel %vm1551_vm0, %v1583_v1, 0.0 }
 0x1c7   : > { %v1743_v51 = vadd.f32 %v5778_v43, %v1711_v38  ;;  %v1876_v44 = vrot.slane %v1779_v16, 1  ;;  %v1878_v18 = vrot.slane %v1780_v7, 1  ;;  %v8702_v49 = vrot.slane %v6455_v3, 2  ;;  %9155 = vst [vmem:[#allocation5_spill] sm:$0xff] %v6469_v21 }
 0x1c8   : > { %v2123_v30 = vrot.slane %v2025_v12, 2  ;;  %v1586_v58 = vrot.slane %v6444_v25, 7  ;;  %v6472_v6 = vmin.f32 %v1353_v63, 6.0  ;;  %v6477_v10 = vmul.f32 %v9022_v46, %v6459_v47 }
 0x1c9   : > { %v1879_v60 = vsel %vm1874_vm1, %v1876_v44, %v1878_v18  ;;  %v6479_v11 = vmin.f32 %v1346_v17, 6.0  ;;  %v1316_v38 = vadd.f32 %v6395_v29, %v1277_v9  ;;  %v6487_v63 = vmul.f32 %v9024_v57, %v6459_v47  ;;  %v1206_v36 = vpop.permute.xlu1 %1205 }
 0x1ca   : > { %9156 = vst [vmem:[#allocation7_spill] sm:$0xff] %v6472_v6  ;;  %9157 = vst [vmem:[#allocation28_spill] sm:$0xff] %v6477_v10  ;;  %v1988_v16 = vadd.f32 %v1879_v60, %v1743_v51  ;;  %v2124_v7 = vsel %vm2119_vm2, %v8702_v49, %v2123_v30  ;;  %v6491_v12 = vmul.f32 %v5345_v59, %v6459_v47  ;;  %v9161_v26 = vrot.slane %v6300_v41, 7  ;;  %v9166_v60 = vld [vmem:[#allocation18_spill] sm:$0xff] }
 0x1cb   : > { %9158 = vst [vmem:[#allocation39_spill] sm:$0xff] %v6479_v11  ;;  %9159 = vst [vmem:[#allocation110_spill] sm:$0xff] %v6487_v63  ;;  %v6500_v9 = vmul.f32 %v5362_v14, %v6459_v47  ;;  %v6504_v51 = vmul.f32 %v9022_v46, %v6469_v21  ;;  %v1247_v18 = vmul.f32 %v9005_v20, %v1198_v28  ;;  %v9167_v33 = vrot.slane %v9166_v60, 7  ;;  %v9180_v47 = vld [vmem:[#allocation21_spill] sm:$0xff] }
 0x1cc   : > { %9160 = vst [vmem:[#allocation111_spill] sm:$0xff] %v6491_v12  ;;  %v6496_v17 = vsel %vm1551_vm0, %v9161_v26, %v1580_v61  ;;  %v6507_v30 = vadd.f32 %v2124_v7, %v1988_v16  ;;  %v6515_v61 = vsel %vm1551_vm0, %v1586_v58, 0.0  ;;  %v6521_v37 = vmul.f32 %v9024_v57, %v6469_v21 }
 0x1cd   : > { %9162 = vst [vmem:[#allocation112_spill] sm:$0xff] %v6496_v17  ;;  %9163 = vst [vmem:[#allocation113_spill] sm:$0xff] %v6500_v9  ;;  %v6512_v45 = vsel %vm1551_vm0, %v9167_v33, %v1583_v1  ;;  %v6525_v28 = vmul.f32 %v5345_v59, %v6469_v21  ;;  %v1348_v16 = vmax.f32 %v1316_v38, 0.0  ;;  %v6531_v1 = vmul.f32 %v5362_v14, %v6469_v21 }
 0x1ce   : > { %9164 = vst [vmem:[#allocation114_spill] sm:$0xff] %v6504_v51  ;;  %9165 = vst [vmem:[#allocation115_spill] sm:$0xff] %v6507_v30  ;;  %v1589_v26 = vrot.slane %v6479_v11, 7  ;;  %v6535_v49 = vsel %vm1874_vm1, %v1875_v52, %v1876_v44  ;;  %v6541_v38 = vmul.f32 %v9022_v46, %v6515_v61  ;;  %v6545_v7 = vmul.f32 %v9024_v57, %v6515_v61 }
 0x1cf   : > { %9168 = vst [vmem:[#allocation116_spill] sm:$0xff] %v6512_v45  ;;  %9169 = vst [vmem:[#allocation117_spill] sm:$0xff] %v6515_v61  ;;  %v6549_v33 = vmul.f32 %v5345_v59, %v6515_v61  ;;  %v9176_v11 = vrot.slane %v6472_v6, 7  ;;  %v1279_v44 = vadd.f32 %v1247_v18, %v1083_v48  ;;  %v6560_v41 = vmul.f32 %v5362_v14, %v6515_v61 }
 0x1d0   : > { %9170 = vst [vmem:[#allocation118_spill] sm:$0xff] %v6521_v37  ;;  %9171 = vst [vmem:[#allocation119_spill] sm:$0xff] %v6525_v28  ;;  %v6562_v63 = vmin.f32 %v1348_v16, 6.0  ;;  %v9181_v34 = vrot.slane %v9180_v47, 7  ;;  %v6571_v48 = vsel %vm1551_vm0, %v1589_v26, 0.0  ;;  %v1249_v10 = vmul.f32 %v9005_v20, %v1206_v36 }
 0x1d1   : > { %9172 = vst [vmem:[#allocation120_spill] sm:$0xff] %v6531_v1  ;;  %9173 = vst [vmem:[#allocation121_spill] sm:$0xff] %v6541_v38  ;;  %v6554_v52 = vsel %vm1551_vm0, 0.0, %v9176_v11  ;;  %v1318_v11 = vadd.f32 %v6395_v29, %v1279_v44  ;;  %v9187_v44 = vld [vmem:[#allocation40_spill] sm:$0xff]  ;;  %v9188_v38 = vld [vmem:[#allocation26_spill] sm:$0xff]  ;;  %v6600_v36 = vmul.f32 %v9022_v46, %v6571_v48  ;;  %v1724_v61 = vmul.f32 %v9021_v50, %v6147_v54 }
 0x1d2   : > { %9174 = vst [vmem:[#allocation122_spill] sm:$0xff] %v6545_v7  ;;  %9175 = vst [vmem:[#allocation123_spill] sm:$0xff] %v6549_v33  ;;  %v6568_v4 = vsel %vm1551_vm0, %v9181_v34, %v1586_v58  ;;  %v6577_v60 = vmul.f32 %v5345_v59, %v6554_v52  ;;  %v6581_v16 = vmul.f32 %v5362_v14, %v6554_v52  ;;  %v9189_v1 = vrot.slane %v9188_v38, 7 }
 0x1d3   : > { %9177 = vst [vmem:[#allocation124_spill] sm:$0xff] %v6554_v52  ;;  %9178 = vst [vmem:[#allocation125_spill] sm:$0xff] %v6560_v41  ;;  %v6588_v25 = vmul.f32 %v5440_v62, %v6554_v52  ;;  %v1085_v18 = vadd.f32 %v9187_v44, %v6431_v42  ;;  %v1592_v34 = vrot.slane %v6562_v63, 7  ;;  %v1350_v58 = vmax.f32 %v1318_v11, 0.0 }
 0x1d4   : > { %9179 = vst [vmem:[#allocation126_spill] sm:$0xff] %v6562_v63  ;;  %9182 = vst [vmem:[#allocation127_spill] sm:$0xff] %v6568_v4  ;;  %v6596_v28 = vsel %vm1551_vm0, %v9189_v1, %v1589_v26  ;;  %v1799_v42 = vmul.f32 %v9022_v46, %v6147_v54  ;;  %v6611_v26 = vmul.f32 %v9024_v57, %v6571_v48 }
 0x1d5   : > { %9183 = vst [vmem:[#allocation128_spill] sm:$0xff] %v6571_v48  ;;  %9184 = vst [vmem:[#allocation129_spill] sm:$0xff] %v6577_v60  ;;  %v1281_v7 = vadd.f32 %v1249_v10, %v1085_v18  ;;  %v6615_v1 = vmul.f32 %v5345_v59, %v6571_v48  ;;  %v6619_v10 = vmul.f32 %v5362_v14, %v6571_v48  ;;  %v6621_v11 = vmin.f32 %v1350_v58, 6.0 }
 0x1d6   : > { %9185 = vst [vmem:[#allocation130_spill] sm:$0xff] %v6581_v16  ;;  %9186 = vst [vmem:[#allocation131_spill] sm:$0xff] %v6588_v25  ;;  %v6625_v18 = vmul.f32 %v9022_v46, %v6144_v40  ;;  %v1910_v44 = vrot.slane %v1799_v42, 1  ;;  %v6628_v47 = vsel %vm1551_vm0, %v1592_v34, 0.0  ;;  %v2044_v38 = vmul.f32 %v9024_v57, %v6147_v54  ;;  %v9209_v16 = vld [vmem:[#allocation32_spill] sm:$0xff] }
 0x1d7   : > { %9190 = vst [vmem:[#allocation40_spill] sm:$0xff] %v6596_v28  ;;  %9191 = vst [vmem:[#allocation132_spill] sm:$0xff] %v6600_v36  ;;  %v1320_v63 = vadd.f32 %v6395_v29, %v1281_v7  ;;  %v6635_v41 = vmul.f32 %v9024_v57, %v6144_v40  ;;  %v1756_v33 = vadd.f32 %v5778_v43, %v1724_v61  ;;  %v1595_v37 = vrot.slane %v6621_v11, 7  ;;  %v9204_v36 = vld [vmem:[#allocation19_spill] sm:$0xff] }
 0x1d8   : > { %9192 = vst [vmem:[#allocation133_spill] sm:$0xff] %v6611_v26  ;;  %9193 = vst [vmem:[#allocation134_spill] sm:$0xff] %v6615_v1  ;;  %v8736_v48 = vrot.slane %v6625_v18, 1  ;;  %v2357_v42 = vmul.f32 %v5345_v59, %v6350_v53  ;;  %v2155_v51 = vrot.slane %v2044_v38, 2  ;;  %v6646_v39 = vmul.f32 %v5345_v59, %v6327_v0  ;;  %v1214_v26 = vpop.permute.xlu1 %1213 }
 0x1d9   : > { %9194 = vst [vmem:[#allocation135_spill] sm:$0xff] %v6619_v10  ;;  %9195 = vst [vmem:[#allocation136_spill] sm:$0xff] %v6621_v11  ;;  %v6651_v58 = vmul.f32 %v9022_v46, %v6628_v47  ;;  %v6655_v43 = vmul.f32 %v9024_v57, %v6628_v47  ;;  %v6663_v7 = vmul.f32 %v5345_v59, %v6628_v47  ;;  %v1352_v11 = vmax.f32 %v1320_v63, 0.0 }
 0x1da   : > { %9196 = vst [vmem:[#allocation137_spill] sm:$0xff] %v6625_v18  ;;  %9197 = vst [vmem:[#allocation138_spill] sm:$0xff] %v6628_v47  ;;  %v1912_v61 = vsel %vm1874_vm1, %v1910_v44, %v8736_v48  ;;  %v6667_v9 = vmul.f32 %v5362_v14, %v6628_v47  ;;  %v9205_v12 = vrot.slane %v9204_v36, 7  ;;  %v2601_v44 = vmul.f32 %v5362_v14, %v6350_v53 }
 0x1db   : > { %9198 = vst [vmem:[#allocation139_spill] sm:$0xff] %v6635_v41  ;;  %9199 = vst [vmem:[#allocation140_spill] sm:$0xff] %v6646_v39  ;;  %v2001_v18 = vadd.f32 %v1912_v61, %v1756_v33  ;;  %v6678_v38 = vsel %vm1551_vm0, %v1595_v37, 0.0  ;;  %v9208_v48 = vrot.slane %v6635_v41, 2  ;;  %v2467_v47 = vrot.slane %v2357_v42, 1 }
 0x1dc   : > { %9200 = vst [vmem:[#allocation141_spill] sm:$0xff] %v6651_v58  ;;  %9201 = vst [vmem:[#allocation142_spill] sm:$0xff] %v6655_v43  ;;  %v6673_v21 = vsel %vm1551_vm0, %v9205_v12, %v1592_v34  ;;  %v8743_v63 = vrot.slane %v6646_v39, 1  ;;  %v2282_v33 = vmul.f32 %v5440_v62, %v6350_v53  ;;  %v9210_v41 = vrot.slane %v9209_v16, 7  ;;  %v6730_v61 = vld [vmem:[%s8564_s5 + $0x8] ss:$0 sm:$0xff] }
 0x1dd   : > { %9202 = vst [vmem:[#allocation143_spill] sm:$0xff] %v6663_v7  ;;  %9203 = vst [vmem:[#allocation144_spill] sm:$0xff] %v6667_v9  ;;  %v2157_v1 = vsel %vm2119_vm2, %v2155_v51, %v9208_v48  ;;  %v6695_v48 = vmin.f32 %v1352_v11, 6.0  ;;  %v6699_v42 = vmul.f32 %v9022_v46, %v6678_v38  ;;  %v6707_v36 = vmul.f32 %v9024_v57, %v6678_v38 }
 0x1de   : > { %9206 = vst [vmem:[#allocation145_spill] sm:$0xff] %v6673_v21  ;;  %9207 = vst [vmem:[#allocation146_spill] sm:$0xff] %v6678_v38  ;;  %v2246_v34 = vadd.f32 %v2157_v1, %v2001_v18  ;;  %v6693_v51 = vsel %vm1551_vm0, %v9210_v41, %v1595_v37  ;;  %v6703_v1 = vmul.f32 %v5362_v14, %v6327_v0  ;;  %v2711_v18 = vrot.slane %v2601_v44, 2 }
 0x1df   : > { %9211 = vst [vmem:[#allocation147_spill] sm:$0xff] %v6693_v51  ;;  %9212 = vst [vmem:[#allocation148_spill] sm:$0xff] %v6695_v48  ;;  %v6711_v41 = vmul.f32 %v5345_v59, %v6678_v38  ;;  %v6715_v37 = vmul.f32 %v5362_v14, %v6678_v38  ;;  %v2469_v11 = vsel %vm1874_vm1, %v2467_v47, %v8743_v63  ;;  %v1598_v43 = vrot.slane %v6695_v48, 7 }
 0x1e0   : > { %9213 = vst [vmem:[#allocation149_spill] sm:$0xff] %v6699_v42  ;;  %v2314_v12 = vadd.f32 %v2282_v33, %v2246_v34  ;;  %9214 = vst [vmem:[#allocation150_spill] sm:$0xff] %v6703_v1  ;;  %v2913_v44 = vmul.f32 %v5455_v27, %v6424_v19  ;;  %v6725_v10 = vmul.f32 %v5455_v27, %v6496_v17  ;;  %v1461_v33 = vpop.permute.xlu1 %1460  ;;  %v9221_v58 = vrot.slane %v6703_v1, 2 }
 0x1e1   : > { %9215 = vst [vmem:[#allocation151_spill] sm:$0xff] %v6707_v36  ;;  %9216 = vst [vmem:[#allocation152_spill] sm:$0xff] %v6711_v41  ;;  %v3157_v16 = vmul.f32 %v6730_v61, %v6424_v19  ;;  %v6736_v47 = vmul.f32 %v6730_v61, %v6496_v17  ;;  %v1251_v63 = vmul.f32 %v9005_v20, %v1214_v26 }
 0x1e2   : > { %9217 = vst [vmem:[#allocation153_spill] sm:$0xff] %v6715_v37  ;;  %v2558_v34 = vadd.f32 %v2469_v11, %v2314_v12  ;;  %9218 = vst [vmem:[#allocation154_spill] sm:$0xff] %v6725_v10  ;;  %v9220_v12 = vld [vmem:[#allocation9_spill] sm:$0xff]  ;;  %v2713_v9 = vsel %vm2119_vm2, %v2711_v18, %v9221_v58  ;;  %v3023_v7 = vrot.slane %v2913_v44, 1  ;;  %v8753_v38 = vrot.slane %v6725_v10, 1 }
 0x1e3   : > { %9219 = vst [vmem:[#allocation155_spill] sm:$0xff] %v6736_v47  ;;  %v1087_v11 = vadd.f32 %v9220_v12, %v6434_v23  ;;  %v2838_v25 = vmul.f32 %v5452_v8, %v6424_v19  ;;  %v8752_v60 = vrot.slane %v6736_v47, 2  ;;  %v3267_v12 = vrot.slane %v3157_v16, 2  ;;  %v6774_v18 = vld [vmem:[%s8565_s6] ss:$0 sm:$0xff] }
 0x1e4   : > { %v2802_v39 = vadd.f32 %v2713_v9, %v2558_v34  ;;  %v3025_v26 = vsel %vm1874_vm1, %v3023_v7, %v8753_v38  ;;  %v1728_v58 = vmul.f32 %v9021_v50, %v6424_v19  ;;  %v1805_v34 = vmul.f32 %v9022_v46, %v6424_v19 }
 0x1e5   : > { %v1283_v30 = vadd.f32 %v1251_v63, %v1087_v11  ;;  %v6760_v63 = vsel %vm1551_vm0, %v1598_v43, 0.0  ;;  %v3269_v11 = vsel %vm2119_vm2, %v3267_v12, %v8752_v60  ;;  %v6767_v16 = vmul.f32 %v9022_v46, %v6496_v17 }
 0x1e6   : > { %v2870_v44 = vadd.f32 %v2838_v25, %v2802_v39  ;;  %9222 = vst [vmem:[#allocation9_spill] sm:$0xff] %v6760_v63  ;;  %v2050_v7 = vmul.f32 %v9024_v57, %v6424_v19  ;;  %v1760_v23 = vadd.f32 %v6774_v18, %v1728_v58  ;;  %v6779_v12 = vmul.f32 %v9024_v57, %v6496_v17 }
 0x1e7   : > { %v1322_v9 = vadd.f32 %v6395_v29, %v1283_v30  ;;  %9223 = vst [vmem:[#allocation156_spill] sm:$0xff] %v6767_v16  ;;  %v1469_v30 = vpop.permute.xlu1 %1468  ;;  %v1920_v60 = vrot.slane %v1805_v34, 1  ;;  %v8762_v38 = vrot.slane %v6767_v16, 1  ;;  %v6784_v48 = vmul.f32 %v5345_v59, %v6512_v45 }
 0x1e8   : > { %v3114_v39 = vadd.f32 %v3025_v26, %v2870_v44  ;;  %9224 = vst [vmem:[#allocation157_spill] sm:$0xff] %v6779_v12  ;;  %v6788_v26 = vmul.f32 %v5362_v14, %v6512_v45  ;;  %v6795_v36 = vmul.f32 %v5455_v27, %v6568_v4  ;;  %v1475_v34 = vmul.f32 %v1469_v30, %v5234_v13  ;;  %v9239_v30 = vld [vmem:[#allocation27_spill] sm:$0xff] }
 0x1e9   : > { %v1354_v25 = vmax.f32 %v1322_v9, 0.0  ;;  %9225 = vst [vmem:[#allocation158_spill] sm:$0xff] %v6784_v48  ;;  %v1922_v42 = vsel %vm1874_vm1, %v1920_v60, %v8762_v38  ;;  %v2165_v47 = vrot.slane %v2050_v7, 2  ;;  %v6803_v10 = vmul.f32 %v6730_v61, %v6568_v4 }
 0x1ea   : > { %9226 = vst [vmem:[#allocation159_spill] sm:$0xff] %v6788_v26  ;;  %v3358_v44 = vadd.f32 %v3269_v11, %v3114_v39  ;;  %9228 = vst [vmem:[#allocation161_spill] sm:$0xff] %v6795_v36  ;;  %v2005_v39 = vadd.f32 %v1922_v42, %v1760_v23  ;;  %v9230_v52 = vrot.slane %v6779_v12, 2  ;;  %v9231_v23 = vld [vmem:[#allocation35_spill] sm:$0xff]  ;;  %v6822_v1 = vmul.f32 %v9022_v46, %v6760_v63 }
 0x1eb   : > { %v6790_v9 = vmin.f32 %v1354_v25, 6.0  ;;  %9229 = vst [vmem:[#allocation162_spill] sm:$0xff] %v6803_v10  ;;  %v9232_v25 = vrot.slane %v9231_v23, 7  ;;  %v1481_v38 = vpop.permute.xlu1 %1480  ;;  %v9238_v60 = vrot.slane %v6784_v48, 1  ;;  %v9240_v23 = vrot.slane %v9239_v30, 1 }
 0x1ec   : > { %v3390_v11 = vmax.f32 %v3358_v44, 0.0  ;;  %v2167_v13 = vsel %vm2119_vm2, %v2165_v47, %v9230_v52  ;;  %9233 = vst [vmem:[#allocation163_spill] sm:$0xff] %v6822_v1  ;;  %v6826_v52 = vmul.f32 %v9024_v57, %v6760_v63  ;;  %v6830_v47 = vmul.f32 %v5345_v59, %v6760_v63 }
 0x1ed   : > { %9227 = vst [vmem:[#allocation160_spill] sm:$0xff] %v6790_v9  ;;  %v2250_v42 = vadd.f32 %v2167_v13, %v2005_v39  ;;  %v6818_v58 = vsel %vm1551_vm0, %v9232_v25, %v1598_v43  ;;  %v6834_v39 = vmul.f32 %v1461_v33, %v5208_v2  ;;  %v9236_v43 = vld [vmem:[#allocation31_spill] sm:$0xff]  ;;  %v9237_v13 = vld [vmem:[#allocation22_spill] sm:$0xff]  ;;  %v2479_v37 = vsel %vm1874_vm1, %v9240_v23, %v9238_v60  ;;  %v9244_v33 = vld [vmem:[#allocation20_spill] sm:$0xff] }
 0x1ee   : > { %v3422_v44 = vmin.f32 %v3390_v11, 6.0  ;;  %9234 = vst [vmem:[#allocation164_spill] sm:$0xff] %v6826_v52  ;;  %9235 = vst [vmem:[#allocation165_spill] sm:$0xff] %v6830_v47  ;;  %v1493_v11 = vpop.permute.xlu0 %1492  ;;  %v1477_v25 = vadd.f32 %v1475_v34, %v9236_v43  ;;  %v9241_v41 = vrot.slane %v6790_v9, 7  ;;  %v9242_v12 = vrot.slane %v6472_v6, 7  ;;  %v9247_v43 = vld [vmem:[#allocation24_spill] sm:$0xff] }
 0x1ef   : > { %v2318_v7 = vadd.f32 %v9237_v13, %v2250_v42  ;;  %v9243_v2 = vrot.slane %v6788_v26, 2  ;;  %v9246_v42 = vrot.slane %v6795_v36, 1  ;;  %v9248_v13 = vrot.slane %v9247_v43, 1  ;;  %v9250_v23 = vld [vmem:[#allocation30_spill] sm:$0xff]  ;;  %v9254_v43 = vld [vmem:[#allocation60_spill] sm:$0xff] }
 0x1f0   : > { %3500 = vrot.lane.b32.xlu0 %v3422_v44, %s4660_s30  ;;  %v6848_v16 = vsel %vm1551_vm0, %v9242_v12, %v9241_v41  ;;  %v9245_v44 = vrot.slane %v9244_v33, 2  ;;  %v9249_v60 = vrot.slane %v6803_v10, 2  ;;  %v9251_v48 = vrot.slane %v9250_v23, 2 }
 0x1f1   : > { %v3035_v30 = vsel %vm1874_vm1, %v9248_v13, %v9246_v42  ;;  %v2562_v41 = vadd.f32 %v2479_v37, %v2318_v7  ;;  %v1487_v12 = vmul.f32 %v1481_v38, %v5210_v24  ;;  %v1499_v26 = vmul.f32 %v1493_v11, %v9005_v20 }
 0x1f2   : > { %v2723_v34 = vsel %vm2119_vm2, %v9245_v44, %v9243_v2  ;;  %v3279_v6 = vsel %vm2119_vm2, %v9251_v48, %v9249_v60  ;;  %v1987_v2 = vadd.f32 %v6535_v49, %v6439_v32  ;;  %v9252_v33 = vrot.slane %v6455_v3, 2  ;;  %v9255_v3 = vld [vmem:[#allocation52_spill] sm:$0xff]  ;;  %v9256_v60 = vld [vmem:[#allocation73_spill] sm:$0xff] }
 0x1f3   : > { %v9253_v44 = vrot.slane %v6416_v56, 2  ;;  %v2268_v13 = vmul.f32 %v5440_v62, %v9254_v43  ;;  %v2336_v48 = vmul.f32 %v5345_v59, %v9254_v43  ;;  %v2806_v38 = vadd.f32 %v2723_v34, %v2562_v41 }
 0x1f4   : > { %v1489_v7 = vadd.f32 %v1487_v12, %v1477_v25  ;;  %v2580_v32 = vmul.f32 %v5362_v14, %v9254_v43  ;;  %v6883_v56 = vmul.f32 %v5362_v14, %v9255_v3  ;;  %v2824_v23 = vmul.f32 %v5452_v8, %v9256_v60 }
 0x1f5   : > { %v2122_v42 = vsel %vm2119_vm2, %v9253_v44, %v9252_v33  ;;  %v2432_v49 = vrot.slane %v2336_v48, 1  ;;  %v2892_v33 = vmul.f32 %v5455_v27, %v9256_v60  ;;  %v9257_v44 = vld [vmem:[#allocation25_spill] sm:$0xff]  ;;  %v9258_v41 = vrot.slane %v5898_v31, 1 }
 0x1f6   : > { %v2232_v11 = vadd.f32 %v2122_v42, %v1987_v2  ;;  %v2874_v10 = vadd.f32 %v9257_v44, %v2806_v38  ;;  %v1501_v37 = vadd.f32 %v1499_v26, %v1489_v7  ;;  %v2676_v25 = vrot.slane %v2580_v32, 2  ;;  %v9259_v42 = vld [vmem:[#allocation58_spill] sm:$0xff] }
 0x1f7   : > { %v2434_v12 = vsel %vm1874_vm1, %v2432_v49, %v9258_v41  ;;  %v8777_v2 = vrot.slane %v6883_v56, 2  ;;  %v6896_v43 = vmul.f32 %v5455_v27, %v9259_v42  ;;  %v2988_v48 = vrot.slane %v2892_v33, 1 }
 0x1f8   : > { %v2300_v34 = vadd.f32 %v2268_v13, %v2232_v11  ;;  %v3118_v36 = vadd.f32 %v3035_v30, %v2874_v10  ;;  %v1503_v3 = vadd.f32 %v6395_v29, %v1501_v37  ;;  %v3136_v26 = vmul.f32 %v6730_v61, %v9256_v60 }
 0x1f9   : > { %9260 = vst [vmem:[#allocation31_spill] sm:$0xff] %v6896_v43  ;;  %v2678_v13 = vsel %vm2119_vm2, %v2676_v25, %v8777_v2  ;;  %v8774_v38 = vrot.slane %v6896_v43, 1  ;;  %v6907_v7 = vmul.f32 %v6730_v61, %v9259_v42  ;;  %v6911_v11 = vmul.f32 %v9022_v46, %v6568_v4 }
 0x1fa   : > { %v2544_v45 = vadd.f32 %v2434_v12, %v2300_v34  ;;  %v3362_v10 = vadd.f32 %v3279_v6, %v3118_v36  ;;  %v1505_v30 = vmax.f32 %v1503_v3, 0.0  ;;  %v3232_v32 = vrot.slane %v3136_v26, 2  ;;  %v9265_v36 = vld [vmem:[#allocation36_spill] sm:$0xff] }
 0x1fb   : > { %9261 = vst [vmem:[#allocation22_spill] sm:$0xff] %v6907_v7  ;;  %9262 = vst [vmem:[#allocation27_spill] sm:$0xff] %v6911_v11  ;;  %v2990_v49 = vsel %vm1874_vm1, %v2988_v48, %v8774_v38  ;;  %v8775_v33 = vrot.slane %v6907_v7, 2  ;;  %v8776_v44 = vrot.slane %v6911_v11, 1  ;;  %v6920_v34 = vmul.f32 %v9024_v57, %v6568_v4  ;;  %v9289_v11 = vld [vmem:[#allocation75_spill] sm:$0xff] }
 0x1fc   : > { %v2788_v37 = vadd.f32 %v2678_v13, %v2544_v45  ;;  %v3394_v25 = vmax.f32 %v3362_v10, 0.0  ;;  %v1507_v41 = vmin.f32 %v1505_v30, 6.0  ;;  %v6924_v6 = vmul.f32 %v5345_v59, %v6596_v28 }
 0x1fd   : > { %9263 = vst [vmem:[#allocation20_spill] sm:$0xff] %v6920_v34  ;;  %v3234_v45 = vsel %vm2119_vm2, %v3232_v32, %v8775_v33  ;;  %v9266_v3 = vrot.slane %v9265_v36, 1  ;;  %v8778_v26 = vrot.slane %v6920_v34, 2  ;;  %v6937_v13 = vmul.f32 %v5362_v14, %v6596_v28  ;;  %v9269_v32 = vld [vmem:[#allocation38_spill] sm:$0xff] }
 0x1fe   : > { %v2856_v12 = vadd.f32 %v2824_v23, %v2788_v37  ;;  %9264 = vst [vmem:[#allocation24_spill] sm:$0xff] %v6924_v6  ;;  %v3426_v23 = vmin.f32 %v3394_v25, 6.0  ;;  %v6939_v10 = vmul.f32 0.0, %v1507_v41  ;;  %v9268_v37 = vld [vmem:[#allocation42_spill] sm:$0xff]  ;;  %v9270_v33 = vrot.slane %v9269_v32, 2 }
 0x1ff   : > { %v1932_v48 = vsel %vm1874_vm1, %v9266_v3, %v8776_v44  ;;  %9267 = vst [vmem:[#allocation30_spill] sm:$0xff] %v6937_v13  ;;  %v8785_v3 = vrot.slane %v6924_v6, 1  ;;  %v6951_v2 = vmul.f32 %v5455_v27, %v6673_v21  ;;  %v9275_v32 = vld [vmem:[#allocation6_spill] sm:$0xff]  ;;  %v2898_v43 = vmul.f32 %v5455_v27, %v6024_v5 }
 0x200   : > { %v3100_v30 = vadd.f32 %v2990_v49, %v2856_v12  ;;  %v2009_v38 = vadd.f32 %v1932_v48, %v9268_v37  ;;  %v2177_v36 = vsel %vm2119_vm2, %v9270_v33, %v8778_v26  ;;  %3508 = vrot.lane.b32.xlu0 %v3426_v23, %s4660_s30  ;;  %v8780_v49 = vrot.slane %v6939_v10, 7  ;;  %v1485_v26 = vpop.permute.xlu1 %1484 }
 0x201   : > { %9271 = vst [vmem:[#allocation60_spill] sm:$0xff] %v6951_v2  ;;  %v6957_v12 = vmul.f32 %v6730_v61, %v6673_v21  ;;  %v6963_v37 = vmul.f32 %v5362_v14, %v6760_v63  ;;  %v6975_v48 = vmul.f32 %v5345_v59, %v6848_v16  ;;  %v1478_v33 = vadd.f32 %v6463_v35, %v6834_v39 }
 0x202   : > { %v3344_v25 = vadd.f32 %v3234_v45, %v3100_v30  ;;  %v2254_v41 = vadd.f32 %v2177_v36, %v2009_v38  ;;  %v6970_v38 = vsel %vm1551_vm0, 0.0, %v8780_v49  ;;  %v9274_v30 = vld [vmem:[#allocation53_spill] sm:$0xff]  ;;  %v9276_v44 = vrot.slane %v9275_v32, 1  ;;  %v9281_v32 = vld [vmem:[#allocation10_spill] sm:$0xff] }
 0x203   : > { %9272 = vst [vmem:[#allocation73_spill] sm:$0xff] %v6957_v12  ;;  %9273 = vst [vmem:[#allocation25_spill] sm:$0xff] %v6963_v37  ;;  %v8792_v52 = vrot.slane %v6957_v12, 2  ;;  %v1488_v34 = vmul.f32 %v1485_v26, %v5210_v24  ;;  %v6993_v35 = vmul.f32 %v5455_v27, %v6970_v38  ;;  %v9280_v39 = vrot.slane %v6951_v2, 1 }
 0x204   : > { %v3376_v45 = vmax.f32 %v3344_v25, 0.0  ;;  %v2322_v36 = vadd.f32 %v9274_v30, %v2254_v41  ;;  %v2489_v23 = vsel %vm1874_vm1, %v9276_v44, %v8785_v3  ;;  %v9277_v25 = vrot.slane %v6937_v13, 2  ;;  %v9278_v41 = vld [vmem:[#allocation54_spill] sm:$0xff] }
 0x205   : > { %v9279_v30 = vrot.slane %v9278_v41, 2  ;;  %v9282_v44 = vrot.slane %v9281_v32, 1  ;;  %v7007_v24 = vmul.f32 %v9022_v46, %v9259_v42  ;;  %v2029_v26 = vmul.f32 %v9024_v57, %v9256_v60  ;;  %v9285_v41 = vld [vmem:[#allocation61_spill] sm:$0xff] }
 0x206   : > { %v3408_v49 = vmin.f32 %v3376_v45, 6.0  ;;  %v2566_v1 = vadd.f32 %v2489_v23, %v2322_v36  ;;  %v1714_v23 = vmul.f32 %v9021_v50, %v9256_v60  ;;  %v1784_v45 = vmul.f32 %v9022_v46, %v9256_v60 }
 0x207   : > { %v2733_v63 = vsel %vm2119_vm2, %v9279_v30, %v9277_v25  ;;  %v3045_v3 = vsel %vm1874_vm1, %v9282_v44, %v9280_v39  ;;  %9283 = vst [vmem:[#allocation58_spill] sm:$0xff] %v7007_v24  ;;  %v7013_v25 = vmul.f32 %v9024_v57, %v9259_v42  ;;  %v9286_v30 = vrot.slane %v9285_v41, 2  ;;  %v9288_v44 = vld [vmem:[#allocation43_spill] sm:$0xff] }
 0x208   : > { %3472 = vrot.lane.b32.xlu1 %v3408_v49, %s4660_s30  ;;  %v2810_v36 = vadd.f32 %v2733_v63, %v2566_v1  ;;  %v1746_v49 = vadd.f32 %v6774_v18, %v1714_v23  ;;  %v1885_v1 = vrot.slane %v1784_v45, 1  ;;  %v9287_v63 = vld [vmem:[#allocation76_spill] sm:$0xff]  ;;  %v8795_v60 = vrot.slane %v7007_v24, 1 }
 0x209   : > { %9284 = vst [vmem:[#allocation36_spill] sm:$0xff] %v7013_v25  ;;  %v3289_v39 = vsel %vm2119_vm2, %v9286_v30, %v8792_v52  ;;  %v2342_v32 = vmul.f32 %v5345_v59, %v9287_v63  ;;  %v2130_v13 = vrot.slane %v2029_v26, 2  ;;  %v8796_v6 = vrot.slane %v7013_v25, 2 }
 0x20a   : > { %v2878_v2 = vadd.f32 %v9288_v44, %v2810_v36  ;;  %v1490_v47 = vadd.f32 %v1488_v34, %v1478_v33  ;;  %v7028_v12 = vmul.f32 %v5345_v59, %v9289_v11  ;;  %v2586_v41 = vmul.f32 %v5362_v14, %v9287_v63 }
 0x20b   : > { %v7034_v23 = vmul.f32 %v5362_v14, %v9289_v11  ;;  %v1887_v36 = vsel %vm1874_vm1, %v1885_v1, %v8795_v60  ;;  %v2132_v34 = vsel %vm2119_vm2, %v2130_v13, %v8796_v6  ;;  %v2442_v33 = vrot.slane %v2342_v32, 1  ;;  %v1497_v60 = vpop.permute.xlu1 %1496 }
 0x20c   : > { %v3122_v45 = vadd.f32 %v3045_v3, %v2878_v2  ;;  %v1991_v26 = vadd.f32 %v1887_v36, %v1746_v49  ;;  %v8800_v30 = vrot.slane %v7028_v12, 1  ;;  %v2686_v44 = vrot.slane %v2586_v41, 2  ;;  %v9290_v2 = vld [vmem:[#allocation84_spill] sm:$0xff] }
 0x20d   : > { %v8801_v52 = vrot.slane %v7034_v23, 2  ;;  %v7048_v3 = vmul.f32 %v5455_v27, %v9290_v2  ;;  %v3142_v1 = vmul.f32 %v6730_v61, %v6024_v5  ;;  %v2272_v49 = vmul.f32 %v5440_v62, %v9287_v63 }
 0x20e   : > { %v3366_v7 = vadd.f32 %v3289_v39, %v3122_v45  ;;  %v2236_v13 = vadd.f32 %v2132_v34, %v1991_v26  ;;  %v2828_v32 = vmul.f32 %v5452_v8, %v6024_v5  ;;  %v7058_v39 = vmul.f32 %v6730_v61, %v9290_v2 }
 0x20f   : > { %v2444_v45 = vsel %vm1874_vm1, %v2442_v33, %v8800_v30  ;;  %v2688_v36 = vsel %vm2119_vm2, %v2686_v44, %v8801_v52  ;;  %v2998_v34 = vrot.slane %v2898_v43, 1  ;;  %v8803_v63 = vrot.slane %v7048_v3, 1 }
 0x210   : > { %v3398_v41 = vmax.f32 %v3366_v7, 0.0  ;;  %v2304_v26 = vadd.f32 %v2272_v49, %v2236_v13  ;;  %v1500_v6 = vmul.f32 %v1497_v60, %v9005_v20  ;;  %v1718_v11 = vmul.f32 %v9021_v50, %v6024_v5 }
 0x211   : > { %v3242_v24 = vrot.slane %v3142_v1, 2  ;;  %v1790_v7 = vmul.f32 %v9022_v46, %v6024_v5  ;;  %v7074_v33 = vmul.f32 %v9022_v46, %v9290_v2  ;;  %v2035_v1 = vmul.f32 %v9024_v57, %v6024_v5 }
 0x212   : > { %v3430_v25 = vmin.f32 %v3398_v41, 6.0  ;;  %v2548_v30 = vadd.f32 %v2444_v45, %v2304_v26  ;;  %v1502_v44 = vadd.f32 %v1500_v6, %v1490_v47  ;;  %v1750_v13 = vadd.f32 %v6774_v18, %v1718_v11  ;;  %v9292_v26 = vld [vmem:[#allocation88_spill] sm:$0xff] }
 0x213   : > { %v1895_v20 = vrot.slane %v1790_v7, 1  ;;  %v8802_v60 = vrot.slane %v7074_v33, 1  ;;  %v7084_v49 = vmul.f32 %v9024_v57, %v9290_v2  ;;  %v3000_v45 = vsel %vm1874_vm1, %v2998_v34, %v8803_v63 }
 0x214   : > { %3516 = vrot.lane.b32.xlu0 %v3430_v25, %s4660_s30  ;;  %v2792_v41 = vadd.f32 %v2688_v36, %v2548_v30  ;;  %v1504_v47 = vadd.f32 %v6395_v29, %v1502_v44  ;;  %v2348_v11 = vmul.f32 %v5345_v59, %v6045_v15  ;;  %v2140_v25 = vrot.slane %v2035_v1, 2 }
 0x215   : > { %9291 = vst [vmem:[#allocation42_spill] sm:$0xff] %v7084_v49  ;;  %v1897_v6 = vsel %vm1874_vm1, %v1895_v20, %v8802_v60  ;;  %v8804_v5 = vrot.slane %v7084_v49, 2  ;;  %v7098_v7 = vmul.f32 %v5345_v59, %v9292_v26  ;;  %v2592_v20 = vmul.f32 %v5362_v14, %v6045_v15  ;;  %v9312_v49 = vld [vmem:[#allocation41_spill] sm:$0xff] }
 0x216   : > { %v2860_v30 = vadd.f32 %v2828_v32, %v2792_v41  ;;  %v1506_v36 = vmax.f32 %v1504_v47, 0.0  ;;  %v1995_v52 = vadd.f32 %v1897_v6, %v1750_v13  ;;  %v2452_v34 = vrot.slane %v2348_v11, 1 }
 0x217   : > { %9293 = vst [vmem:[#allocation38_spill] sm:$0xff] %v7098_v7  ;;  %v2142_v29 = vsel %vm2119_vm2, %v2140_v25, %v8804_v5  ;;  %v7108_v1 = vmul.f32 %v5362_v14, %v9292_v26  ;;  %v2276_v32 = vmul.f32 %v5440_v62, %v6045_v15  ;;  %v9295_v13 = vrot.slane %v7058_v39, 2 }
 0x218   : > { %v3104_v60 = vadd.f32 %v3000_v45, %v2860_v30  ;;  %v1508_v63 = vmin.f32 %v1506_v36, 6.0  ;;  %v2240_v43 = vadd.f32 %v2142_v29, %v1995_v52  ;;  %v2696_v47 = vrot.slane %v2592_v20, 2 }
 0x219   : > { %9294 = vst [vmem:[#allocation53_spill] sm:$0xff] %v7108_v1  ;;  %v3244_v41 = vsel %vm2119_vm2, %v3242_v24, %v9295_v13  ;;  %v8808_v11 = vrot.slane %v7108_v1, 2  ;;  %v2904_v6 = vmul.f32 %v5455_v27, %v6066_v22  ;;  %v7122_v52 = vmul.f32 %v5455_v27, %v6061_v55 }
 0x21a   : > { %v3348_v25 = vadd.f32 %v3244_v41, %v3104_v60  ;;  %v7118_v5 = vmul.f32 0.0, %v1508_v63  ;;  %v2308_v44 = vadd.f32 %v2276_v32, %v2240_v43  ;;  %v7126_v15 = vmul.f32 %v6730_v61, %v6970_v38 }
 0x21b   : > { %9297 = vst [vmem:[#allocation54_spill] sm:$0xff] %v7122_v52  ;;  %v9298_v24 = vrot.slane %v7098_v7, 1  ;;  %v3148_v30 = vmul.f32 %v6730_v61, %v6066_v22  ;;  %v7135_v63 = vmul.f32 %v6730_v61, %v6061_v55  ;;  %v2832_v29 = vmul.f32 %v5452_v8, %v6066_v22 }
 0x21c   : > { %9296 = vst [vmem:[#allocation6_spill] sm:$0xff] %v7118_v5  ;;  %v3380_v43 = vmax.f32 %v3348_v25, 0.0  ;;  %v8807_v60 = vrot.slane %v7118_v5, 7  ;;  %v2698_v20 = vsel %vm2119_vm2, %v2696_v47, %v8808_v11  ;;  %v3008_v32 = vrot.slane %v2904_v6, 1 }
 0x21d   : > { %v2454_v45 = vsel %vm1874_vm1, %v2452_v34, %v9298_v24  ;;  %9299 = vst [vmem:[#allocation10_spill] sm:$0xff] %v7135_v63  ;;  %v8809_v34 = vrot.slane %v7122_v52, 1  ;;  %v3252_v13 = vrot.slane %v3148_v30, 2  ;;  %v9300_v24 = vrot.slane %v6939_v10, 7  ;;  %v9304_v30 = vld [vmem:[#allocation37_spill] sm:$0xff] }
 0x21e   : > { %v2552_v36 = vadd.f32 %v2454_v45, %v2308_v44  ;;  %v3412_v41 = vmin.f32 %v3380_v43, 6.0  ;;  %v8810_v45 = vrot.slane %v7135_v63, 2  ;;  %v9302_v1 = vrot.slane %v6790_v9, 7 }
 0x21f   : > { %v7149_v25 = vsel %vm1551_vm0, %v9300_v24, %v8807_v60  ;;  %v1817_v10 = vmul.f32 %v9022_v46, %v9304_v30  ;;  %v3010_v60 = vsel %vm1874_vm1, %v3008_v32, %v8809_v34  ;;  %v1736_v11 = vmul.f32 %v9021_v50, %v9304_v30  ;;  %v9308_v34 = vld [vmem:[#allocation8_spill] sm:$0xff] }
 0x220   : > { %9301 = vst [vmem:[#allocation61_spill] sm:$0xff] %v7149_v25  ;;  %v2796_v44 = vadd.f32 %v2698_v20, %v2552_v36  ;;  %v7156_v47 = vsel %vm1551_vm0, %v9302_v1, 0.0  ;;  %v7160_v6 = vmul.f32 %v5455_v27, %v7149_v25  ;;  %v7167_v36 = vmul.f32 %v5452_v8, %v6970_v38  ;;  %3480 = vrot.lane.b32.xlu1 %v3412_v41, %s4660_s30 }
 0x221   : > { %9303 = vst [vmem:[#allocation76_spill] sm:$0xff] %v7156_v47  ;;  %v7174_v7 = vmul.f32 %v6730_v61, %v7149_v25  ;;  %v7187_v41 = vmul.f32 %v9022_v46, %v6673_v21  ;;  %v2062_v1 = vmul.f32 %v9024_v57, %v9304_v30  ;;  %v7193_v32 = vmul.f32 %v9024_v57, %v6673_v21 }
 0x222   : > { %9305 = vst [vmem:[#allocation43_spill] sm:$0xff] %v7167_v36  ;;  %v2864_v24 = vadd.f32 %v2832_v29, %v2796_v44  ;;  %v3254_v29 = vsel %vm2119_vm2, %v3252_v13, %v8810_v45  ;;  %v1940_v44 = vrot.slane %v1817_v10, 1  ;;  %v2375_v20 = vmul.f32 %v5345_v59, %v9308_v34 }
 0x223   : > { %9306 = vst [vmem:[#allocation84_spill] sm:$0xff] %v7187_v41  ;;  %9307 = vst [vmem:[#allocation37_spill] sm:$0xff] %v7193_v32  ;;  %v7200_v13 = vmul.f32 %v5345_v59, %v6693_v51  ;;  %v2619_v10 = vmul.f32 %v5362_v14, %v9308_v34  ;;  %v1768_v45 = vadd.f32 %v6774_v18, %v1736_v11  ;;  %v2185_v25 = vrot.slane %v2062_v1, 2 }
 0x224   : > { %v3108_v43 = vadd.f32 %v3010_v60, %v2864_v24  ;;  %v8821_v24 = vrot.slane %v7187_v41, 1  ;;  %v2294_v9 = vmul.f32 %v5440_v62, %v9308_v34  ;;  %v7210_v37 = vmul.f32 %v5362_v14, %v6693_v51 }
 0x225   : > { %9309 = vst [vmem:[#allocation8_spill] sm:$0xff] %v7200_v13  ;;  %v8822_v5 = vrot.slane %v7200_v13, 1  ;;  %v2497_v63 = vrot.slane %v2375_v20, 1  ;;  %v2741_v11 = vrot.slane %v2619_v10, 2  ;;  %v9311_v36 = vrot.slane %v7193_v32, 2 }
 0x226   : > { %v3352_v60 = vadd.f32 %v3254_v29, %v3108_v43  ;;  %9310 = vst [vmem:[#allocation166_spill] sm:$0xff] %v7210_v37  ;;  %v1942_v29 = vsel %vm1874_vm1, %v1940_v44, %v8821_v24  ;;  %v8825_v38 = vrot.slane %v7210_v37, 2  ;;  %v7224_v41 = vmul.f32 %v5455_v27, %v6818_v58 }
 0x227   : > { %v2013_v47 = vadd.f32 %v1942_v29, %v1768_v45  ;;  %v2187_v26 = vsel %vm2119_vm2, %v2185_v25, %v9311_v36  ;;  %v2850_v45 = vmul.f32 %v5452_v8, %v9312_v49  ;;  %v3175_v20 = vmul.f32 %v6730_v61, %v9312_v49 }
 0x228   : > { %v3384_v43 = vmax.f32 %v3352_v60, 0.0  ;;  %v2931_v60 = vmul.f32 %v5455_v27, %v9312_v49  ;;  %9313 = vst [vmem:[#allocation41_spill] sm:$0xff] %v7224_v41  ;;  %v7232_v44 = vmul.f32 %v6730_v61, %v6818_v58  ;;  %v2499_v25 = vsel %vm1874_vm1, %v2497_v63, %v8822_v5 }
 0x229   : > { %v2258_v1 = vadd.f32 %v2187_v26, %v2013_v47  ;;  %v1722_v26 = vmul.f32 %v9021_v50, %v6066_v22  ;;  %v1796_v47 = vmul.f32 %v9022_v46, %v6066_v22  ;;  %v3297_v24 = vrot.slane %v3175_v20, 2 }
 0x22a   : > { %v3416_v52 = vmin.f32 %v3384_v43, 6.0  ;;  %9314 = vst [vmem:[#allocation167_spill] sm:$0xff] %v7232_v44  ;;  %v2743_v43 = vsel %vm2119_vm2, %v2741_v11, %v8825_v38  ;;  %v3053_v29 = vrot.slane %v2931_v60, 1  ;;  %v2041_v36 = vmul.f32 %v9024_v57, %v6066_v22 }
 0x22b   : > { %v2326_v10 = vadd.f32 %v2294_v9, %v2258_v1  ;;  %v1754_v63 = vadd.f32 %v6774_v18, %v1722_v26  ;;  %v1905_v5 = vrot.slane %v1796_v47, 1  ;;  %v7257_v11 = vmul.f32 %v9024_v57, %v6061_v55 }
 0x22c   : > { %3488 = vrot.lane.b32.xlu1 %v3416_v52, %s4660_s30  ;;  %v7248_v52 = vmul.f32 %v9022_v46, %v6061_v55  ;;  %v9315_v60 = vrot.slane %v7224_v41, 1  ;;  %v2150_v20 = vrot.slane %v2041_v36, 2  ;;  %v2354_v26 = vmul.f32 %v5345_v59, %v6147_v54 }
 0x22d   : > { %v2570_v13 = vadd.f32 %v2499_v25, %v2326_v10  ;;  %v7266_v22 = vmul.f32 %v5345_v59, %v6144_v40  ;;  %v8829_v10 = vrot.slane %v7257_v11, 2  ;;  %v2598_v38 = vmul.f32 %v5362_v14, %v6147_v54 }
 0x22e   : > { %v8827_v9 = vrot.slane %v7248_v52, 1  ;;  %v3055_v1 = vsel %vm1874_vm1, %v3053_v29, %v9315_v60  ;;  %v2462_v29 = vrot.slane %v2354_v26, 1  ;;  %v7277_v60 = vmul.f32 %v5362_v14, %v6144_v40 }
 0x22f   : > { %9316 = vst [vmem:[#allocation168_spill] sm:$0xff] %v7266_v22  ;;  %v2814_v25 = vadd.f32 %v2743_v43, %v2570_v13  ;;  %v9317_v13 = vrot.slane %v7232_v44, 2 }
 0x230   : > { %v1907_v47 = vsel %vm1874_vm1, %v1905_v5, %v8827_v9  ;;  %v2152_v5 = vsel %vm2119_vm2, %v2150_v20, %v8829_v10  ;;  %v2706_v9 = vrot.slane %v2598_v38, 2  ;;  %v8832_v26 = vrot.slane %v7277_v60, 2 }
 0x231   : > { %v1999_v32 = vadd.f32 %v1907_v47, %v1754_v63  ;;  %v2882_v41 = vadd.f32 %v2850_v45, %v2814_v25  ;;  %v3299_v43 = vsel %vm2119_vm2, %v3297_v24, %v9317_v13  ;;  %v2280_v63 = vmul.f32 %v5440_v62, %v6147_v54 }
 0x232   : > { %v2910_v47 = vmul.f32 %v5455_v27, %v6350_v53  ;;  %v7292_v45 = vmul.f32 %v5455_v27, %v6327_v0  ;;  %v3154_v24 = vmul.f32 %v6730_v61, %v6350_v53  ;;  %v7298_v38 = vmul.f32 %v6730_v61, %v6327_v0 }
 0x233   : > { %v2244_v37 = vadd.f32 %v2152_v5, %v1999_v32  ;;  %v3126_v36 = vadd.f32 %v3055_v1, %v2882_v41  ;;  %v9319_v54 = vrot.slane %v7266_v22, 1  ;;  %v2836_v25 = vmul.f32 %v5452_v8, %v6350_v53 }
 0x234   : > { %9318 = vst [vmem:[#allocation169_spill] sm:$0xff] %v7298_v38  ;;  %v1726_v41 = vmul.f32 %v9021_v50, %v6350_v53  ;;  %v2708_v13 = vsel %vm2119_vm2, %v2706_v9, %v8832_v26  ;;  %v3018_v5 = vrot.slane %v2910_v47, 1  ;;  %v8834_v10 = vrot.slane %v7292_v45, 1 }
 0x235   : > { %v2312_v32 = vadd.f32 %v2280_v63, %v2244_v37  ;;  %v2464_v20 = vsel %vm1874_vm1, %v2462_v29, %v9319_v54  ;;  %v3370_v1 = vadd.f32 %v3299_v43, %v3126_v36  ;;  %v3262_v37 = vrot.slane %v3154_v24, 2 }
 0x236   : > { %v1802_v63 = vmul.f32 %v9022_v46, %v6350_v53  ;;  %v7315_v29 = vmul.f32 %v9022_v46, %v6327_v0  ;;  %v1758_v36 = vadd.f32 %v6774_v18, %v1726_v41  ;;  %v2047_v9 = vmul.f32 %v9024_v57, %v6350_v53 }
 0x237   : > { %v2556_v44 = vadd.f32 %v2464_v20, %v2312_v32  ;;  %v3402_v54 = vmax.f32 %v3370_v1, 0.0  ;;  %v7324_v24 = vmul.f32 %v9024_v57, %v6327_v0  ;;  %v3020_v1 = vsel %vm1874_vm1, %v3018_v5, %v8834_v10 }
 0x238   : > { %9320 = vst [vmem:[#allocation170_spill] sm:$0xff] %v7315_v29  ;;  %v1915_v47 = vrot.slane %v1802_v63, 1  ;;  %v8833_v32 = vrot.slane %v7315_v29, 1  ;;  %v2160_v26 = vrot.slane %v2047_v9, 2  ;;  %v2360_v41 = vmul.f32 %v5345_v59, %v6424_v19 }
 0x239   : > { %v2800_v43 = vadd.f32 %v2708_v13, %v2556_v44  ;;  %9321 = vst [vmem:[#allocation171_spill] sm:$0xff] %v7324_v24  ;;  %v3434_v20 = vmin.f32 %v3402_v54, 6.0  ;;  %v8836_v44 = vrot.slane %v7324_v24, 2  ;;  %v7337_v13 = vmul.f32 %v5345_v59, %v6496_v17 }
 0x23a   : > { %v1917_v53 = vsel %vm1874_vm1, %v1915_v47, %v8833_v32  ;;  %v9323_v63 = vrot.slane %v7298_v38, 2  ;;  %v7347_v9 = vmul.f32 %v5362_v14, %v6496_v17  ;;  %v2472_v32 = vrot.slane %v2360_v41, 1 }
 0x23b   : > { %v2868_v22 = vadd.f32 %v2836_v25, %v2800_v43  ;;  %9322 = vst [vmem:[#allocation172_spill] sm:$0xff] %v7337_v13  ;;  %3524 = vrot.lane.b32.xlu0 %v3434_v20, %s4660_s30  ;;  %v2003_v54 = vadd.f32 %v1917_v53, %v1758_v36  ;;  %v2604_v25 = vmul.f32 %v5362_v14, %v6424_v19  ;;  %v8837_v20 = vrot.slane %v7337_v13, 1  ;;  %v9325_v53 = vld [vmem:[#allocation23_spill] sm:$0xff] }
 0x23c   : > { %v3264_v5 = vsel %vm2119_vm2, %v3262_v37, %v9323_v63  ;;  %9324 = vst [vmem:[#allocation173_spill] sm:$0xff] %v7347_v9  ;;  %v2162_v47 = vsel %vm2119_vm2, %v2160_v26, %v8836_v44  ;;  %v2284_v37 = vmul.f32 %v5440_v62, %v6424_v19  ;;  %v2916_v63 = vmul.f32 %v5455_v27, %v9325_v53 }
 0x23d   : > { %v3112_v43 = vadd.f32 %v3020_v1, %v2868_v22  ;;  %v2248_v10 = vadd.f32 %v2162_v47, %v2003_v54  ;;  %v2474_v22 = vsel %vm1874_vm1, %v2472_v32, %v8837_v20  ;;  %v9326_v1 = vld [vmem:[#allocation116_spill] sm:$0xff]  ;;  %v3160_v41 = vmul.f32 %v6730_v61, %v9325_v53 }
 0x23e   : > { %v7363_v26 = vmul.f32 %v5455_v27, %v9326_v1  ;;  %v2716_v47 = vrot.slane %v2604_v25, 2  ;;  %v2840_v19 = vmul.f32 %v5452_v8, %v9325_v53  ;;  %v7371_v44 = vmul.f32 %v6730_v61, %v9326_v1 }
 0x23f   : > { %v3356_v29 = vadd.f32 %v3264_v5, %v3112_v43  ;;  %v2316_v54 = vadd.f32 %v2284_v37, %v2248_v10  ;;  %v3028_v43 = vrot.slane %v2916_v63, 1  ;;  %v1730_v20 = vmul.f32 %v9021_v50, %v9325_v53 }
 0x240   : > { %9327 = vst [vmem:[#allocation23_spill] sm:$0xff] %v7363_v26  ;;  %9328 = vst [vmem:[#allocation116_spill] sm:$0xff] %v7371_v44  ;;  %v1808_v10 = vmul.f32 %v9022_v46, %v9325_v53  ;;  %v7381_v25 = vmul.f32 %v9022_v46, %v9326_v1  ;;  %v9330_v24 = vrot.slane %v7347_v9, 2  ;;  %v3272_v63 = vrot.slane %v3160_v41, 2 }
 0x241   : > { %v3388_v5 = vmax.f32 %v3356_v29, 0.0  ;;  %v2560_v36 = vadd.f32 %v2474_v22, %v2316_v54  ;;  %v2053_v32 = vmul.f32 %v9024_v57, %v9325_v53  ;;  %v9331_v22 = vrot.slane %v7363_v26, 1 }
 0x242   : > { %9329 = vst [vmem:[#allocation174_spill] sm:$0xff] %v7381_v25  ;;  %v2718_v29 = vsel %vm2119_vm2, %v2716_v47, %v9330_v24  ;;  %v1925_v13 = vrot.slane %v1808_v10, 1  ;;  %v8844_v38 = vrot.slane %v7381_v25, 1  ;;  %v1762_v24 = vadd.f32 %v6774_v18, %v1730_v20 }
 0x243   : > { %v3420_v37 = vmin.f32 %v3388_v5, 6.0  ;;  %v2804_v17 = vadd.f32 %v2718_v29, %v2560_v36  ;;  %v3030_v54 = vsel %vm1874_vm1, %v3028_v43, %v9331_v22  ;;  %v9332_v5 = vrot.slane %v7371_v44, 2  ;;  %v9334_v36 = vld [vmem:[#allocation17_spill] sm:$0xff] }
 0x244   : > { %v7399_v41 = vmul.f32 %v9024_v57, %v9326_v1  ;;  %v2366_v53 = vmul.f32 %v5345_v59, %v9334_v36  ;;  %v1927_v43 = vsel %vm1874_vm1, %v1925_v13, %v8844_v38  ;;  %v7408_v10 = vmul.f32 %v5345_v59, %v6568_v4 }
 0x245   : > { %3496 = vrot.lane.b32.xlu1 %v3420_v37, %s4660_s30  ;;  %v3274_v9 = vsel %vm2119_vm2, %v3272_v63, %v9332_v5  ;;  %v2872_v47 = vadd.f32 %v2840_v19, %v2804_v17  ;;  %v2610_v37 = vmul.f32 %v5362_v14, %v9334_v36  ;;  %v2007_v20 = vadd.f32 %v1927_v43, %v1762_v24 }
 0x246   : > { %9333 = vst [vmem:[#allocation175_spill] sm:$0xff] %v7399_v41  ;;  %9335 = vst [vmem:[#allocation17_spill] sm:$0xff] %v7408_v10  ;;  %v2170_v29 = vrot.slane %v2053_v32, 2  ;;  %v8848_v63 = vrot.slane %v7399_v41, 2  ;;  %v7415_v22 = vmul.f32 %v5362_v14, %v6568_v4  ;;  %v2288_v19 = vmul.f32 %v5440_v62, %v9334_v36  ;;  %v9337_v32 = vld [vmem:[#allocation29_spill] sm:$0xff] }
 0x247   : > { %v3116_v17 = vadd.f32 %v3030_v54, %v2872_v47  ;;  %v2482_v13 = vrot.slane %v2366_v53, 1  ;;  %v8850_v5 = vrot.slane %v7408_v10, 1  ;;  %v2922_v43 = vmul.f32 %v5455_v27, %v9337_v32 }
 0x248   : > { %9336 = vst [vmem:[#allocation176_spill] sm:$0xff] %v7415_v22  ;;  %v2172_v38 = vsel %vm2119_vm2, %v2170_v29, %v8848_v63  ;;  %v7428_v4 = vmul.f32 %v5455_v27, %v6596_v28  ;;  %v2726_v44 = vrot.slane %v2610_v37, 2  ;;  %v3166_v36 = vmul.f32 %v6730_v61, %v9337_v32 }
 0x249   : > { %v3360_v54 = vadd.f32 %v3274_v9, %v3116_v17  ;;  %v2252_v47 = vadd.f32 %v2172_v38, %v2007_v20  ;;  %v2484_v53 = vsel %vm1874_vm1, %v2482_v13, %v8850_v5  ;;  %v2844_v29 = vmul.f32 %v5452_v8, %v9337_v32 }
 0x24a   : > { %9338 = vst [vmem:[#allocation29_spill] sm:$0xff] %v7428_v4  ;;  %v7440_v24 = vmul.f32 %v6730_v61, %v6596_v28  ;;  %v9340_v38 = vrot.slane %v7415_v22, 2  ;;  %v1734_v20 = vmul.f32 %v9021_v50, %v9337_v32  ;;  %v3038_v17 = vrot.slane %v2922_v43, 1 }
 0x24b   : > { %v3392_v41 = vmax.f32 %v3360_v54, 0.0  ;;  %v2320_v9 = vadd.f32 %v2288_v19, %v2252_v47  ;;  %v3282_v13 = vrot.slane %v3166_v36, 2  ;;  %v1814_v5 = vmul.f32 %v9022_v46, %v9337_v32 }
 0x24c   : > { %9339 = vst [vmem:[#allocation177_spill] sm:$0xff] %v7440_v24  ;;  %v2728_v37 = vsel %vm2119_vm2, %v2726_v44, %v9340_v38  ;;  %v7451_v63 = vmul.f32 %v9022_v46, %v6596_v28  ;;  %v8858_v19 = vrot.slane %v7440_v24, 2  ;;  %v2059_v54 = vmul.f32 %v9024_v57, %v9337_v32 }
 0x24d   : > { %v3424_v10 = vmin.f32 %v3392_v41, 6.0  ;;  %v2564_v25 = vadd.f32 %v2484_v53, %v2320_v9  ;;  %v9342_v44 = vrot.slane %v7428_v4, 1  ;;  %v1935_v43 = vrot.slane %v1814_v5, 1 }
 0x24e   : > { %9341 = vst [vmem:[#allocation178_spill] sm:$0xff] %v7451_v63  ;;  %v8853_v36 = vrot.slane %v7451_v63, 1  ;;  %v7462_v38 = vmul.f32 %v9024_v57, %v6596_v28  ;;  %v1766_v53 = vadd.f32 %v6774_v18, %v1734_v20  ;;  %v2180_v9 = vrot.slane %v2059_v54, 2 }
 0x24f   : > { %v3040_v47 = vsel %vm1874_vm1, %v3038_v17, %v9342_v44  ;;  %3504 = vrot.lane.b32.xlu1 %v3424_v10, %s4660_s30  ;;  %v2808_v41 = vadd.f32 %v2728_v37, %v2564_v25  ;;  %v2372_v32 = vmul.f32 %v5345_v59, %v9304_v30  ;;  %v7474_v44 = vmul.f32 %v5345_v59, %v6673_v21 }
 0x250   : > { %9343 = vst [vmem:[#allocation179_spill] sm:$0xff] %v7462_v38  ;;  %v1937_v17 = vsel %vm1874_vm1, %v1935_v43, %v8853_v36  ;;  %v8857_v5 = vrot.slane %v7462_v38, 2  ;;  %v2616_v10 = vmul.f32 %v5362_v14, %v9304_v30  ;;  %v3284_v37 = vsel %vm2119_vm2, %v3282_v13, %v8858_v19 }
 0x251   : > { %9344 = vst [vmem:[#allocation180_spill] sm:$0xff] %v7474_v44  ;;  %v2876_v25 = vadd.f32 %v2844_v29, %v2808_v41  ;;  %v2011_v20 = vadd.f32 %v1937_v17, %v1766_v53  ;;  %v7483_v54 = vmul.f32 %v5362_v14, %v6673_v21  ;;  %v2292_v36 = vmul.f32 %v5440_v62, %v9304_v30 }
 0x252   : > { %v2182_v43 = vsel %vm2119_vm2, %v2180_v9, %v8857_v5  ;;  %v2492_v63 = vrot.slane %v2372_v32, 1  ;;  %v8860_v4 = vrot.slane %v7474_v44, 1  ;;  %v2736_v24 = vrot.slane %v2616_v10, 2 }
 0x253   : > { %9345 = vst [vmem:[#allocation181_spill] sm:$0xff] %v7483_v54  ;;  %v3120_v29 = vadd.f32 %v3040_v47, %v2876_v25  ;;  %v2256_v41 = vadd.f32 %v2182_v43, %v2011_v20  ;;  %v8859_v13 = vrot.slane %v7483_v54, 2  ;;  %v2928_v53 = vmul.f32 %v5455_v27, %v9308_v34 }
 0x254   : > { %v7496_v17 = vmul.f32 %v5455_v27, %v6693_v51  ;;  %v3172_v9 = vmul.f32 %v6730_v61, %v9308_v34  ;;  %v7502_v30 = vmul.f32 %v6730_v61, %v6693_v51  ;;  %v2848_v25 = vmul.f32 %v5452_v8, %v9308_v34 }
 0x255   : > { %v3364_v32 = vadd.f32 %v3284_v37, %v3120_v29  ;;  %v2324_v10 = vadd.f32 %v2292_v36, %v2256_v41  ;;  %v2494_v20 = vsel %vm1874_vm1, %v2492_v63, %v8860_v4  ;;  %v2738_v43 = vsel %vm2119_vm2, %v2736_v24, %v8859_v13 }
 0x256   : > { %9346 = vst [vmem:[#allocation182_spill] sm:$0xff] %v7496_v17  ;;  %9347 = vst [vmem:[#allocation183_spill] sm:$0xff] %v7502_v30  ;;  %v1738_v61 = vmul.f32 %v9021_v50, %v9308_v34  ;;  %v1820_v36 = vmul.f32 %v9022_v46, %v9308_v34  ;;  %v7520_v37 = vmul.f32 %v9022_v46, %v6693_v51  ;;  %v3048_v29 = vrot.slane %v2928_v53, 1 }
 0x257   : > { %v3396_v19 = vmax.f32 %v3364_v32, 0.0  ;;  %v2568_v47 = vadd.f32 %v2494_v20, %v2324_v10  ;;  %v3292_v63 = vrot.slane %v3172_v9, 2  ;;  %v2065_v24 = vmul.f32 %v9024_v57, %v9308_v34 }
 0x258   : > { %9348 = vst [vmem:[#allocation184_spill] sm:$0xff] %v7520_v37  ;;  %v1945_v5 = vrot.slane %v1820_v36, 1  ;;  %v8862_v32 = vrot.slane %v7520_v37, 1  ;;  %v9349_v10 = vrot.slane %v7496_v17, 1  ;;  %v1770_v54 = vadd.f32 %v6774_v18, %v1738_v61 }
 0x259   : > { %v3428_v13 = vmin.f32 %v3396_v19, 6.0  ;;  %v2812_v4 = vadd.f32 %v2738_v43, %v2568_v47  ;;  %v7532_v53 = vmul.f32 %v9024_v57, %v6693_v51  ;;  %v2190_v9 = vrot.slane %v2065_v24, 2  ;;  %v9360_v51 = vld [vmem:[#allocation115_spill] sm:$0xff] }
 0x25a   : > { %v3050_v20 = vsel %vm1874_vm1, %v3048_v29, %v9349_v10  ;;  %v1947_v34 = vsel %vm1874_vm1, %v1945_v5, %v8862_v32  ;;  %v2378_v19 = vmul.f32 %v5345_v59, %v9312_v49  ;;  %v7542_v47 = vmul.f32 %v5345_v59, %v6818_v58  ;;  %v9354_v10 = vld [vmem:[#allocation124_spill] sm:$0xff]  ;;  %v7570_v32 = vld [vmem:[%s8564_s5 + $0x8] ss:$0 sm:$0xff] }
 0x25b   : > { %9350 = vst [vmem:[#allocation185_spill] sm:$0xff] %v7532_v53  ;;  %3512 = vrot.lane.b32.xlu1 %v3428_v13, %s4660_s30  ;;  %v2880_v41 = vadd.f32 %v2848_v25, %v2812_v4  ;;  %v2015_v18 = vadd.f32 %v1947_v34, %v1770_v54  ;;  %v8863_v43 = vrot.slane %v7532_v53, 2  ;;  %v2622_v61 = vmul.f32 %v5362_v14, %v9312_v49 }
 0x25c   : > { %9351 = vst [vmem:[#allocation186_spill] sm:$0xff] %v7542_v47  ;;  %v7549_v4 = vmul.f32 %v5362_v14, %v6818_v58  ;;  %v9353_v5 = vrot.slane %v7502_v30, 2  ;;  %v2296_v36 = vmul.f32 %v5440_v62, %v9312_v49  ;;  %v2934_v34 = vmul.f32 %v5455_v27, %v9354_v10 }
 0x25d   : > { %v3124_v13 = vadd.f32 %v3050_v20, %v2880_v41  ;;  %v2192_v54 = vsel %vm2119_vm2, %v2190_v9, %v8863_v43  ;;  %v7565_v41 = vmul.f32 %v5455_v27, %v6848_v16  ;;  %v3178_v9 = vmul.f32 %v7570_v32, %v9354_v10 }
 0x25e   : > { %9352 = vst [vmem:[#allocation187_spill] sm:$0xff] %v7549_v4  ;;  %v3294_v25 = vsel %vm2119_vm2, %v3292_v63, %v9353_v5  ;;  %v2260_v63 = vadd.f32 %v2192_v54, %v2015_v18  ;;  %v2502_v5 = vrot.slane %v2378_v19, 1  ;;  %v2746_v43 = vrot.slane %v2622_v61, 2  ;;  %v9357_v18 = vld [vmem:[#allocation52_spill] sm:$0xff] }
 0x25f   : > { %9355 = vst [vmem:[#allocation124_spill] sm:$0xff] %v7565_v41  ;;  %v3368_v20 = vadd.f32 %v3294_v25, %v3124_v13  ;;  %v3058_v24 = vrot.slane %v2934_v34, 1  ;;  %v8874_v29 = vrot.slane %v7565_v41, 1  ;;  %v7577_v53 = vmul.f32 %v7570_v32, %v6848_v16 }
 0x260   : > { %v2328_v13 = vadd.f32 %v2296_v36, %v2260_v63  ;;  %v2852_v19 = vmul.f32 %v5452_v8, %v9354_v10  ;;  %v2269_v25 = vmul.f32 %v5440_v62, %v9357_v18  ;;  %v9358_v54 = vrot.slane %v7542_v47, 1  ;;  %v9361_v18 = vld [vmem:[#allocation65_spill] sm:$0xff] }
 0x261   : > { %9356 = vst [vmem:[#allocation188_spill] sm:$0xff] %v7577_v53  ;;  %v3400_v30 = vmax.f32 %v3368_v20, 0.0  ;;  %v9359_v61 = vrot.slane %v7549_v4, 2  ;;  %v3060_v37 = vsel %vm1874_vm1, %v3058_v24, %v8874_v29  ;;  %v3302_v20 = vrot.slane %v3178_v9, 2 }
 0x262   : > { %v2504_v17 = vsel %vm1874_vm1, %v2502_v5, %v9358_v54  ;;  %v2301_v44 = vadd.f32 %v2269_v25, %v9360_v51  ;;  %v9362_v21 = vrot.slane %v9361_v18, 1  ;;  %v9363_v47 = vrot.slane %v5898_v31, 1  ;;  %v9364_v54 = vld [vmem:[#allocation63_spill] sm:$0xff]  ;;  %v9365_v51 = vld [vmem:[#allocation57_spill] sm:$0xff]  ;;  %v9370_v25 = vld [vmem:[#allocation58_spill] sm:$0xff] }
 0x263   : > { %v2748_v34 = vsel %vm2119_vm2, %v2746_v43, %v9359_v61  ;;  %v3432_v36 = vmin.f32 %v3400_v30, 6.0  ;;  %v2572_v63 = vadd.f32 %v2504_v17, %v2328_v13  ;;  %v2894_v43 = vmul.f32 %v5455_v27, %v9364_v54 }
 0x264   : > { %v2436_v5 = vsel %vm1874_vm1, %v9363_v47, %v9362_v21  ;;  %v3138_v61 = vmul.f32 %v7570_v32, %v9364_v54  ;;  %v1715_v30 = vmul.f32 %v9021_v50, %v9259_v42  ;;  %v9366_v9 = vrot.slane %v9365_v51, 2  ;;  %v9368_v21 = vld [vmem:[#allocation11_spill] sm:$0xff] }
 0x265   : > { %3520 = vrot.lane.b32.xlu1 %v3432_v36, %s4660_s30  ;;  %v2816_v17 = vadd.f32 %v2748_v34, %v2572_v63  ;;  %v2545_v24 = vadd.f32 %v2436_v5, %v2301_v44  ;;  %v9367_v13 = vrot.slane %v6883_v56, 2  ;;  %v9369_v47 = vrot.slane %v9368_v21, 1  ;;  %v7621_v44 = vld [vmem:[%s8565_s6] ss:$0 sm:$0xff]  ;;  %v9372_v63 = vld [vmem:[#allocation66_spill] sm:$0xff] }
 0x266   : > { %v9371_v18 = vrot.slane %v9370_v25, 1  ;;  %v2825_v10 = vmul.f32 %v5452_v8, %v9259_v42  ;;  %v2991_v41 = vrot.slane %v2894_v43, 1  ;;  %v3235_v4 = vrot.slane %v3138_v61, 2 }
 0x267   : > { %v2680_v31 = vsel %vm2119_vm2, %v9367_v13, %v9366_v9  ;;  %v1747_v56 = vadd.f32 %v7621_v44, %v1715_v30  ;;  %v2884_v34 = vadd.f32 %v2852_v19, %v2816_v17  ;;  %v2344_v5 = vmul.f32 %v5345_v59, %v9372_v63  ;;  %v9374_v13 = vld [vmem:[#allocation44_spill] sm:$0xff]  ;;  %v9378_v30 = vld [vmem:[#allocation75_spill] sm:$0xff] }
 0x268   : > { %v1889_v29 = vsel %vm1874_vm1, %v9371_v18, %v9369_v47  ;;  %v2789_v36 = vadd.f32 %v2680_v31, %v2545_v24  ;;  %v2588_v51 = vmul.f32 %v5362_v14, %v9372_v63  ;;  %v9373_v9 = vrot.slane %v7577_v53, 2  ;;  %v9376_v47 = vld [vmem:[#allocation36_spill] sm:$0xff]  ;;  %v9379_v31 = vld [vmem:[#allocation31_spill] sm:$0xff] }
 0x269   : > { %v1992_v61 = vadd.f32 %v1889_v29, %v1747_v56  ;;  %v9375_v21 = vrot.slane %v9374_v13, 2  ;;  %v9377_v25 = vrot.slane %v9376_v47, 2  ;;  %v2273_v19 = vmul.f32 %v5440_v62, %v9378_v30 }
 0x26a   : > { %v3304_v43 = vsel %vm2119_vm2, %v3302_v20, %v9373_v9  ;;  %v3128_v17 = vadd.f32 %v3060_v37, %v2884_v34  ;;  %v2857_v24 = vadd.f32 %v2825_v10, %v2789_v36  ;;  %v9380_v38 = vrot.slane %v9379_v31, 1  ;;  %v9381_v20 = vld [vmem:[#allocation47_spill] sm:$0xff] }
 0x26b   : > { %v2134_v18 = vsel %vm2119_vm2, %v9377_v25, %v9375_v21  ;;  %v2445_v22 = vrot.slane %v2344_v5, 1  ;;  %v2689_v26 = vrot.slane %v2588_v51, 2  ;;  %v2900_v29 = vmul.f32 %v5455_v27, %v9381_v20  ;;  %v9382_v21 = vld [vmem:[#allocation22_spill] sm:$0xff] }
 0x26c   : > { %v2992_v28 = vsel %vm1874_vm1, %v9380_v38, %v2991_v41  ;;  %v2237_v53 = vadd.f32 %v2134_v18, %v1992_v61  ;;  %v3144_v56 = vmul.f32 %v7570_v32, %v9381_v20  ;;  %v3372_v9 = vadd.f32 %v3304_v43, %v3128_v17 }
 0x26d   : > { %v3101_v13 = vadd.f32 %v2992_v28, %v2857_v24  ;;  %v9383_v47 = vrot.slane %v9382_v21, 2  ;;  %v1740_v10 = vmul.f32 %v9021_v50, %v9312_v49  ;;  %v9384_v38 = vrot.slane %v7028_v12, 1 }
 0x26e   : > { %v2305_v34 = vadd.f32 %v2273_v19, %v2237_v53  ;;  %v3001_v36 = vrot.slane %v2900_v29, 1  ;;  %v3245_v5 = vrot.slane %v3144_v56, 2  ;;  %v3404_v51 = vmax.f32 %v3372_v9, 0.0 }
 0x26f   : > { %v3236_v37 = vsel %vm2119_vm2, %v9383_v47, %v3235_v4  ;;  %v2446_v41 = vsel %vm1874_vm1, %v9384_v38, %v2445_v22  ;;  %v1823_v43 = vmul.f32 %v9022_v46, %v9312_v49  ;;  %v7657_v28 = vmul.f32 %v9022_v46, %v6818_v58 }
 0x270   : > { %v3345_v61 = vadd.f32 %v3236_v37, %v3101_v13  ;;  %v2549_v4 = vadd.f32 %v2446_v41, %v2305_v34  ;;  %v9385_v25 = vrot.slane %v7034_v23, 2  ;;  %v2829_v12 = vmul.f32 %v5452_v8, %v9290_v2 }
 0x271   : > { %v2068_v22 = vmul.f32 %v9024_v57, %v9312_v49  ;;  %v3436_v18 = vmin.f32 %v3404_v51, 6.0  ;;  %v1950_v17 = vrot.slane %v1823_v43, 1  ;;  %v1951_v24 = vrot.slane %v7657_v28, 1 }
 0x272   : > { %v2690_v53 = vsel %vm2119_vm2, %v9385_v25, %v2689_v26  ;;  %v3377_v19 = vmax.f32 %v3345_v61, 0.0  ;;  %v9386_v46 = vrot.slane %v7048_v3, 1  ;;  %v1772_v23 = vadd.f32 %v7621_v44, %v1740_v10  ;;  %v9389_v10 = vld [vmem:[#allocation129_spill] sm:$0xff]  ;;  %v9393_v25 = vld [vmem:[#allocation80_spill] sm:$0xff] }
 0x273   : > { %v2793_v31 = vadd.f32 %v2690_v53, %v2549_v4  ;;  %v7673_v26 = vmul.f32 %v9024_v57, %v6818_v58  ;;  %3528 = vrot.lane.b32.xlu1 %v3436_v18, %s4660_s30  ;;  %v9387_v49 = vrot.slane %v7058_v39, 2  ;;  %v1952_v9 = vsel %vm1874_vm1, %v1950_v17, %v1951_v24  ;;  %v9396_v18 = vld [vmem:[#allocation77_spill] sm:$0xff] }
 0x274   : > { %v3002_v29 = vsel %vm1874_vm1, %v9386_v46, %v3001_v36  ;;  %v2195_v13 = vrot.slane %v2068_v22, 2  ;;  %v7684_v3 = vmul.f32 %v5362_v14, %v6848_v16  ;;  %v2017_v47 = vadd.f32 %v1952_v9, %v1772_v23 }
 0x275   : > { %v3246_v56 = vsel %vm2119_vm2, %v9387_v49, %v3245_v5  ;;  %v2861_v21 = vadd.f32 %v2829_v12, %v2793_v31  ;;  %v2196_v57 = vrot.slane %v7673_v26, 2  ;;  %v9388_v37 = vrot.slane %v6975_v48, 1  ;;  %v9399_v49 = vld [vmem:[#allocation81_spill] sm:$0xff] }
 0x276   : > { %v9390_v34 = vrot.slane %v9389_v10, 1  ;;  %v3409_v38 = vmin.f32 %v3377_v19, 6.0  ;;  %v2752_v41 = vrot.slane %v7684_v3, 2  ;;  %v9391_v36 = vrot.slane %v7160_v6, 1 }
 0x277   : > { %v9392_v5 = vrot.slane %v6993_v35, 1  ;;  %v1719_v61 = vmul.f32 %v9021_v50, %v9290_v2  ;;  %v3105_v43 = vadd.f32 %v3002_v29, %v2861_v21  ;;  %v2197_v4 = vsel %vm2119_vm2, %v2195_v13, %v2196_v57  ;;  %v9401_v13 = vld [vmem:[#allocation42_spill] sm:$0xff] }
 0x278   : > { %v2509_v39 = vsel %vm1874_vm1, %v9390_v34, %v9388_v37  ;;  %v9394_v53 = vrot.slane %v9393_v25, 1  ;;  %v9395_v12 = vrot.slane %v7074_v33, 1  ;;  %v2350_v19 = vmul.f32 %v5345_v59, %v9396_v18  ;;  %3474 = vrot.lane.b32.xlu1 %v3409_v38, %s4660_s30  ;;  %v9404_v38 = vld [vmem:[#allocation131_spill] sm:$0xff] }
 0x279   : > { %v3065_v51 = vsel %vm1874_vm1, %v9392_v5, %v9391_v36  ;;  %v2262_v35 = vadd.f32 %v2197_v4, %v2017_v47  ;;  %v9397_v17 = vrot.slane %v7174_v7, 2  ;;  %v9398_v31 = vrot.slane %v7126_v15, 2  ;;  %v9403_v47 = vld [vmem:[#allocation82_spill] sm:$0xff]  ;;  %v9405_v5 = vld [vmem:[#allocation88_spill] sm:$0xff] }
 0x27a   : > { %v1899_v22 = vsel %vm1874_vm1, %v9395_v12, %v9394_v53  ;;  %v1751_v29 = vadd.f32 %v7621_v44, %v1719_v61  ;;  %v2594_v23 = vmul.f32 %v5362_v14, %v9396_v18  ;;  %v3349_v33 = vadd.f32 %v3246_v56, %v3105_v43  ;;  %v9406_v56 = vld [vmem:[#allocation130_spill] sm:$0xff] }
 0x27b   : > { %v3309_v46 = vsel %vm2119_vm2, %v9398_v31, %v9397_v17  ;;  %v9400_v9 = vrot.slane %v9399_v49, 2  ;;  %v9402_v21 = vrot.slane %v9401_v13, 2  ;;  %v2455_v10 = vrot.slane %v2350_v19, 1  ;;  %v9408_v19 = vld [vmem:[#allocation12_spill] sm:$0xff]  ;;  %v9409_v17 = vld [vmem:[#allocation62_spill] sm:$0xff] }
 0x27c   : > { %v2906_v34 = vmul.f32 %v5455_v27, %v9403_v47  ;;  %v2330_v15 = vadd.f32 %v9404_v38, %v2262_v35  ;;  %v1996_v36 = vadd.f32 %v1899_v22, %v1751_v29  ;;  %v2277_v61 = vmul.f32 %v5440_v62, %v9405_v5 }
 0x27d   : > { %v2144_v37 = vsel %vm2119_vm2, %v9402_v21, %v9400_v9  ;;  %v2699_v4 = vrot.slane %v2594_v23, 2  ;;  %v3381_v25 = vmax.f32 %v3349_v33, 0.0  ;;  %v9407_v43 = vrot.slane %v9406_v56, 2  ;;  %v9410_v33 = vld [vmem:[#allocation38_spill] sm:$0xff] }
 0x27e   : > { %v3150_v12 = vmul.f32 %v7570_v32, %v9403_v47  ;;  %v2235_v31 = vadd.f32 %v9409_v17, %v9408_v19  ;;  %v2574_v49 = vadd.f32 %v2509_v39, %v2330_v15  ;;  %v2241_v35 = vadd.f32 %v2144_v37, %v1996_v36  ;;  %v9412_v19 = vld [vmem:[#allocation53_spill] sm:$0xff] }
 0x27f   : > { %v2753_v53 = vsel %vm2119_vm2, %v9407_v43, %v2752_v41  ;;  %v2833_v22 = vmul.f32 %v5452_v8, %v6061_v55  ;;  %v3011_v29 = vrot.slane %v2906_v34, 1  ;;  %v3413_v23 = vmin.f32 %v3381_v25, 6.0  ;;  %v9414_v25 = vld [vmem:[#allocation43_spill] sm:$0xff] }
 0x280   : > { %v9411_v9 = vrot.slane %v9410_v33, 1  ;;  %v2271_v21 = vmul.f32 %v5440_v62, %v9259_v42  ;;  %v2341_v38 = vmul.f32 %v5345_v59, %v9364_v54  ;;  %v2818_v56 = vadd.f32 %v2753_v53, %v2574_v49  ;;  %v9415_v53 = vld [vmem:[#allocation54_spill] sm:$0xff] }
 0x281   : > { %v2309_v43 = vadd.f32 %v2277_v61, %v2241_v35  ;;  %v9413_v39 = vrot.slane %v9412_v19, 2  ;;  %v2585_v34 = vmul.f32 %v5362_v14, %v9364_v54  ;;  %3482 = vrot.lane.b32.xlu1 %v3413_v23, %s4660_s30  ;;  %v3255_v15 = vrot.slane %v3150_v12, 2 }
 0x282   : > { %v2456_v13 = vsel %vm1874_vm1, %v9411_v9, %v2455_v10  ;;  %v2303_v36 = vadd.f32 %v2271_v21, %v2235_v31  ;;  %v2440_v10 = vrot.slane %v2341_v38, 1  ;;  %v2897_v42 = vmul.f32 %v5455_v27, %v9372_v63 }
 0x283   : > { %v2700_v37 = vsel %vm2119_vm2, %v9413_v39, %v2699_v4  ;;  %v2886_v17 = vadd.f32 %v9414_v25, %v2818_v56  ;;  %v2553_v33 = vadd.f32 %v2456_v13, %v2309_v43  ;;  %v9416_v61 = vrot.slane %v9415_v53, 1  ;;  %v9417_v4 = vld [vmem:[#allocation91_spill] sm:$0xff]  ;;  %v9419_v13 = vld [vmem:[#allocation85_spill] sm:$0xff]  ;;  %v9422_v39 = vld [vmem:[#allocation10_spill] sm:$0xff] }
 0x284   : > { %v2684_v35 = vrot.slane %v2585_v34, 2  ;;  %v9418_v9 = vrot.slane %v9417_v4, 1  ;;  %v2996_v19 = vrot.slane %v2897_v42, 1  ;;  %v3141_v12 = vmul.f32 %v7570_v32, %v9372_v63  ;;  %v9424_v42 = vld [vmem:[#allocation92_spill] sm:$0xff] }
 0x285   : > { %v3012_v49 = vsel %vm1874_vm1, %v9416_v61, %v3011_v29  ;;  %v1723_v31 = vmul.f32 %v9021_v50, %v6061_v55  ;;  %v3130_v23 = vadd.f32 %v3065_v51, %v2886_v17  ;;  %v2797_v21 = vadd.f32 %v2700_v37, %v2553_v33  ;;  %v9426_v33 = vld [vmem:[#allocation93_spill] sm:$0xff] }
 0x286   : > { %v2441_v54 = vsel %vm1874_vm1, %v9418_v9, %v2440_v10  ;;  %v9420_v56 = vrot.slane %v9419_v13, 1  ;;  %v9421_v43 = vrot.slane %v7248_v52, 1  ;;  %v9423_v34 = vrot.slane %v9422_v39, 2  ;;  %v9429_v39 = vld [vmem:[#allocation86_spill] sm:$0xff] }
 0x287   : > { %v2547_v38 = vadd.f32 %v2441_v54, %v2303_v36  ;;  %v9425_v25 = vrot.slane %v9424_v42, 2  ;;  %v2827_v53 = vmul.f32 %v5452_v8, %v9378_v30  ;;  %v1755_v51 = vadd.f32 %v7621_v44, %v1723_v31  ;;  %v9428_v54 = vld [vmem:[#allocation87_spill] sm:$0xff]  ;;  %v9432_v42 = vld [vmem:[#allocation94_spill] sm:$0xff] }
 0x288   : > { %v1909_v29 = vsel %vm1874_vm1, %v9421_v43, %v9420_v56  ;;  %v3256_v10 = vsel %vm2119_vm2, %v9423_v34, %v3255_v15  ;;  %v3374_v37 = vadd.f32 %v3309_v46, %v3130_v23  ;;  %v2865_v36 = vadd.f32 %v2833_v22, %v2797_v21 }
 0x289   : > { %v2685_v63 = vsel %vm2119_vm2, %v9425_v25, %v2684_v35  ;;  %v9427_v52 = vrot.slane %v9426_v33, 1  ;;  %v3240_v4 = vrot.slane %v3141_v12, 2  ;;  %v2000_v9 = vadd.f32 %v1909_v29, %v1755_v51  ;;  %v9436_v33 = vld [vmem:[#allocation168_spill] sm:$0xff] }
 0x28a   : > { %v2791_v17 = vadd.f32 %v2685_v63, %v2547_v38  ;;  %v2356_v15 = vmul.f32 %v5345_v59, %v9428_v54  ;;  %v2600_v35 = vmul.f32 %v5362_v14, %v9428_v54  ;;  %v3406_v13 = vmax.f32 %v3374_v37, 0.0 }
 0x28b   : > { %v2997_v61 = vsel %vm1874_vm1, %v9427_v52, %v2996_v19  ;;  %v3109_v56 = vadd.f32 %v3012_v49, %v2865_v36  ;;  %v9430_v31 = vrot.slane %v9429_v39, 2  ;;  %v9431_v46 = vrot.slane %v7257_v11, 2  ;;  %v9433_v49 = vld [vmem:[#allocation76_spill] sm:$0xff]  ;;  %v9441_v39 = vld [vmem:[#allocation98_spill] sm:$0xff] }
 0x28c   : > { %v2859_v43 = vadd.f32 %v2827_v53, %v2791_v17  ;;  %v2281_v19 = vmul.f32 %v5440_v62, %v6144_v40  ;;  %v2465_v12 = vrot.slane %v2356_v15, 1  ;;  %v2709_v21 = vrot.slane %v2600_v35, 2  ;;  %v9434_v53 = vld [vmem:[#allocation50_spill] sm:$0xff] }
 0x28d   : > { %v2154_v22 = vsel %vm2119_vm2, %v9431_v46, %v9430_v31  ;;  %v3438_v38 = vmin.f32 %v3406_v13, 6.0  ;;  %v3353_v29 = vadd.f32 %v3256_v10, %v3109_v56  ;;  %v2912_v25 = vmul.f32 %v5455_v27, %v9432_v42  ;;  %v9439_v56 = vld [vmem:[#allocation68_spill] sm:$0xff] }
 0x28e   : > { %v2245_v23 = vadd.f32 %v2154_v22, %v2000_v9  ;;  %v3103_v34 = vadd.f32 %v2997_v61, %v2859_v43  ;;  %v7798_v63 = vmul.f32 %v5345_v59, %v9433_v49  ;;  %v9435_v11 = vrot.slane %v9434_v53, 2 }
 0x28f   : > { %v3156_v36 = vmul.f32 %v7570_v32, %v9432_v42  ;;  %3532 = vrot.lane.b32.xlu0 %v3438_v38, %s4660_s30  ;;  %v3385_v17 = vmax.f32 %v3353_v29, 0.0  ;;  %v9437_v52 = vrot.slane %v9436_v33, 1  ;;  %v1717_v9 = vmul.f32 %v9021_v50, %v9378_v30 }
 0x290   : > { %v3241_v51 = vsel %vm2119_vm2, %v9435_v11, %v3240_v4  ;;  %v2313_v37 = vadd.f32 %v2281_v19, %v2245_v23  ;;  %v7813_v15 = vmul.f32 %v5362_v14, %v9433_v49  ;;  %v9438_v35 = vrot.slane %v7277_v60, 2 }
 0x291   : > { %v3347_v10 = vadd.f32 %v3241_v51, %v3103_v34  ;;  %v2466_v61 = vsel %vm1874_vm1, %v9437_v52, %v2465_v12  ;;  %v9440_v43 = vrot.slane %v9439_v56, 1  ;;  %v9442_v31 = vrot.slane %v9441_v39, 1  ;;  %v9443_v51 = vld [vmem:[#allocation69_spill] sm:$0xff] }
 0x292   : > { %v2557_v4 = vadd.f32 %v2466_v61, %v2313_v37  ;;  %v2710_v13 = vsel %vm2119_vm2, %v9438_v35, %v2709_v21  ;;  %v3417_v22 = vmin.f32 %v3385_v17, 6.0  ;;  %v3021_v19 = vrot.slane %v2912_v25, 1  ;;  %v9445_v17 = vld [vmem:[#allocation99_spill] sm:$0xff] }
 0x293   : > { %v1894_v46 = vsel %vm1874_vm1, %v9442_v31, %v9440_v43  ;;  %v3379_v23 = vmax.f32 %v3347_v10, 0.0  ;;  %v1749_v30 = vadd.f32 %v7621_v44, %v1717_v9  ;;  %v2837_v38 = vmul.f32 %v5452_v8, %v6327_v0 }
 0x294   : > { %v2801_v12 = vadd.f32 %v2710_v13, %v2557_v4  ;;  %v2347_v60 = vmul.f32 %v5345_v59, %v9381_v20  ;;  %v2591_v21 = vmul.f32 %v5362_v14, %v9381_v20  ;;  %3490 = vrot.lane.b32.xlu1 %v3417_v22, %s4660_s30  ;;  %v3265_v34 = vrot.slane %v3156_v36, 2 }
 0x295   : > { %v3411_v29 = vmin.f32 %v3379_v23, 6.0  ;;  %v1994_v53 = vadd.f32 %v1894_v46, %v1749_v30  ;;  %v2903_v25 = vmul.f32 %v5455_v27, %v9396_v18  ;;  %v9444_v37 = vrot.slane %v9443_v51, 2  ;;  %v9456_v51 = vld [vmem:[#allocation112_spill] sm:$0xff] }
 0x296   : > { %v2869_v11 = vadd.f32 %v2837_v38, %v2801_v12  ;;  %v9446_v10 = vrot.slane %v9445_v17, 2  ;;  %v2450_v52 = vrot.slane %v2347_v60, 1  ;;  %v3147_v61 = vmul.f32 %v7570_v32, %v9396_v18  ;;  %v9452_v60 = vld [vmem:[#allocation96_spill] sm:$0xff] }
 0x297   : > { %3478 = vrot.lane.b32.xlu0 %v3411_v29, %s4660_s30  ;;  %v9447_v20 = vrot.slane %v7292_v45, 1  ;;  %v2275_v4 = vmul.f32 %v5440_v62, %v9290_v2  ;;  %v1727_v35 = vmul.f32 %v9021_v50, %v6327_v0  ;;  %v7850_v13 = vmul.f32 %v5455_v27, %v9433_v49  ;;  %v9448_v45 = vld [vmem:[#allocation169_spill] sm:$0xff]  ;;  %v9454_v29 = vld [vmem:[#allocation170_spill] sm:$0xff] }
 0x298   : > { %v2139_v33 = vsel %vm2119_vm2, %v9446_v10, %v9444_v37  ;;  %v2694_v43 = vrot.slane %v2591_v21, 2  ;;  %v3006_v18 = vrot.slane %v2903_v25, 1  ;;  %v7854_v39 = vmul.f32 %v7570_v32, %v9433_v49  ;;  %v9457_v10 = vld [vmem:[#allocation101_spill] sm:$0xff] }
 0x299   : > { %v3022_v36 = vsel %vm1874_vm1, %v9447_v20, %v3021_v19  ;;  %v2239_v9 = vadd.f32 %v2139_v33, %v1994_v53  ;;  %v9449_v31 = vrot.slane %v9448_v45, 2  ;;  %v1759_v2 = vadd.f32 %v7621_v44, %v1727_v35  ;;  %v9450_v19 = vld [vmem:[#allocation100_spill] sm:$0xff]  ;;  %v9463_v35 = vld [vmem:[#allocation171_spill] sm:$0xff] }
 0x29a   : > { %v3113_v56 = vadd.f32 %v3022_v36, %v2869_v11  ;;  %v9451_v30 = vrot.slane %v9450_v19, 1  ;;  %v3250_v38 = vrot.slane %v3147_v61, 2  ;;  %v9453_v21 = vrot.slane %v9452_v60, 1  ;;  %v9459_v61 = vld [vmem:[#allocation102_spill] sm:$0xff] }
 0x29b   : > { %v3266_v46 = vsel %vm2119_vm2, %v9449_v31, %v3265_v34  ;;  %v2307_v22 = vadd.f32 %v2275_v4, %v2239_v9  ;;  %v9455_v53 = vrot.slane %v9454_v29, 1  ;;  %v2831_v11 = vmul.f32 %v5452_v8, %v9405_v5  ;;  %v9461_v9 = vld [vmem:[#allocation97_spill] sm:$0xff] }
 0x29c   : > { %v3357_v23 = vadd.f32 %v3266_v46, %v3113_v56  ;;  %v2451_v12 = vsel %vm1874_vm1, %v9451_v30, %v2450_v52  ;;  %v2285_v37 = vmul.f32 %v5440_v62, %v9456_v51  ;;  %v9458_v33 = vrot.slane %v9457_v10, 2 }
 0x29d   : > { %v1919_v49 = vsel %vm1874_vm1, %v9455_v53, %v9453_v21  ;;  %v2551_v25 = vadd.f32 %v2451_v12, %v2307_v22  ;;  %v9460_v20 = vrot.slane %v9459_v61, 1  ;;  %v9462_v4 = vrot.slane %v9461_v9, 2  ;;  %v9465_v22 = vld [vmem:[#allocation5_spill] sm:$0xff]  ;;  %v9470_v21 = vld [vmem:[#allocation172_spill] sm:$0xff] }
 0x29e   : > { %v2004_v34 = vadd.f32 %v1919_v49, %v1759_v2  ;;  %v3389_v17 = vmax.f32 %v3357_v23, 0.0  ;;  %v2695_v52 = vsel %vm2119_vm2, %v9458_v33, %v2694_v43  ;;  %v9464_v56 = vrot.slane %v9463_v35, 2  ;;  %v9466_v43 = vld [vmem:[#allocation103_spill] sm:$0xff]  ;;  %v9472_v49 = vld [vmem:[#allocation13_spill] sm:$0xff] }
 0x29f   : > { %v3007_v36 = vsel %vm1874_vm1, %v9460_v20, %v3006_v18  ;;  %v2795_v31 = vadd.f32 %v2695_v52, %v2551_v25  ;;  %v2918_v2 = vmul.f32 %v5455_v27, %v9465_v22  ;;  %v1721_v23 = vmul.f32 %v9021_v50, %v9405_v5  ;;  %v9468_v18 = vld [vmem:[#allocation111_spill] sm:$0xff]  ;;  %v9476_v5 = vld [vmem:[#allocation113_spill] sm:$0xff] }
 0x2a0   : > { %v2164_v45 = vsel %vm2119_vm2, %v9464_v56, %v9462_v4  ;;  %v3421_v19 = vmin.f32 %v3389_v17, 6.0  ;;  %v9467_v30 = vrot.slane %v9466_v43, 2  ;;  %v9469_v60 = vrot.slane %v9468_v18, 1  ;;  %v9478_v20 = vld [vmem:[#allocation173_spill] sm:$0xff]  ;;  %v9482_v18 = vld [vmem:[#allocation104_spill] sm:$0xff] }
 0x2a1   : > { %v2249_v46 = vadd.f32 %v2164_v45, %v2004_v34  ;;  %v9471_v29 = vrot.slane %v9470_v21, 1  ;;  %v9473_v25 = vrot.slane %v9472_v49, 1  ;;  %v9474_v34 = vld [vmem:[#allocation14_spill] sm:$0xff]  ;;  %v2863_v52 = vadd.f32 %v2831_v11, %v2795_v31 }
 0x2a2   : > { %v3251_v12 = vsel %vm2119_vm2, %v9467_v30, %v3250_v38  ;;  %v9475_v10 = vrot.slane %v9474_v34, 1  ;;  %v9477_v17 = vrot.slane %v9476_v5, 2  ;;  %v9479_v9 = vrot.slane %v9478_v20, 2  ;;  %3498 = vrot.lane.b32.xlu1 %v3421_v19, %s4660_s30  ;;  %v9480_v30 = vld [vmem:[#allocation83_spill] sm:$0xff]  ;;  %v9486_v20 = vld [vmem:[#allocation105_spill] sm:$0xff] }
 0x2a3   : > { %v2476_v53 = vsel %vm1874_vm1, %v9471_v29, %v9469_v60  ;;  %v2317_v61 = vadd.f32 %v2285_v37, %v2249_v46  ;;  %v1753_v4 = vadd.f32 %v7621_v44, %v1721_v23  ;;  %v2841_v35 = vmul.f32 %v5452_v8, %v9326_v1  ;;  %v9484_v5 = vld [vmem:[#allocation23_spill] sm:$0xff] }
 0x2a4   : > { %v1904_v33 = vsel %vm1874_vm1, %v9475_v10, %v9473_v25  ;;  %v2720_v38 = vsel %vm2119_vm2, %v9479_v9, %v9477_v17  ;;  %v3162_v56 = vmul.f32 %v7570_v32, %v9465_v22  ;;  %v2353_v11 = vmul.f32 %v5345_v59, %v9403_v47 }
 0x2a5   : > { %v2597_v37 = vmul.f32 %v5362_v14, %v9403_v47  ;;  %v3107_v45 = vadd.f32 %v3007_v36, %v2863_v52  ;;  %v2561_v31 = vadd.f32 %v2476_v53, %v2317_v61  ;;  %v3031_v46 = vrot.slane %v2918_v2, 1 }
 0x2a6   : > { %v1998_v43 = vadd.f32 %v1904_v33, %v1753_v4  ;;  %v9481_v23 = vrot.slane %v9480_v30, 2  ;;  %v9483_v19 = vrot.slane %v9482_v18, 2  ;;  %v2279_v21 = vmul.f32 %v5440_v62, %v6061_v55  ;;  %v9488_v4 = vld [vmem:[#allocation114_spill] sm:$0xff] }
 0x2a7   : > { %v2460_v22 = vrot.slane %v2353_v11, 1  ;;  %v2909_v29 = vmul.f32 %v5455_v27, %v9428_v54  ;;  %v3351_v49 = vadd.f32 %v3251_v12, %v3107_v45  ;;  %v2805_v25 = vadd.f32 %v2720_v38, %v2561_v31  ;;  %v9490_v11 = vld [vmem:[#allocation174_spill] sm:$0xff] }
 0x2a8   : > { %v2149_v60 = vsel %vm2119_vm2, %v9483_v19, %v9481_v23  ;;  %v3153_v36 = vmul.f32 %v7570_v32, %v9428_v54  ;;  %v2510_v2 = vrot.slane %v7798_v63, 1  ;;  %v3275_v53 = vrot.slane %v3162_v56, 2  ;;  %v9492_v23 = vld [vmem:[#allocation116_spill] sm:$0xff]  ;;  %v9494_v19 = vld [vmem:[#allocation107_spill] sm:$0xff] }
 0x2a9   : > { %v2243_v47 = vadd.f32 %v2149_v60, %v1998_v43  ;;  %v2704_v34 = vrot.slane %v2597_v37, 2  ;;  %v1731_v10 = vmul.f32 %v9021_v50, %v9326_v1  ;;  %v3383_v33 = vmax.f32 %v3351_v49, 0.0 }
 0x2aa   : > { %v2873_v52 = vadd.f32 %v2841_v35, %v2805_v25  ;;  %v3016_v61 = vrot.slane %v2909_v29, 1  ;;  %v9485_v17 = vrot.slane %v9484_v5, 1  ;;  %v9487_v9 = vrot.slane %v9486_v20, 1  ;;  %v9503_v20 = vld [vmem:[#allocation128_spill] sm:$0xff] }
 0x2ab   : > { %v2311_v55 = vadd.f32 %v2279_v21, %v2243_v47  ;;  %v1763_v54 = vadd.f32 %v7621_v44, %v1731_v10  ;;  %v9489_v56 = vrot.slane %v9488_v4, 1  ;;  %v9491_v37 = vrot.slane %v9490_v11, 1  ;;  %v9496_v47 = vld [vmem:[#allocation108_spill] sm:$0xff] }
 0x2ac   : > { %v3032_v12 = vsel %vm1874_vm1, %v9485_v17, %v3031_v46  ;;  %v2461_v38 = vsel %vm1874_vm1, %v9487_v9, %v2460_v22  ;;  %v3415_v31 = vmin.f32 %v3383_v33, 6.0  ;;  %v3260_v30 = vrot.slane %v3153_v36, 2  ;;  %v9498_v33 = vld [vmem:[#allocation118_spill] sm:$0xff] }
 0x2ad   : > { %v1929_v45 = vsel %vm1874_vm1, %v9491_v37, %v9489_v56  ;;  %v3117_v35 = vadd.f32 %v3032_v12, %v2873_v52  ;;  %v2555_v43 = vadd.f32 %v2461_v38, %v2311_v55  ;;  %v9493_v18 = vrot.slane %v9492_v23, 2  ;;  %v9500_v55 = vld [vmem:[#allocation175_spill] sm:$0xff]  ;;  %v9504_v56 = vld [vmem:[#allocation109_spill] sm:$0xff] }
 0x2ae   : > { %v9495_v60 = vrot.slane %v9494_v19, 2  ;;  %v2835_v22 = vmul.f32 %v5452_v8, %v6144_v40  ;;  %v2008_v29 = vadd.f32 %v1929_v45, %v1763_v54  ;;  %3486 = vrot.lane.b32.xlu0 %v3415_v31, %s4660_s30  ;;  %v9497_v10 = vrot.slane %v9496_v47, 1  ;;  %v9506_v37 = vld [vmem:[#allocation89_spill] sm:$0xff] }
 0x2af   : > { %v3276_v46 = vsel %vm2119_vm2, %v9493_v18, %v3275_v53  ;;  %v9499_v52 = vrot.slane %v9498_v33, 2  ;;  %v9501_v53 = vrot.slane %v9500_v55, 2  ;;  %v2924_v9 = vmul.f32 %v5455_v27, %v9503_v20  ;;  %v9508_v31 = vld [vmem:[#allocation137_spill] sm:$0xff]  ;;  %v9510_v18 = vld [vmem:[#allocation123_spill] sm:$0xff] }
 0x2b0   : > { %v2705_v21 = vsel %vm2119_vm2, %v9495_v60, %v2704_v34  ;;  %v3361_v49 = vadd.f32 %v3276_v46, %v3117_v35  ;;  %v3017_v36 = vsel %vm1874_vm1, %v9497_v10, %v3016_v61  ;;  %v9502_v34 = vld [vmem:[#allocation127_spill] sm:$0xff]  ;;  %v1725_v38 = vmul.f32 %v9021_v50, %v6144_v40  ;;  %v9512_v19 = vld [vmem:[#allocation17_spill] sm:$0xff] }
 0x2b1   : > { %v2799_v25 = vadd.f32 %v2705_v21, %v2555_v43  ;;  %v2174_v5 = vsel %vm2119_vm2, %v9501_v53, %v9499_v52  ;;  %v2289_v12 = vmul.f32 %v5440_v62, %v9502_v34  ;;  %v9505_v61 = vrot.slane %v9504_v56, 2  ;;  %v9514_v40 = vld [vmem:[#allocation125_spill] sm:$0xff]  ;;  %v9518_v56 = vld [vmem:[#allocation48_spill] sm:$0xff] }
 0x2b2   : > { %v2253_v17 = vadd.f32 %v2174_v5, %v2008_v29  ;;  %v3393_v54 = vmax.f32 %v3361_v49, 0.0  ;;  %v9507_v45 = vrot.slane %v9506_v37, 1  ;;  %v9509_v35 = vrot.slane %v9508_v31, 1 }
 0x2b3   : > { %v2867_v4 = vadd.f32 %v2835_v22, %v2799_v25  ;;  %v3261_v11 = vsel %vm2119_vm2, %v9505_v61, %v3260_v30  ;;  %v9511_v46 = vrot.slane %v9510_v18, 1  ;;  %v9513_v60 = vrot.slane %v9512_v19, 1  ;;  %v9516_v22 = vld [vmem:[#allocation176_spill] sm:$0xff] }
 0x2b4   : > { %v1914_v43 = vsel %vm1874_vm1, %v9509_v35, %v9507_v45  ;;  %v2321_v23 = vadd.f32 %v2289_v12, %v2253_v17  ;;  %v9515_v29 = vrot.slane %v9514_v40, 2  ;;  %v9517_v49 = vrot.slane %v9516_v22, 2  ;;  %v9523_v45 = vld [vmem:[#allocation40_spill] sm:$0xff] }
 0x2b5   : > { %v2486_v21 = vsel %vm1874_vm1, %v9513_v60, %v9511_v46  ;;  %v1757_v30 = vadd.f32 %v7621_v44, %v1725_v38  ;;  %v3425_v47 = vmin.f32 %v3393_v54, 6.0  ;;  %v3111_v10 = vadd.f32 %v3017_v36, %v2867_v4  ;;  %v9520_v38 = vld [vmem:[#allocation139_spill] sm:$0xff]  ;;  %v9524_v46 = vld [vmem:[#allocation29_spill] sm:$0xff] }
 0x2b6   : > { %v2730_v25 = vsel %vm2119_vm2, %v9517_v49, %v9515_v29  ;;  %v3168_v33 = vmul.f32 %v7570_v32, %v9503_v20  ;;  %v2359_v52 = vmul.f32 %v5345_v59, %v9432_v42  ;;  %v2565_v55 = vadd.f32 %v2486_v21, %v2321_v23  ;;  %v9522_v20 = vld [vmem:[#allocation56_spill] sm:$0xff] }
 0x2b7   : > { %v3041_v53 = vrot.slane %v2924_v9, 1  ;;  %v2002_v5 = vadd.f32 %v1914_v43, %v1757_v30  ;;  %v2603_v17 = vmul.f32 %v5362_v14, %v9432_v42  ;;  %3506 = vrot.lane.b32.xlu1 %v3425_v47, %s4660_s30  ;;  %v3355_v12 = vadd.f32 %v3261_v11, %v3111_v10  ;;  %v9526_v29 = vld [vmem:[#allocation140_spill] sm:$0xff]  ;;  %v9528_v30 = vld [vmem:[#allocation6_spill] sm:$0xff] }
 0x2b8   : > { %v9519_v61 = vrot.slane %v9518_v56, 2  ;;  %v9521_v54 = vrot.slane %v9520_v38, 2  ;;  %v2470_v4 = vrot.slane %v2359_v52, 1  ;;  %v2915_v37 = vmul.f32 %v5455_v27, %v9522_v20  ;;  %v9532_v56 = vld [vmem:[#allocation150_spill] sm:$0xff] }
 0x2b9   : > { %v2809_v59 = vadd.f32 %v2730_v25, %v2565_v55  ;;  %v2845_v9 = vmul.f32 %v5452_v8, %v9523_v45  ;;  %v2283_v14 = vmul.f32 %v5440_v62, %v6327_v0  ;;  %v2754_v42 = vrot.slane %v7813_v15, 2 }
 0x2ba   : > { %v2159_v36 = vsel %vm2119_vm2, %v9521_v54, %v9519_v61  ;;  %v3387_v11 = vmax.f32 %v3355_v12, 0.0  ;;  %v3285_v35 = vrot.slane %v3168_v33, 2  ;;  %v2714_v43 = vrot.slane %v2603_v17, 2 }
 0x2bb   : > { %v2247_v31 = vadd.f32 %v2159_v36, %v2002_v5  ;;  %v3061_v23 = vrot.slane %v7850_v13, 1  ;;  %v2877_v18 = vadd.f32 %v2845_v9, %v2809_v59  ;;  %v9525_v19 = vrot.slane %v9524_v46, 1  ;;  %v9530_v5 = vld [vmem:[#allocation177_spill] sm:$0xff]  ;;  %v9535_v59 = vld [vmem:[#allocation132_spill] sm:$0xff] }
 0x2bc   : > { %v3419_v40 = vmin.f32 %v3387_v11, 6.0  ;;  %v9527_v22 = vrot.slane %v9526_v29, 1  ;;  %v3026_v25 = vrot.slane %v2915_v37, 1  ;;  %v3159_v0 = vmul.f32 %v7570_v32, %v9522_v20  ;;  %v9534_v36 = vld [vmem:[#allocation61_spill] sm:$0xff] }
 0x2bd   : > { %v3042_v60 = vsel %vm1874_vm1, %v9525_v19, %v3041_v53  ;;  %v2315_v21 = vadd.f32 %v2283_v14, %v2247_v31  ;;  %v9529_v47 = vrot.slane %v9528_v30, 7  ;;  %v2839_v55 = vmul.f32 %v5452_v8, %v9456_v51  ;;  %v3477_v53 = vpop.permute.xlu0 %3476  ;;  %v9537_v31 = vld [vmem:[#allocation178_spill] sm:$0xff] }
 0x2be   : > { %v2471_v49 = vsel %vm1874_vm1, %v9527_v22, %v2470_v4  ;;  %v3121_v33 = vadd.f32 %v3042_v60, %v2877_v18  ;;  %3494 = vrot.lane.b32.xlu0 %v3419_v40, %s4660_s30  ;;  %v9531_v17 = vrot.slane %v9530_v5, 2  ;;  %v9533_v61 = vrot.slane %v9532_v56, 2  ;;  %v9539_v18 = vld [vmem:[#allocation154_spill] sm:$0xff]  ;;  %v9541_v40 = vld [vmem:[#allocation45_spill] sm:$0xff]  ;;  %v9544_v5 = vld [vmem:[#allocation179_spill] sm:$0xff] }
 0x2bf   : > { %v1695_v10 = vsel %vm1551_vm0, %v9529_v47, 0.0  ;;  %v2559_v52 = vadd.f32 %v2471_v49, %v2315_v21  ;;  %v1735_v54 = vmul.f32 %v9021_v50, %v9523_v45  ;;  %v8027_v4 = vmul.f32 %v5452_v8, %v9534_v36 }
 0x2c0   : > { %v3286_v12 = vsel %vm2119_vm2, %v9531_v17, %v3285_v35  ;;  %v2715_v38 = vsel %vm2119_vm2, %v9533_v61, %v2714_v43  ;;  %v9536_v9 = vrot.slane %v9535_v59, 1  ;;  %v9538_v14 = vrot.slane %v9537_v31, 1  ;;  %v9550_v59 = vld [vmem:[#allocation28_spill] sm:$0xff] }
 0x2c1   : > { %v3365_v20 = vadd.f32 %v3286_v12, %v3121_v33  ;;  %v2803_v37 = vadd.f32 %v2715_v38, %v2559_v52  ;;  %v8035_v35 = vmul.f32 %v5455_v27, %v1695_v10  ;;  %v9540_v43 = vrot.slane %v9539_v18, 1  ;;  %v3485_v30 = vpop.permute.xlu0 %3484  ;;  %v9542_v33 = vld [vmem:[#allocation133_spill] sm:$0xff]  ;;  %v9552_v31 = vld [vmem:[#allocation156_spill] sm:$0xff] }
 0x2c2   : > { %v1939_v11 = vsel %vm1874_vm1, %v9538_v14, %v9536_v9  ;;  %v3270_v19 = vrot.slane %v3159_v0, 2  ;;  %v1767_v60 = vadd.f32 %v7621_v44, %v1735_v54  ;;  %v8042_v21 = vmul.f32 %v7570_v32, %v1695_v10  ;;  %v9546_v0 = vld [vmem:[#allocation146_spill] sm:$0xff] }
 0x2c3   : > { %v3027_v46 = vsel %vm1874_vm1, %v9540_v43, %v3026_v25  ;;  %v8046_v29 = vsel %vm3568_vm3, %v9541_v40, %v3477_v53  ;;  %v3397_v22 = vmax.f32 %v3365_v20, 0.0  ;;  %v2871_v49 = vadd.f32 %v2839_v55, %v2803_v37  ;;  %v9547_v55 = vld [vmem:[#allocation155_spill] sm:$0xff]  ;;  %v9549_v20 = vld [vmem:[#allocation145_spill] sm:$0xff] }
 0x2c4   : > { %v2012_v47 = vadd.f32 %v1939_v11, %v1767_v60  ;;  %v9543_v52 = vrot.slane %v9542_v33, 2  ;;  %v9545_v17 = vrot.slane %v9544_v5, 2  ;;  %v2930_v12 = vmul.f32 %v5455_v27, %v9546_v0  ;;  %v9559_v5 = vld [vmem:[#allocation144_spill] sm:$0xff] }
 0x2c5   : > { %v3429_v56 = vmin.f32 %v3397_v22, 6.0  ;;  %v3115_v10 = vadd.f32 %v3027_v46, %v2871_v49  ;;  %v3174_v61 = vmul.f32 %v7570_v32, %v9546_v0  ;;  %v1729_v53 = vmul.f32 %v9021_v50, %v9456_v51  ;;  %v9554_v51 = vld [vmem:[#allocation72_spill] sm:$0xff]  ;;  %v9555_v22 = vld [vmem:[#allocation143_spill] sm:$0xff] }
 0x2c6   : > { %v2184_v25 = vsel %vm2119_vm2, %v9545_v17, %v9543_v52  ;;  %v9548_v38 = vrot.slane %v9547_v55, 2  ;;  %v2293_v37 = vmul.f32 %v5440_v62, %v9549_v20  ;;  %v9551_v9 = vrot.slane %v9550_v59, 1 }
 0x2c7   : > { %v2257_v36 = vadd.f32 %v2184_v25, %v2012_v47  ;;  %v9553_v14 = vrot.slane %v9552_v31, 1  ;;  %3514 = vrot.lane.b32.xlu1 %v3429_v56, %s4660_s30  ;;  %v4661_v43 = vmov 1983009808   ;;  %v8074_v60 = vsel %vm3568_vm3, %v9554_v51, %v3485_v30  ;;  %v9557_v47 = vld [vmem:[#allocation180_spill] sm:$0xff]  ;;  %v9561_v25 = vld [vmem:[#allocation181_spill] sm:$0xff]  ;;  %v9568_v51 = vld [vmem:[#allocation147_spill] sm:$0xff] }
 0x2c8   : > { %v3271_v54 = vsel %vm2119_vm2, %v9548_v38, %v3270_v19  ;;  %v8070_v46 = vunpack.c.l.s4 %v4661_v43  ;;  %v1761_v19 = vadd.f32 %v7621_v44, %v1729_v53  ;;  %v9556_v49 = vrot.slane %v9555_v22, 1 }
 0x2c9   : > { %v1924_v11 = vsel %vm1874_vm1, %v9553_v14, %v9551_v9  ;;  %v3359_v18 = vadd.f32 %v3271_v54, %v3115_v10  ;;  %v2325_v40 = vadd.f32 %v2293_v37, %v2257_v36  ;;  %v9558_v33 = vrot.slane %v9557_v47, 1  ;;  %v9563_v54 = vld [vmem:[#allocation117_spill] sm:$0xff]  ;;  %v9564_v37 = vld [vmem:[#allocation110_spill] sm:$0xff] }
 0x2ca   : > { %v9560_v17 = vrot.slane %v9559_v5, 2  ;;  %v9562_v0 = vrot.slane %v9561_v25, 2  ;;  %v3051_v10 = vrot.slane %v2930_v12, 1  ;;  %v3295_v38 = vrot.slane %v3174_v61, 2  ;;  %v9566_v9 = vld [vmem:[#allocation157_spill] sm:$0xff]  ;;  %v9573_v5 = vld [vmem:[#allocation182_spill] sm:$0xff] }
 0x2cb   : > { %v2496_v52 = vsel %vm1874_vm1, %v9558_v33, %v9556_v49  ;;  %v3391_v55 = vmax.f32 %v3359_v18, 0.0  ;;  %v2006_v30 = vadd.f32 %v1924_v11, %v1761_v19  ;;  %v2921_v53 = vmul.f32 %v5455_v27, %v9563_v54  ;;  %v9569_v11 = vld [vmem:[#allocation149_spill] sm:$0xff] }
 0x2cc   : > { %v2740_v56 = vsel %vm2119_vm2, %v9562_v0, %v9560_v17  ;;  %v2569_v36 = vadd.f32 %v2496_v52, %v2325_v40  ;;  %v9565_v59 = vrot.slane %v9564_v37, 2  ;;  %v9567_v31 = vrot.slane %v9566_v9, 2  ;;  %v9571_v40 = vld [vmem:[#allocation184_spill] sm:$0xff]  ;;  %v9577_v37 = vld [vmem:[#allocation119_spill] sm:$0xff]  ;;  %v9579_v9 = vld [vmem:[#allocation158_spill] sm:$0xff] }
 0x2cd   : > { %v3165_v43 = vmul.f32 %v7570_v32, %v9563_v54  ;;  %v1739_v22 = vmul.f32 %v9021_v50, %v9568_v51  ;;  %v3423_v12 = vmin.f32 %v3391_v55, 6.0  ;;  %v2287_v61 = vmul.f32 %v5440_v62, %v9326_v1  ;;  %v9575_v55 = vld [vmem:[#allocation183_spill] sm:$0xff] }
 0x2ce   : > { %v2169_v14 = vsel %vm2119_vm2, %v9567_v31, %v9565_v59  ;;  %v9570_v19 = vrot.slane %v9569_v11, 1  ;;  %v9572_v49 = vrot.slane %v9571_v40, 1  ;;  %v2813_v33 = vadd.f32 %v2740_v56, %v2569_v36  ;;  %v9581_v11 = vld [vmem:[#allocation120_spill] sm:$0xff] }
 0x2cf   : > { %v2251_v18 = vadd.f32 %v2169_v14, %v2006_v30  ;;  %v2849_v52 = vmul.f32 %v5452_v8, %v9568_v51  ;;  %v9574_v17 = vrot.slane %v9573_v5, 1  ;;  %v1771_v0 = vadd.f32 %v7621_v44, %v1739_v22  ;;  %3502 = vrot.lane.b32.xlu0 %v3423_v12, %s4660_s30 }
 0x2d0   : > { %v1949_v47 = vsel %vm1874_vm1, %v9572_v49, %v9570_v19  ;;  %v9576_v1 = vrot.slane %v9575_v55, 2  ;;  %v9578_v59 = vrot.slane %v9577_v37, 1  ;;  %v9580_v56 = vrot.slane %v9579_v9, 1 }
 0x2d1   : > { %v3052_v25 = vsel %vm1874_vm1, %v9574_v17, %v3051_v10  ;;  %v2319_v54 = vadd.f32 %v2287_v61, %v2251_v18  ;;  %v3036_v31 = vrot.slane %v2921_v53, 1  ;;  %v2881_v14 = vadd.f32 %v2849_v52, %v2813_v33  ;;  %v9583_v10 = vld [vmem:[#allocation159_spill] sm:$0xff]  ;;  %v9587_v17 = vld [vmem:[#allocation185_spill] sm:$0xff] }
 0x2d2   : > { %v3296_v30 = vsel %vm2119_vm2, %v9576_v1, %v3295_v38  ;;  %v2481_v36 = vsel %vm1874_vm1, %v9580_v56, %v9578_v59  ;;  %v9582_v19 = vrot.slane %v9581_v11, 2  ;;  %v9584_v40 = vrot.slane %v9583_v10, 2  ;;  %v9585_v18 = vld [vmem:[#allocation151_spill] sm:$0xff]  ;;  %v9593_v56 = vld [vmem:[#allocation161_spill] sm:$0xff] }
 0x2d3   : > { %v3280_v12 = vrot.slane %v3165_v43, 2  ;;  %v2016_v49 = vadd.f32 %v1949_v47, %v1771_v0  ;;  %v2563_v5 = vadd.f32 %v2481_v36, %v2319_v54  ;;  %v2843_v38 = vmul.f32 %v5452_v8, %v9502_v34  ;;  %v9589_v43 = vld [vmem:[#allocation121_spill] sm:$0xff]  ;;  %v9591_v0 = vld [vmem:[#allocation27_spill] sm:$0xff] }
 0x2d4   : > { %v2725_v22 = vsel %vm2119_vm2, %v9584_v40, %v9582_v19  ;;  %v9586_v61 = vrot.slane %v9585_v18, 2  ;;  %v9588_v55 = vrot.slane %v9587_v17, 2  ;;  %v1733_v53 = vmul.f32 %v9021_v50, %v9502_v34  ;;  %v9595_v19 = vld [vmem:[#allocation165_spill] sm:$0xff]  ;;  %v9597_v40 = vld [vmem:[#allocation186_spill] sm:$0xff] }
 0x2d5   : > { %v3125_v33 = vadd.f32 %v3052_v25, %v2881_v14  ;;  %v2297_v37 = vmul.f32 %v5440_v62, %v6818_v58  ;;  %v9590_v47 = vrot.slane %v9589_v43, 1  ;;  %v9592_v54 = vrot.slane %v9591_v0, 1  ;;  %v9599_v18 = vld [vmem:[#allocation162_spill] sm:$0xff] }
 0x2d6   : > { %v2194_v1 = vsel %vm2119_vm2, %v9588_v55, %v9586_v61  ;;  %v2807_v9 = vadd.f32 %v2725_v22, %v2563_v5  ;;  %v9594_v36 = vrot.slane %v9593_v56, 1  ;;  %v9596_v10 = vrot.slane %v9595_v19, 1  ;;  %v9603_v5 = vld [vmem:[#allocation187_spill] sm:$0xff]  ;;  %v9607_v19 = vld [vmem:[#allocation20_spill] sm:$0xff] }
 0x2d7   : > { %v2261_v52 = vadd.f32 %v2194_v1, %v2016_v49  ;;  %v1934_v59 = vsel %vm1874_vm1, %v9592_v54, %v9590_v47  ;;  %v9598_v34 = vrot.slane %v9597_v40, 1  ;;  %v1765_v14 = vadd.f32 %v7621_v44, %v1733_v53  ;;  %v9601_v1 = vld [vmem:[#allocation25_spill] sm:$0xff]  ;;  %v9609_v40 = vld [vmem:[#allocation138_spill] sm:$0xff] }
 0x2d8   : > { %v3037_v11 = vsel %vm1874_vm1, %v9594_v36, %v3036_v31  ;;  %v3369_v49 = vadd.f32 %v3296_v30, %v3125_v33  ;;  %v9600_v61 = vrot.slane %v9599_v18, 2  ;;  %v9602_v22 = vrot.slane %v9601_v1, 2  ;;  %v9605_v33 = vld [vmem:[#allocation122_spill] sm:$0xff] }
 0x2d9   : > { %v2506_v25 = vsel %vm1874_vm1, %v9598_v34, %v9596_v10  ;;  %v2329_v55 = vadd.f32 %v2297_v37, %v2261_v52  ;;  %v9604_v43 = vrot.slane %v9603_v5, 2  ;;  %v2875_v47 = vadd.f32 %v2843_v38, %v2807_v9  ;;  %v8168_v10 = vpop.permute.xlu1 %3472 }
 0x2da   : > { %v3281_v17 = vsel %vm2119_vm2, %v9600_v61, %v3280_v12  ;;  %v2853_v0 = vmul.f32 %v5452_v8, %v6848_v16  ;;  %v3305_v54 = vrot.slane %v7854_v39, 2  ;;  %v2010_v56 = vadd.f32 %v1934_v59, %v1765_v14  ;;  %v9612_v61 = vld [vmem:[#allocation84_spill] sm:$0xff] }
 0x2db   : > { %v2750_v31 = vsel %vm2119_vm2, %v9604_v43, %v9602_v22  ;;  %v3401_v53 = vmax.f32 %v3369_v49, 0.0  ;;  %v2573_v30 = vadd.f32 %v2506_v25, %v2329_v55  ;;  %v9606_v36 = vrot.slane %v9605_v33, 2  ;;  %v9610_v49 = vld [vmem:[#allocation141_spill] sm:$0xff]  ;;  %v9618_v33 = vld [vmem:[#allocation134_spill] sm:$0xff] }
 0x2dc   : > { %v9608_v12 = vrot.slane %v9607_v19, 2  ;;  %v2291_v37 = vmul.f32 %v5440_v62, %v9523_v45  ;;  %v3119_v38 = vadd.f32 %v3037_v11, %v2875_v47  ;;  %v2927_v34 = vmul.f32 %v5455_v27, %v9609_v40  ;;  %v9614_v11 = vld [vmem:[#allocation124_spill] sm:$0xff] }
 0x2dd   : > { %v1737_v39 = vmul.f32 %v9021_v50, %v9549_v20  ;;  %v3433_v59 = vmin.f32 %v3401_v53, 6.0  ;;  %v2817_v25 = vadd.f32 %v2750_v31, %v2573_v30  ;;  %v3171_v14 = vmul.f32 %v7570_v32, %v9609_v40  ;;  %v9620_v19 = vld [vmem:[#allocation24_spill] sm:$0xff] }
 0x2de   : > { %v2179_v52 = vsel %vm2119_vm2, %v9608_v12, %v9606_v36  ;;  %v9611_v18 = vrot.slane %v9610_v49, 1  ;;  %v9613_v55 = vrot.slane %v9612_v61, 1  ;;  %v3363_v1 = vadd.f32 %v3281_v17, %v3119_v38  ;;  %v9622_v12 = vld [vmem:[#allocation135_spill] sm:$0xff]  ;;  %v9624_v38 = vld [vmem:[#allocation30_spill] sm:$0xff]  ;;  %v9628_v61 = vld [vmem:[#allocation37_spill] sm:$0xff] }
 0x2df   : > { %v2255_v9 = vadd.f32 %v2179_v52, %v2010_v56  ;;  %v9615_v22 = vrot.slane %v9614_v11, 1  ;;  %v1769_v47 = vadd.f32 %v7621_v44, %v1737_v39  ;;  %3522 = vrot.lane.b32.xlu1 %v3433_v59, %s4660_s30  ;;  %v2885_v31 = vadd.f32 %v2853_v0, %v2817_v25  ;;  %v9616_v56 = vld [vmem:[#allocation188_spill] sm:$0xff]  ;;  %v9626_v49 = vld [vmem:[#allocation142_spill] sm:$0xff] }
 0x2e0   : > { %v1944_v45 = vsel %vm1874_vm1, %v9613_v55, %v9611_v18  ;;  %v9617_v53 = vrot.slane %v9616_v56, 2  ;;  %v9619_v36 = vrot.slane %v9618_v33, 1  ;;  %v9621_v17 = vrot.slane %v9620_v19, 1  ;;  %v9631_v19 = vld [vmem:[#allocation163_spill] sm:$0xff] }
 0x2e1   : > { %v3062_v5 = vsel %vm1874_vm1, %v9615_v22, %v3061_v23  ;;  %v2323_v43 = vadd.f32 %v2291_v37, %v2255_v9  ;;  %v9623_v52 = vrot.slane %v9622_v12, 2  ;;  %v9625_v23 = vrot.slane %v9624_v38, 2  ;;  %v3481_v22 = vpop.permute.xlu1 %3480  ;;  %v9635_v12 = vld [vmem:[#allocation152_spill] sm:$0xff] }
 0x2e2   : > { %v3306_v30 = vsel %vm2119_vm2, %v9617_v53, %v3305_v54  ;;  %v2491_v13 = vsel %vm1874_vm1, %v9621_v17, %v9619_v36  ;;  %v3395_v9 = vmax.f32 %v3363_v1, 0.0  ;;  %v2847_v0 = vmul.f32 %v5452_v8, %v9549_v20  ;;  %v9630_v36 = vld [vmem:[#allocation9_spill] sm:$0xff] }
 0x2e3   : > { %v2735_v37 = vsel %vm2119_vm2, %v9625_v23, %v9623_v52  ;;  %v2567_v40 = vadd.f32 %v2491_v13, %v2323_v43  ;;  %v2014_v39 = vadd.f32 %v1944_v45, %v1769_v47  ;;  %v3129_v59 = vadd.f32 %v3062_v5, %v2885_v31  ;;  %v3493_v47 = vpop.permute.xlu0 %3492  ;;  %v9637_v52 = vld [vmem:[#allocation8_spill] sm:$0xff] }
 0x2e4   : > { %v3046_v54 = vrot.slane %v2927_v34, 1  ;;  %v3290_v25 = vrot.slane %v3171_v14, 2  ;;  %v9627_v18 = vrot.slane %v9626_v49, 2  ;;  %v9629_v55 = vrot.slane %v9628_v61, 2 }
 0x2e5   : > { %v3427_v56 = vmin.f32 %v3395_v9, 6.0  ;;  %v2811_v53 = vadd.f32 %v2735_v37, %v2567_v40  ;;  %v2295_v1 = vmul.f32 %v5440_v62, %v9568_v51  ;;  %v3373_v43 = vadd.f32 %v3306_v30, %v3129_v59  ;;  %v9633_v30 = vld [vmem:[#allocation60_spill] sm:$0xff]  ;;  %v9639_v9 = vld [vmem:[#allocation73_spill] sm:$0xff]  ;;  %v9643_v59 = vld [vmem:[#allocation166_spill] sm:$0xff] }
 0x2e6   : > { %v2189_v11 = vsel %vm2119_vm2, %v9629_v55, %v9627_v18  ;;  %v2933_v20 = vmul.f32 %v5455_v27, %v9630_v36  ;;  %v3177_v34 = vmul.f32 %v7570_v32, %v9630_v36  ;;  %v1741_v14 = vmul.f32 %v9021_v50, %v6818_v58 }
 0x2e7   : > { %v2259_v33 = vadd.f32 %v2189_v11, %v2014_v39  ;;  %v3605_v45 = vunpack.c.0.s8 %v8070_v46  ;;  %3510 = vrot.lane.b32.xlu0 %v3427_v56, %s4660_s30  ;;  %v2879_v5 = vadd.f32 %v2847_v0, %v2811_v53  ;;  %v9632_v17 = vrot.slane %v9631_v19, 1  ;;  %v3489_v56 = vpop.permute.xlu1 %3488  ;;  %v3501_v36 = vpop.permute.xlu0 %3500  ;;  %v9648_v19 = vld [vmem:[#allocation79_spill] sm:$0xff] }
 0x2e8   : > { %v3405_v27 = vmax.f32 %v3373_v43, 0.0  ;;  %v9634_v13 = vrot.slane %v9633_v30, 1  ;;  %v9636_v50 = vrot.slane %v9635_v12, 1  ;;  %v9638_v46 = vrot.slane %v9637_v52, 1  ;;  %v9653_v12 = vld [vmem:[#allocation95_spill] sm:$0xff] }
 0x2e9   : > { %v2327_v31 = vadd.f32 %v2295_v1, %v2259_v33  ;;  %v1954_v51 = vsel %vm1874_vm1, %v1951_v24, %v9632_v17  ;;  %v1773_v23 = vadd.f32 %v7621_v44, %v1741_v14  ;;  %v9640_v40 = vrot.slane %v9639_v9, 2  ;;  %v9641_v24 = vld [vmem:[#allocation153_spill] sm:$0xff]  ;;  %v9645_v1 = vld [vmem:[#allocation164_spill] sm:$0xff]  ;;  %v9656_v9 = vld [vmem:[#allocation46_spill] sm:$0xff] }
 0x2ea   : > { %v3047_v32 = vsel %vm1874_vm1, %v9634_v13, %v3046_v54  ;;  %v2501_v38 = vsel %vm1874_vm1, %v9638_v46, %v9636_v50  ;;  %v9642_v39 = vrot.slane %v9641_v24, 2  ;;  %v9644_v49 = vrot.slane %v9643_v59, 2  ;;  %v9649_v17 = vld [vmem:[#allocation41_spill] sm:$0xff]  ;;  %v9655_v46 = vld [vmem:[#allocation15_spill] sm:$0xff] }
 0x2eb   : > { %v3123_v37 = vadd.f32 %v3047_v32, %v2879_v5  ;;  %v3291_v28 = vsel %vm2119_vm2, %v9640_v40, %v3290_v25  ;;  %v2571_v0 = vadd.f32 %v2501_v38, %v2327_v31  ;;  %v3437_v18 = vmin.f32 %v3405_v27, 6.0  ;;  %v9647_v31 = vld [vmem:[#allocation34_spill] sm:$0xff]  ;;  %v9651_v27 = vld [vmem:[#allocation167_spill] sm:$0xff] }
 0x2ec   : > { %v2745_v54 = vsel %vm2119_vm2, %v9644_v49, %v9642_v39  ;;  %v3056_v61 = vrot.slane %v2933_v20, 1  ;;  %v3300_v55 = vrot.slane %v3177_v34, 2  ;;  %v2018_v11 = vadd.f32 %v1954_v51, %v1773_v23 }
 0x2ed   : > { %v3367_v53 = vadd.f32 %v3291_v28, %v3123_v37  ;;  %v2815_v33 = vadd.f32 %v2745_v54, %v2571_v0  ;;  %v2851_v44 = vmul.f32 %v5452_v8, %v6818_v58  ;;  %v9646_v43 = vrot.slane %v9645_v1, 2  ;;  %3530 = vrot.lane.b32.xlu1 %v3437_v18, %s4660_s30  ;;  %v3497_v28 = vpop.permute.xlu1 %3496  ;;  %v9658_v18 = vld [vmem:[#allocation74_spill] sm:$0xff] }
 0x2ee   : > { %v3066_v14 = vrot.slane %v8035_v35, 1  ;;  %v3617_v20 = vcombine.low %v8046_v29, %v8074_v60  ;;  %v2299_v5 = vmul.f32 %v5440_v62, %v6848_v16  ;;  %v8254_v8 = vsub.s32 %v3605_v45, %v9647_v31 }
 0x2ef   : > { %v2199_v25 = vsel %vm2119_vm2, %v2196_v57, %v9646_v43  ;;  %v3399_v58 = vmax.f32 %v3367_v53, 0.0  ;;  %v3579_v26 = vsel %vm3568_vm3, %v9648_v19, %v3493_v47  ;;  %v2883_v57 = vadd.f32 %v2851_v44, %v2815_v33 }
 0x2f0   : > { %v2263_v34 = vadd.f32 %v2199_v25, %v2018_v11  ;;  %v9650_v51 = vrot.slane %v9649_v17, 1  ;;  %v9652_v30 = vrot.slane %v9651_v27, 2  ;;  %v3583_v62 = vsel %vm3568_vm3, %v9653_v12, %v3501_v36 }
 0x2f1   : > { %v3431_v16 = vmin.f32 %v3399_v58, 6.0  ;;  %v9654_v50 = vrot.slane %v6975_v48, 1  ;;  %v3569_v38 = vsel %vm3568_vm3, %v9655_v46, %v8168_v10  ;;  %v4662_v23 = vmov 1934713408  }
 0x2f2   : > { %v3057_v35 = vsel %vm1874_vm1, %v9650_v51, %v3056_v61  ;;  %v3301_v13 = vsel %vm2119_vm2, %v9652_v30, %v3300_v55  ;;  %v2331_v32 = vadd.f32 %v2299_v5, %v2263_v34  ;;  %v3668_v37 = vunpack.c.l.s4 %v4662_v23  ;;  %v9659_v61 = vld [vmem:[#allocation90_spill] sm:$0xff]  ;;  %v3505_v30 = vpop.permute.xlu1 %3504 }
 0x2f3   : > { %v3127_v45 = vadd.f32 %v3057_v35, %v2883_v57  ;;  %v2511_v47 = vsel %vm1874_vm1, %v9654_v50, %v2510_v2  ;;  %v3573_v40 = vsel %vm3568_vm3, %v9656_v9, %v3481_v22  ;;  %3518 = vrot.lane.b32.xlu0 %v3431_v16, %s4660_s30  ;;  %v2755_v48 = vsel %vm2119_vm2, %v2752_v41, %v2754_v42 }
 0x2f4   : > { %v2575_v52 = vadd.f32 %v2511_v47, %v2331_v32  ;;  %v3649_v63 = vcombine.low %v3579_v26, %v3583_v62  ;;  %v3601_v2 = vcombine.low %v3569_v38, %v3573_v40  ;;  %v3310_v24 = vrot.slane %v8042_v21, 2 }
 0x2f5   : > { %v3371_v0 = vadd.f32 %v3301_v13, %v3127_v45  ;;  %v9657_v39 = vrot.slane %v7160_v6, 1  ;;  %v3669_v22 = vunpack.c.0.s8 %v3668_v37  ;;  %v3577_v15 = vsel %vm3568_vm3, %v9658_v18, %v3489_v56  ;;  %v9664_v18 = vld [vmem:[#allocation18_spill] sm:$0xff] }
 0x2f6   : > { %v2819_v10 = vadd.f32 %v2755_v48, %v2575_v52  ;;  %v3609_v54 = vrot.slane %v3601_v2, %v8254_v8  ;;  %v3581_v3 = vsel %vm3568_vm3, %v9659_v61, %v3497_v28  ;;  %v3625_v41 = vrot.slane %v3617_v20, %v8254_v8  ;;  %v3513_v45 = vpop.permute.xlu1 %3512  ;;  %v9661_v48 = vld [vmem:[#allocation21_spill] sm:$0xff]  ;;  %v9665_v61 = vld [vmem:[#allocation35_spill] sm:$0xff] }
 0x2f7   : > { %v3067_v59 = vsel %vm1874_vm1, %v9657_v39, %v3066_v14  ;;  %v3403_v49 = vmax.f32 %v3371_v0, 0.0  ;;  %v3633_v21 = vcombine.low %v3577_v15, %v3581_v3  ;;  %v3657_v6 = vrot.slane %v3649_v63, %v8254_v8  ;;  %v9663_v39 = vld [vmem:[#allocation106_spill] sm:$0xff] }
 0x2f8   : > { %v2887_v42 = vadd.f32 %v8027_v4, %v2819_v10  ;;  %v8295_v53 = vsub.s32 %v3669_v22, %v9647_v31  ;;  %v3665_v33 = vcombine.low %v3609_v54, %v3625_v41  ;;  %v9660_v56 = vrot.slane %v7174_v7, 2 }
 0x2f9   : > { %v3435_v55 = vmin.f32 %v3403_v49, 6.0  ;;  %v3641_v44 = vrot.slane %v3633_v21, %v8254_v8  ;;  %v3634_v25 = vcombine.high %v3577_v15, %v3581_v3  ;;  %v3650_v14 = vcombine.high %v3579_v26, %v3583_v62 }
 0x2fa   : > { %v3131_v11 = vadd.f32 %v3067_v59, %v2887_v42  ;;  %v3311_v1 = vsel %vm2119_vm2, %v9660_v56, %v3310_v24  ;;  %v3602_v20 = vcombine.high %v3569_v38, %v3573_v40  ;;  %v3666_v5 = vcombine.high %v3609_v54, %v3625_v41  ;;  %v3509_v38 = vpop.permute.xlu0 %3508  ;;  %v3521_v37 = vpop.permute.xlu1 %3520  ;;  %v9662_v24 = vld [vmem:[#allocation26_spill] sm:$0xff]  ;;  %v9666_v42 = vld [vmem:[#allocation19_spill] sm:$0xff] }
 0x2fb   : > { %3526 = vrot.lane.b32.xlu0 %v3435_v55, %s4660_s30  ;;  %v3697_v4 = vcombine.low %v3641_v44, %v3657_v6  ;;  %v3698_v36 = vcombine.high %v3641_v44, %v3657_v6  ;;  %v8303_v31 = vrot.slane %v3665_v33, %v8295_v53  ;;  %v3618_v19 = vcombine.high %v8046_v29, %v8074_v60  ;;  %v9667_v33 = vld [vmem:[#allocation32_spill] sm:$0xff]  ;;  %v9668_v56 = vld [vmem:[#allocation7_spill] sm:$0xff] }
 0x2fc   : > { %v3375_v43 = vadd.f32 %v3311_v1, %v3131_v11  ;;  %v3648_v57 = vrot.slane %v3634_v25, %v8254_v8  ;;  %v3664_v51 = vrot.slane %v3650_v14, %v8254_v8  ;;  %v3616_v35 = vrot.slane %v3602_v20, %v8254_v8 }
 0x2fd   : > { %v8306_v58 = vrot.slane %v3697_v4, %v8295_v53  ;;  %v3712_v17 = vrot.slane %v3698_v36, %v8295_v53  ;;  %v3680_v27 = vrot.slane %v3666_v5, %v8295_v53  ;;  %v3632_v29 = vrot.slane %v3618_v19, %v8254_v8 }
 0x2fe   : > { %v3407_v34 = vmax.f32 %v3375_v43, 0.0  ;;  %v3713_v60 = vcombine.low %v3648_v57, %v3664_v51  ;;  %v3714_v50 = vcombine.high %v3648_v57, %v3664_v51  ;;  %v3517_v28 = vpop.permute.xlu0 %3516  ;;  %v3589_v63 = vsel %vm3568_vm3, %v9661_v48, %v3513_v45  ;;  %v3529_v2 = vpop.permute.xlu1 %3528 }
 0x2ff   : > { %v3730_v26 = vcombine.high %v8303_v31, %v8306_v58  ;;  %v3731_v13 = vcombine.low %v3680_v27, %v3712_v17  ;;  %v3681_v32 = vcombine.low %v3616_v35, %v3632_v29  ;;  %v3732_v62 = vcombine.high %v3680_v27, %v3712_v17 }
 0x300   : > { %v3439_v7 = vmin.f32 %v3407_v34, 6.0  ;;  %v3721_v12 = vrot.slane %v3713_v60, %v8295_v53  ;;  %v3682_v52 = vcombine.high %v3616_v35, %v3632_v29  ;;  %v3729_v46 = vcombine.low %v8303_v31, %v8306_v58 }
 0x301   : > { %4147 = vrot.lane.b32.xlu1 %v3730_v26, %s4663_s22  ;;  %v3689_v16 = vrot.slane %v3681_v32, %v8295_v53  ;;  %v3728_v23 = vrot.slane %v3714_v50, %v8295_v53  ;;  %v3591_v10 = vsel %vm3568_vm3, %v9662_v24, %v3517_v28  ;;  %v3585_v59 = vsel %vm3568_vm3, %v9663_v39, %v3505_v30 }
 0x302   : > { %3534 = vrot.lane.b32.xlu0 %v3439_v7, %s4660_s30  ;;  %s4665_s30 = smov 24   ;;  %v3696_v40 = vrot.slane %v3682_v52, %v8295_v53  ;;  %v3525_v22 = vpop.permute.xlu0 %3524  ;;  %v3737_v49 = vcombine.low %v3585_v59, %v3589_v63  ;;  %v3587_v15 = vsel %vm3568_vm3, %v9664_v18, %v3509_v38  ;;  %v3597_v3 = vsel %vm3568_vm3, %v9665_v61, %v3529_v2  ;;  %v9670_v18 = vld [vmem:[#allocation64_spill] sm:$0xff]  ;;  %v9671_v61 = vld [vmem:[#allocation59_spill] sm:$0xff] }
 0x303   : > { %v3733_v47 = vcombine.low %v3689_v16, %v3721_v12  ;;  %v3734_v9 = vcombine.high %v3689_v16, %v3721_v12  ;;  %v3753_v41 = vcombine.low %v3587_v15, %v3591_v10  ;;  %v3593_v21 = vsel %vm3568_vm3, %v9666_v42, %v3521_v37  ;;  %v9672_v42 = vld [vmem:[#allocation16_spill] sm:$0xff] }
 0x304   : > { %v3735_v0 = vcombine.low %v3696_v40, %v3728_v23  ;;  %v3736_v54 = vcombine.high %v3696_v40, %v3728_v23  ;;  %v3745_v55 = vrot.slane %v3737_v49, %v8254_v8  ;;  %v3769_v6 = vcombine.low %v3593_v21, %v3597_v3 }
 0x305   : > { %4155 = vrot.lane.b32.xlu1 %v3731_v13, %s4664_s23  ;;  %v3595_v44 = vsel %vm3568_vm3, %v9667_v33, %v3525_v22  ;;  %v3761_v43 = vrot.slane %v3753_v41, %v8254_v8  ;;  %v3738_v19 = vcombine.high %v3585_v59, %v3589_v63  ;;  %v3770_v17 = vcombine.high %v3593_v21, %v3597_v3  ;;  %v9669_v59 = vld [vmem:[#allocation67_spill] sm:$0xff]  ;;  %v9674_v33 = vld [vmem:[#allocation70_spill] sm:$0xff] }
 0x306   : > { %v3533_v11 = vpop.permute.xlu0 %3532  ;;  %v3777_v36 = vrot.slane %v3769_v6, %v8254_v8  ;;  %v3754_v51 = vcombine.high %v3587_v15, %v3591_v10  ;;  %vm4301_vm0 = vcmask 850944   ;;  %vm4304_vm1 = vcmask 916480  }
 0x307   : > { %v3599_v1 = vsel %vm3568_vm3, %v9668_v56, %v3533_v11  ;;  %v3801_v4 = vcombine.low %v3745_v55, %v3761_v43  ;;  %v3802_v7 = vcombine.high %v3745_v55, %v3761_v43  ;;  %v3752_v30 = vrot.slane %v3738_v19, %v8254_v8  ;;  %v9673_v55 = vld [vmem:[#allocation78_spill] sm:$0xff] }
 0x308   : > { %v3785_v25 = vcombine.low %v3595_v44, %v3599_v1  ;;  %v3786_v20 = vcombine.high %v3595_v44, %v3599_v1  ;;  %v3784_v32 = vrot.slane %v3770_v17, %v8254_v8  ;;  %v3768_v12 = vrot.slane %v3754_v51, %v8254_v8 }
 0x309   : > { %4163 = vrot.lane.b32.xlu1 %v3732_v62, %s4665_s30  ;;  %v8353_v57 = vrot.slane %v3801_v4, %v8295_v53  ;;  %v3816_v13 = vrot.slane %v3802_v7, %v8295_v53  ;;  %vm4307_vm2 = vcmask 982016  }
 0x30a   : > { %v3793_v14 = vrot.slane %v3785_v25, %v8254_v8  ;;  %v3800_v35 = vrot.slane %v3786_v20, %v8254_v8  ;;  %v3817_v45 = vcombine.low %v3752_v30, %v3768_v12  ;;  %v3818_v37 = vcombine.high %v3752_v30, %v3768_v12  ;;  %v3479_v2 = vpop.permute.xlu0 %3478  ;;  %v9675_v25 = vld [vmem:[#allocation71_spill] sm:$0xff] }
 0x30b   : > { %v3572_v3 = vsel %vm3568_vm3, %v9671_v61, %v3479_v2  ;;  %v9677_v61 = vld [vmem:[#allocation39_spill] sm:$0xff] }
 0x30c   : > { %v3833_v34 = vcombine.low %v3777_v36, %v3793_v14  ;;  %v3834_v5 = vcombine.high %v3777_v36, %v3793_v14  ;;  %v3849_v62 = vcombine.low %v3784_v32, %v3800_v35  ;;  %v3825_v52 = vrot.slane %v3817_v45, %v8295_v53  ;;  %v9676_v36 = vld [vmem:[#allocation49_spill] sm:$0xff] }
 0x30d   : > { %4171 = vrot.lane.b32.xlu1 %v3733_v47, %s4666_s8  ;;  %v3850_v38 = vcombine.high %v3784_v32, %v3800_v35 }
 0x30e   : > { %v8356_v26 = vrot.slane %v3833_v34, %v8295_v53  ;;  %v3848_v27 = vrot.slane %v3834_v5, %v8295_v53  ;;  %v3857_v50 = vrot.slane %v3849_v62, %v8295_v53 }
 0x30f   : > { %v3864_v40 = vrot.slane %v3850_v38, %v8295_v53 }
 0x310   : > { %v3866_v29 = vcombine.high %v8353_v57, %v8356_v26  ;;  %v3865_v60 = vcombine.low %v8353_v57, %v8356_v26  ;;  %v3867_v16 = vcombine.low %v3816_v13, %v3848_v27  ;;  %v3868_v47 = vcombine.high %v3816_v13, %v3848_v27 }
 0x311   : > { %4179 = vrot.lane.b32.xlu1 %v3734_v9, %s4667_s10  ;;  %v3869_v23 = vcombine.low %v3825_v52, %v3857_v50  ;;  %v3475_v9 = vpop.permute.xlu1 %3474  ;;  %v3870_v28 = vcombine.high %v3825_v52, %v3857_v50 }
 0x312   : > { %4149 = vrot.lane.b32.xlu0 %v3866_v29, %s4663_s22  ;;  %v3570_v21 = vsel %vm3568_vm3, %v9672_v42, %v3475_v9 }
 0x315   : > { %4187 = vrot.lane.b32.xlu1 %v3735_v0, %s4668_s12  ;;  %v3832_v0 = vrot.slane %v3818_v37, %v8295_v53  ;;  %v3483_v63 = vpop.permute.xlu1 %3482 }
 0x316   : > { %4157 = vrot.lane.b32.xlu0 %v3867_v16, %s4664_s23  ;;  %v3574_v15 = vsel %vm3568_vm3, %v9670_v18, %v3483_v63  ;;  %s4676_s23 = smov 112  }
 0x317   : > { %v3871_v48 = vcombine.low %v3832_v0, %v3864_v40  ;;  %v3872_v24 = vcombine.high %v3832_v0, %v3864_v40  ;;  %v3873_v11 = vcombine.low %v3570_v21, %v3574_v15  ;;  %v3874_v62 = vcombine.high %v3570_v21, %v3574_v15  ;;  %v9678_v21 = vld [vmem:[#allocation33_spill] sm:$0xff] }
 0x319   : > { %4195 = vrot.lane.b32.xlu1 %v3736_v54, %s4669_s15  ;;  %v3491_v10 = vpop.permute.xlu1 %3490  ;;  %v3881_v20 = vrot.slane %v3873_v11, %v8254_v8  ;;  %v3888_v37 = vrot.slane %v3874_v62, %v8254_v8 }
 0x31a   : > { %4165 = vrot.lane.b32.xlu0 %v3868_v47, %s4665_s30  ;;  %v3578_v44 = vsel %vm3568_vm3, %v9674_v33, %v3491_v10  ;;  %s4677_s30 = smov 120  }
 0x31d   : > { %v3499_v49 = vpop.permute.xlu1 %3498 }
 0x31e   : > { %4173 = vrot.lane.b32.xlu0 %v3869_v23, %s4666_s8  ;;  %v3582_v6 = vsel %vm3568_vm3, %v9673_v55, %v3499_v49  ;;  %s386_s8 = sand.u32 1, %s4638_s25  }
 0x31f   : > { %v3905_v1 = vcombine.low %v3578_v44, %v3582_v6  ;;  %v3906_v12 = vcombine.high %v3578_v44, %v3582_v6  ;;  %v9679_v6 = vld [vmem:[#allocation55_spill] sm:$0xff] }
 0x320   : > { %v3487_v39 = vpop.permute.xlu0 %3486 }
 0x321   : > { %v3576_v22 = vsel %vm3568_vm3, %v9669_v59, %v3487_v39  ;;  %v3913_v19 = vrot.slane %v3905_v1, %v8254_v8  ;;  %v3920_v23 = vrot.slane %v3906_v12, %v8254_v8 }
 0x322   : > { %4181 = vrot.lane.b32.xlu0 %v3870_v28, %s4667_s10  ;;  %v3889_v41 = vcombine.low %v3572_v3, %v3576_v22  ;;  %v3890_v13 = vcombine.high %v3572_v3, %v3576_v22  ;;  %s4457_s10 = sshll.u32 %s386_s8, 4 }
 0x324   : > { %v3897_v56 = vrot.slane %v3889_v41, %v8254_v8  ;;  %v3904_v52 = vrot.slane %v3890_v13, %v8254_v8 }
 0x326   : > { %4189 = vrot.lane.b32.xlu0 %v3871_v48, %s4668_s12  ;;  %v3937_v5 = vcombine.low %v3881_v20, %v3897_v56  ;;  %v3938_v32 = vcombine.high %v3881_v20, %v3897_v56  ;;  %v3953_v28 = vcombine.low %v3888_v37, %v3904_v52  ;;  %v3954_v49 = vcombine.high %v3888_v37, %v3904_v52  ;;  %v9680_v56 = vld [vmem:[#allocation51_spill] sm:$0xff]  ;;  %s8480_s12 = scalar_lea.vmem [#allocation2], %s4457_s10 }
 0x328   : > { %v3945_v51 = vrot.slane %v3937_v5, %v8295_v53  ;;  %v3952_v38 = vrot.slane %v3938_v32, %v8295_v53  ;;  %v3968_v15 = vrot.slane %v3954_v49, %v8295_v53 }
 0x329   : > { %v3507_v47 = vpop.permute.xlu1 %3506 }
 0x32a   : > { %4197 = vrot.lane.b32.xlu0 %v3872_v24, %s4669_s15  ;;  %v3961_v24 = vrot.slane %v3953_v28, %v8295_v53  ;;  %v3586_v1 = vsel %vm3568_vm3, %v9680_v56, %v3507_v47  ;;  %s4328_s15 = sshll.u32 %s8480_s12, 4  ;;  %s8500_s15 = int_to_ptr.vmem [resolvable:$true] %s4328_s15 }
 0x330   : > { %v3495_v54 = vpop.permute.xlu0 %3494 }
 0x331   : > { %v3580_v4 = vsel %vm3568_vm3, %v9675_v25, %v3495_v54 }
 0x339   : > { %v3515_v0 = vpop.permute.xlu1 %3514 }
 0x33a   : > { %v3590_v55 = vsel %vm3568_vm3, %v9678_v21, %v3515_v0 }
 0x33b   : > { %v4010_v37 = vcombine.high %v3586_v1, %v3590_v55 }
 0x341   : > { %v3503_v43 = vpop.permute.xlu0 %3502 }
 0x342   : > { %v3584_v14 = vsel %vm3568_vm3, %v9676_v36, %v3503_v43  ;;  %v9681_v43 = vld [vmem:[#allocation148_spill] sm:$0xff]  ;;  %v9682_v36 = vld [vmem:[#allocation126_spill] sm:$0xff] }
 0x343   : > { %v3921_v34 = vcombine.low %v3580_v4, %v3584_v14  ;;  %v3922_v27 = vcombine.high %v3580_v4, %v3584_v14  ;;  %v4009_v4 = vcombine.low %v3586_v1, %v3590_v55 }
 0x345   : > { %v3929_v7 = vrot.slane %v3921_v34, %v8254_v8  ;;  %v3936_v16 = vrot.slane %v3922_v27, %v8254_v8  ;;  %v4017_v27 = vrot.slane %v4009_v4, %v8254_v8 }
 0x347   : > { %v3969_v17 = vcombine.low %v3913_v19, %v3929_v7  ;;  %v3970_v29 = vcombine.high %v3913_v19, %v3929_v7  ;;  %v3985_v9 = vcombine.low %v3920_v23, %v3936_v16  ;;  %v3986_v10 = vcombine.high %v3920_v23, %v3936_v16  ;;  %v9683_v7 = vld [vmem:[#allocation136_spill] sm:$0xff] }
 0x349   : > { %v3977_v35 = vrot.slane %v3969_v17, %v8295_v53  ;;  %v3984_v45 = vrot.slane %v3970_v29, %v8295_v53  ;;  %v3993_v63 = vrot.slane %v3985_v9, %v8295_v53  ;;  %v4000_v54 = vrot.slane %v3986_v10, %v8295_v53 }
 0x34b   : > { %v4001_v30 = vcombine.low %v3945_v51, %v3977_v35  ;;  %v4002_v50 = vcombine.high %v3945_v51, %v3977_v35  ;;  %v4003_v40 = vcombine.low %v3952_v38, %v3984_v45  ;;  %v4004_v2 = vcombine.high %v3952_v38, %v3984_v45  ;;  %v9684_v51 = vld [vmem:[#allocation160_spill] sm:$0xff] }
 0x34c   : > { %v4005_v39 = vcombine.low %v3961_v24, %v3993_v63  ;;  %v4006_v18 = vcombine.high %v3961_v24, %v3993_v63  ;;  %v4007_v33 = vcombine.low %v3968_v15, %v4000_v54  ;;  %v4008_v20 = vcombine.high %v3968_v15, %v4000_v54 }
 0x34d   : > { %4203 = vrot.lane.b32.xlu1 %v4001_v30, %s4670_s16 }
 0x351   : > { %4211 = vrot.lane.b32.xlu1 %v4002_v50, %s4671_s17  ;;  %v3523_v59 = vpop.permute.xlu1 %3522 }
 0x352   : > { %v3594_v14 = vsel %vm3568_vm3, %v9682_v36, %v3523_v59 }
 0x355   : > { %4219 = vrot.lane.b32.xlu1 %v4003_v40, %s4672_s18 }
 0x359   : > { %v3511_v48 = vpop.permute.xlu0 %3510  ;;  %4227 = vrot.lane.b32.xlu1 %v4004_v2, %s4673_s19  ;;  %v4024_v2 = vrot.slane %v4010_v37, %v8254_v8 }
 0x35a   : > { %v3588_v11 = vsel %vm3568_vm3, %v9679_v6, %v3511_v48 }
 0x35d   : > { %4235 = vrot.lane.b32.xlu1 %v4005_v39, %s4674_s20 }
 0x35f   : > { %v3531_v41 = vpop.permute.xlu1 %3530 }
 0x360   : > { %v3598_v25 = vsel %vm3568_vm3, %v9681_v43, %v3531_v41 }
 0x361   : > { %4243 = vrot.lane.b32.xlu1 %v4006_v18, %s4675_s21  ;;  %v4041_v5 = vcombine.low %v3594_v14, %v3598_v25  ;;  %v4042_v23 = vcombine.high %v3594_v14, %v3598_v25 }
 0x363   : > { %v4049_v13 = vrot.slane %v4041_v5, %v8254_v8  ;;  %v4056_v63 = vrot.slane %v4042_v23, %v8254_v8 }
 0x365   : > { %v3519_v22 = vpop.permute.xlu0 %3518  ;;  %4251 = vrot.lane.b32.xlu1 %v4007_v33, %s4676_s23 }
 0x366   : > { %v3592_v3 = vsel %vm3568_vm3, %v9677_v61, %v3519_v22 }
 0x367   : > { %v4025_v44 = vcombine.low %v3588_v11, %v3592_v3  ;;  %v4026_v52 = vcombine.high %v3588_v11, %v3592_v3 }
 0x369   : > { %v4033_v34 = vrot.slane %v4025_v44, %v8254_v8  ;;  %4259 = vrot.lane.b32.xlu1 %v4008_v20, %s4677_s30  ;;  %v4040_v0 = vrot.slane %v4026_v52, %v8254_v8 }
 0x36b   : > { %v4073_v30 = vcombine.low %v4017_v27, %v4033_v34  ;;  %v4074_v38 = vcombine.high %v4017_v27, %v4033_v34  ;;  %v4089_v39 = vcombine.low %v4024_v2, %v4040_v0  ;;  %v4090_v15 = vcombine.high %v4024_v2, %v4040_v0 }
 0x36d   : > { %v3527_v42 = vpop.permute.xlu0 %3526  ;;  %v4081_v62 = vrot.slane %v4073_v30, %v8295_v53  ;;  %v4088_v48 = vrot.slane %v4074_v38, %v8295_v53  ;;  %v4097_v49 = vrot.slane %v4089_v39, %v8295_v53  ;;  %v4104_v3 = vrot.slane %v4090_v15, %v8295_v53 }
 0x36e   : > { %v3596_v17 = vsel %vm3568_vm3, %v9683_v7, %v3527_v42 }
 0x373   : > { %v4148_v21 = vpop.permute.xlu1 %4147 }
 0x374   : > { %v3535_v19 = vpop.permute.xlu0 %3534  ;;  %v4266_v20 = vsel %vm4265_vm4, %v3729_v46, %v4148_v21 }
 0x375   : > { %v3600_v35 = vsel %vm3568_vm3, %v9684_v51, %v3535_v19 }
 0x376   : > { %v4057_v29 = vcombine.low %v3596_v17, %v3600_v35  ;;  %v4058_v45 = vcombine.high %v3596_v17, %v3600_v35 }
 0x377   : > { %v4156_v55 = vpop.permute.xlu1 %4155 }
 0x378   : > { %v4065_v32 = vrot.slane %v4057_v29, %v8254_v8  ;;  %v4072_v9 = vrot.slane %v4058_v45, %v8254_v8  ;;  %v4269_v34 = vsel %vm4268_vm5, %v4266_v20, %v4156_v55 }
 0x37a   : > { %v4105_v12 = vcombine.low %v4049_v13, %v4065_v32  ;;  %v4106_v50 = vcombine.high %v4049_v13, %v4065_v32  ;;  %v4121_v24 = vcombine.low %v4056_v63, %v4072_v9  ;;  %v4122_v54 = vcombine.high %v4056_v63, %v4072_v9 }
 0x37b   : > { %v4164_v6 = vpop.permute.xlu1 %4163 }
 0x37c   : > { %v4113_v16 = vrot.slane %v4105_v12, %v8295_v53  ;;  %v4120_v40 = vrot.slane %v4106_v50, %v8295_v53  ;;  %v4129_v59 = vrot.slane %v4121_v24, %v8295_v53  ;;  %v4136_v61 = vrot.slane %v4122_v54, %v8295_v53 }
 0x37d   : > { %v4272_v19 = vsel %vm4271_vm6, %v4269_v34, %v4164_v6 }
 0x37e   : > { %v4137_v47 = vcombine.low %v4081_v62, %v4113_v16  ;;  %v4138_v28 = vcombine.high %v4081_v62, %v4113_v16  ;;  %v4139_v10 = vcombine.low %v4088_v48, %v4120_v40  ;;  %v4140_v22 = vcombine.high %v4088_v48, %v4120_v40 }
 0x37f   : > { %v4141_v18 = vcombine.low %v4097_v49, %v4129_v59  ;;  %v4142_v8 = vcombine.high %v4097_v49, %v4129_v59  ;;  %v4143_v41 = vcombine.low %v4104_v3, %v4136_v61  ;;  %v4144_v42 = vcombine.high %v4104_v3, %v4136_v61  ;;  %v4172_v11 = vpop.permute.xlu1 %4171 }
 0x380   : > { %4205 = vrot.lane.b32.xlu0 %v4137_v47, %s4670_s16  ;;  %v4275_v17 = vsel %vm4274_vm7, %v4272_v19, %v4172_v11  ;;  %s4476_s16 = sshll.u32 %s4646_s27, 8  ;;  %s8513_s27 = scalar_lea.sflag [#allocation3], %s386_s8 }
 0x383   : > { %v4180_v33 = vpop.permute.xlu1 %4179 }
 0x384   : > { %4213 = vrot.lane.b32.xlu0 %v4138_v28, %s4671_s17  ;;  %v4150_v1 = vpop.permute.xlu0 %4149  ;;  %v4278_v51 = vsel %vm4277_vm8, %v4275_v17, %v4180_v33 }
 0x385   : > { %v4267_v40 = vsel %vm4265_vm4, %v3865_v60, %v4150_v1 }
 0x387   : > { %v4188_v44 = vpop.permute.xlu1 %4187 }
 0x388   : > { %4221 = vrot.lane.b32.xlu0 %v4139_v10, %s4672_s18  ;;  %v4158_v4 = vpop.permute.xlu0 %4157  ;;  %v4281_v31 = vsel %vm4280_vm9, %v4278_v51, %v4188_v44 }
 0x389   : > { %v4270_v28 = vsel %vm4268_vm5, %v4267_v40, %v4158_v4 }
 0x38b   : > { %v4196_v56 = vpop.permute.xlu1 %4195 }
 0x38c   : > { %4229 = vrot.lane.b32.xlu0 %v4140_v22, %s4673_s19  ;;  %v4166_v36 = vpop.permute.xlu0 %4165  ;;  %v4284_v46 = vsel %vm4283_vm10, %v4281_v31, %v4196_v56  ;;  %s8507_s19 = scalar_lea.hbm %s8566_s7, %s4476_s16 }
 0x38d   : > { %v4273_v48 = vsel %vm4271_vm6, %v4270_v28, %v4166_v36 }
 0x390   : > { %4237 = vrot.lane.b32.xlu0 %v4141_v18, %s4674_s20  ;;  %v4174_v7 = vpop.permute.xlu0 %4173  ;;  %s4578_s20 = scalar_lea.vmem %s8500_s15, 256 }
 0x391   : > { %v4276_v63 = vsel %vm4274_vm7, %v4273_v48, %v4174_v7  ;;  %p4579_p12 = scmp.ne.s32.totalorder %s8500_s15, %s4578_s20 }
 0x393   : > { %p4580_p13 = pnand %p4579_p12, %p4760_p4 }
 0x394   : > { %4245 = vrot.lane.b32.xlu0 %v4142_v8, %s4675_s21  ;;  %v4182_v27 = vpop.permute.xlu0 %4181  ;;  %s4678_s21 = smov [#allocation2]  }
 0x395   : > { %v4279_v2 = vsel %vm4277_vm8, %v4276_v63, %v4182_v27  ;;  %p4581_p0 = pneg %p4580_p13 }
 0x398   : > { %4253 = vrot.lane.b32.xlu0 %v4143_v41, %s4676_s23  ;;  %v4190_v50 = vpop.permute.xlu0 %4189  ;;  %s4582_s23 = sshll.u32 %s4678_s21, 4  ;;  %s4583_s23 = int_to_ptr.vmem [resolvable:$false] %s4582_s23 }
 0x399   : > { %v4282_v24 = vsel %vm4280_vm9, %v4279_v2, %v4190_v50  ;;  %p4585_p1 = scmp.lt.s32.totalorder %s8500_s15, %s4583_s23 }
 0x39c   : > { %4261 = vrot.lane.b32.xlu0 %v4144_v42, %s4677_s30  ;;  %v4198_v52 = vpop.permute.xlu0 %4197  ;;  %s4584_s30 = scalar_lea.vmem %s4583_s23, 512 }
 0x39d   : > { %v4285_v39 = vsel %vm4283_vm10, %v4282_v24, %v4198_v52  ;;  %p4586_p2 = scmp.lt.s32.totalorder %s4584_s30, %s4578_s20 }
 0x39f   : > { %p4587_p3 = por %p4586_p2, %p4585_p1 }
 0x3a1   : > { %p4588_p5 = pnand %p4587_p3, %p4581_p0 }
 0x3bf   : > { %v4204_v43 = vpop.permute.xlu1 %4203 }
 0x3c0   : > { %v4287_v35 = vsel %vm4286_vm11, %v4284_v46, %v4204_v43 }
 0x3c3   : > { %v4212_v25 = vpop.permute.xlu1 %4211 }
 0x3c4   : > { %v4290_v29 = vsel %vm4289_vm12, %v4287_v35, %v4212_v25 }
 0x3c7   : > { %v4220_v53 = vpop.permute.xlu1 %4219 }
 0x3c8   : > { %v4293_v30 = vsel %vm4292_vm13, %v4290_v29, %v4220_v53 }
 0x3cb   : > { %v4228_v14 = vpop.permute.xlu1 %4227 }
 0x3cc   : > { %v4296_v32 = vsel %vm4295_vm14, %v4293_v30, %v4228_v14 }
 0x3cf   : > { %v4236_v5 = vpop.permute.xlu1 %4235 }
 0x3d0   : > { %v4299_v12 = vsel %vm4298_vm15, %v4296_v32, %v4236_v5 }
 0x3d3   : > { %v4244_v58 = vpop.permute.xlu1 %4243 }
 0x3d4   : > { %v4302_v62 = vsel %vm4301_vm0, %v4299_v12, %v4244_v58 }
 0x3d7   : > { %v4252_v13 = vpop.permute.xlu1 %4251 }
 0x3d8   : > { %v4305_v16 = vsel %vm4304_vm1, %v4302_v62, %v4252_v13 }
 0x3db   : > { %v4260_v45 = vpop.permute.xlu1 %4259 }
 0x3dc   : > { %v4308_v47 = vsel %vm4307_vm2, %v4305_v16, %v4260_v45 }
 0x3dd   : > { %4310 = vst [vmem:[%s8480_s12] sm:$0xff] %v4308_v47 }
 0x3f2   : > { %v4206_v38 = vpop.permute.xlu0 %4205 }
 0x3f3   : > { %v4288_v57 = vsel %vm4286_vm11, %v4285_v39, %v4206_v38 }
 0x3f6   : > { %v4214_v23 = vpop.permute.xlu0 %4213 }
 0x3f7   : > { %v4291_v26 = vsel %vm4289_vm12, %v4288_v57, %v4214_v23 }
 0x3fa   : > { %v4222_v37 = vpop.permute.xlu0 %4221 }
 0x3fb   : > { %v4294_v60 = vsel %vm4292_vm13, %v4291_v26, %v4222_v37 }
 0x3fe   : > { %v4230_v9 = vpop.permute.xlu0 %4229 }
 0x3ff   : > { %v4297_v22 = vsel %vm4295_vm14, %v4294_v60, %v4230_v9 }
 0x402   : > { %v4238_v0 = vpop.permute.xlu0 %4237 }
 0x403   : > { %v4300_v49 = vsel %vm4298_vm15, %v4297_v22, %v4238_v0 }
 0x406   : > { %v4246_v10 = vpop.permute.xlu0 %4245 }
 0x407   : > { %v4303_v54 = vsel %vm4301_vm0, %v4300_v49, %v4246_v10 }
 0x40a   : > { %v4254_v59 = vpop.permute.xlu0 %4253 }
 0x40b   : > { %v4306_v18 = vsel %vm4304_vm1, %v4303_v54, %v4254_v59 }
 0x40e   : > { %v4262_v15 = vpop.permute.xlu0 %4261 }
 0x40f   : > { %v4309_v61 = vsel %vm4307_vm2, %v4306_v18, %v4262_v15 }
 0x410   : > { %4311 = vst [vmem:[%s8480_s12 + $0x8] sm:$0xff] %v4309_v61 }
 0x411   : > { %4591 = shalt.err (!%p4588_p5)
}
 0x412   : > { %s4592_s8 = scalar_lea.hbm %s8507_s19, 256  ;;  %s4596_s16 = scalar_lea.hbm %s8566_s7, 512 }
 0x413   : > { %p4593_p6 = scmp.ne.s32.totalorder %s8507_s19, %s4592_s8  ;;  %p4597_p10 = scmp.lt.s32.totalorder %s8507_s19, %s8566_s7 }
 0x414   : > { %p4598_p11 = scmp.lt.s32.totalorder %s4596_s16, %s4592_s8 }
 0x415   : > { %p4594_p7 = pnand %p4593_p6, %p4760_p4 }
 0x416   : > { %p4599_p12 = por %p4598_p11, %p4597_p10 }
 0x417   : > { %p4595_p9 = pneg %p4594_p7 }
 0x419   : > { %p4600_p13 = pnand %p4599_p12, %p4595_p9 }
 0x41b   : > { %4603 = shalt.err (!%p4600_p13)
}
 0x41c   : > { %s4679_s20 = smov 128  }
 0x41d   : > { %4478 = dma.vmem_to_hbm [thread:$0]  (%p4760_p4), %s8500_s15, 256, %s8507_s19, %s8513_s27, %s4679_s20, %s4679_s20, %s4663_s22  }
 0x41e PF: > { %p4484_p0 = scmp.ge.s32.totalorder %s4654_s29, 2  ;;  %s4343_s21 = sand.u32 1, %s4634_s24  }
 0x41f   : > { %s4344_s23 = scalar_lea.sflag [#allocation3], %s4343_s21 }
 0x420   : > { %p4481_p1 = pnand %p4484_p0, %p4767_p8 }
 0x422   : > { %p4482_p2 = pneg %p4481_p1 }
 0x424   : > { %4629 = dma.done.wait (%p4482_p2), %s4344_s23, 256  }
 0x425   : > { %4631 = vsyncadd (%p4482_p2), %s4344_s23, 4294967040  ;;  %s20_s29 = sadd.s32 1, %s4654_s29   ;;  %s9685_s24 = smov %s4638_s25 }
 0x426   : > { %p17_p3 = scmp.ge.s32.totalorder %s20_s29, 4   ;;  %s9686_s25 = smov %s4642_s26 }
 0x427   : > { %s9687_s26 = smov %s4773_s14  ;;  %s9688_s27 = smov %s4650_s28 }
 0x428   : > { %s9689_s28 = smov %s9691_s9  ;;  %19 = sbr.rel (!%p17_p3) target bundleno = 4 (0x4), region = 89 }
 0x42d   :  { %4349 = vsyncpa [#allocation3], 1 }
 0x42e   :  { %4351 = vsyncpa [#allocation3 + $0x1], 1 }

</bundles_post_ra>
